<compile_context>
chip_gen: v7x
topology: tpu7x:2x2x1
jax: 0.10.0
libtpu: 0.0.40
codegen_flags: <defaults>
</compile_context>

<pallas_src>
import functools
import numpy as np

import jax
import jax.numpy as jnp
from jax.experimental import pallas as pl
from jax.experimental.pallas import tpu as pltpu

LRELU_SLOPE = 0.1                 # hifigan LRELU_SLOPE
COMPUTE_DTYPE = jnp.bfloat16      # activation / weight streaming dtype (f32 accum)
MAX_TILE = 2048                   # time-tile lanes (multiple of 128)


def _round_up(v, m):
    return -(-v // m) * m


# --------------------------------------------------------------------------
# Fused multi-layer conv1d Pallas kernel
# --------------------------------------------------------------------------
def _make_conv_kernel(cfgs, *, ext, tl, lens, pad_l_suffix, has_halo, has_res,
                      internal_res_off, out_act, out_scale):
    """cfgs: static per-layer dicts {K, dil, lrelu}.  The kernel computes the
    whole layer stack for one (batch, time-tile) grid point."""
    nl = len(cfgs)

    def kernel(*refs):
        it = iter(refs)
        x_ref = next(it)
        halo_ref = next(it) if has_halo else None
        res_ref = next(it) if has_res else None
        wb = [(next(it), next(it)) for _ in range(nl)]
        o_ref = next(it)

        x = x_ref[0]                                           # (C0, tl)
        if has_halo:
            # halo: first `ext` lanes of the next 128-lane chunk of the input
            x = jnp.concatenate([x, halo_ref[0][:, :ext]], axis=1)
        resid = None
        if internal_res_off is not None:
            # raw (pre-lrelu) input window, used for the resblock residual add
            resid = x[:, internal_res_off:internal_res_off + tl].astype(jnp.float32)

        cur, rem = x, ext
        for li, cfg in enumerate(cfgs):
            K, d, slope = cfg['K'], cfg['dil'], cfg['lrelu']
            w_ref, b_ref = wb[li]
            if slope is not None:
                cur = jnp.where(cur >= 0, cur, cur * slope)
            rem -= d * (K - 1)
            out_len = tl + rem
            if K == 1:
                stacked = cur[:, :out_len]
            else:
                # im2col: stack the K dilated taps along sublanes -> ONE matmul
                stacked = jnp.concatenate(
                    [cur[:, t * d:t * d + out_len] for t in range(K)], axis=0)
            cur = jnp.dot(w_ref[...], stacked.astype(w_ref.dtype),
                          preferred_element_type=jnp.float32) + b_ref[...]
            if li + 1 < nl:
                # emulate the NEXT conv's zero padding of this intermediate at
                # the global sequence boundaries (exactness of the fusion)
                g = (pl.program_id(1) * tl - pad_l_suffix[li]
                     + jax.lax.broadcasted_iota(jnp.int32, (1, out_len), 1))
                cur = jnp.where((g >= 0) & (g < lens[li]), cur, 0.0)

        out = cur                                              # (Cout, tl) f32
        if resid is not None:
            out = out + resid
        if has_res:
            out = out + res_ref[0].astype(jnp.float32)
        if out_scale is not None:
            out = out * out_scale
        if out_act == "tanh":
            out = jnp.tanh(out)
        o_ref[...] = out[None].astype(o_ref.dtype)

    return kernel


def conv_stack(x, layers, *, residual=None, internal_residual=False,
               out_act=None, out_scale=None, out_dtype=None, tile=MAX_TILE):
    """Run a stack of 1-D convolutions as a single time-tiled Pallas kernel.

    x: (B, C0, L).  layers: list of dicts with
      w: (Cout, Cin, K)  PyTorch Conv1d weight layout
      b: (Cout,)
      dil, pad_l, pad_r: ints (zero padding applied to this layer's input)
      lrelu: leaky-relu slope applied to this layer's input, or None
    residual: optional (B, Cout_last, Lout) array added in the epilogue.
    internal_residual: add the raw block input (resblock skip) in the epilogue.
    """
    assert tile % 128 == 0
    B, C0, L = x.shape
    nl = len(layers)
    out_dtype = COMPUTE_DTYPE if out_dtype is None else out_dtype

    cfgs, lens, Lc = [], [], L
    for lyr in layers:
        co, ci, K = lyr['w'].shape
        Lc = Lc + lyr['pad_l'] + lyr['pad_r'] - lyr['dil'] * (K - 1)
        lens.append(Lc)
        cfgs.append(dict(K=K, dil=lyr['dil'], lrelu=lyr['lrelu']))
    Lout = lens[-1]
    ext = sum(c['dil'] * (c['K'] - 1) for c in cfgs)
    PL = sum(lyr['pad_l'] for lyr in layers)
    pad_l_suffix = [sum(layers[m]['pad_l'] for m in range(i + 1, nl))
                    for i in range(nl)]
    Cout = layers[-1]['w'].shape[0]
    assert ext <= 128, "halo limited to one extra 128-lane chunk"
    if internal_residual:
        assert PL <= ext and layers[0]['w'].shape[1] == Cout

    tl = min(tile, _round_up(max(Lout, 1), 128))      # 128-dense output lanes
    nt = -(-Lout // tl)
    halo = ext > 0
    Lpad = nt * tl + (128 if halo else 0)
    # single pad per call: conv left-pad + lane-alignment + halo chunk at once
    xpad = jnp.pad(x.astype(COMPUTE_DTYPE),
                   ((0, 0), (0, 0), (PL, Lpad - L - PL)))

    inputs = [xpad]
    in_specs = [pl.BlockSpec((1, C0, tl), lambda b, j: (b, 0, j))]
    if halo:
        hb = tl // 128
        inputs.append(xpad)
        in_specs.append(
            pl.BlockSpec((1, C0, 128), lambda b, j: (b, 0, (j + 1) * hb)))
    if residual is not None:
        assert residual.shape == (B, Cout, Lout)
        rp = jnp.pad(residual.astype(COMPUTE_DTYPE),
                     ((0, 0), (0, 0), (0, nt * tl - Lout)))
        inputs.append(rp)
        in_specs.append(pl.BlockSpec((1, Cout, tl), lambda b, j: (b, 0, j)))
    for lyr in layers:
        co, ci, K = lyr['w'].shape
        # (Cout, K*Cin) matmul weight matching the in-kernel tap stacking order
        wm = jnp.transpose(lyr['w'], (0, 2, 1)).reshape(co, K * ci)
        inputs.append(wm.astype(COMPUTE_DTYPE))
        in_specs.append(pl.BlockSpec((co, K * ci), lambda b, j: (0, 0)))
        inputs.append(lyr['b'].reshape(co, 1).astype(jnp.float32))
        in_specs.append(pl.BlockSpec((co, 1), lambda b, j: (0, 0)))

    kern = _make_conv_kernel(
        cfgs, ext=ext, tl=tl, lens=lens, pad_l_suffix=pad_l_suffix,
        has_halo=halo, has_res=residual is not None,
        internal_res_off=PL if internal_residual else None,
        out_act=out_act, out_scale=out_scale)

    y = pl.pallas_call(
        kern,
        out_shape=jax.ShapeDtypeStruct((B, Cout, nt * tl), out_dtype),
        grid=(B, nt),
        in_specs=in_specs,
        out_specs=pl.BlockSpec((1, Cout, tl), lambda b, j: (b, 0, j)),
        compiler_params=pltpu.CompilerParams(
            dimension_semantics=("parallel", "parallel")),
    )(*inputs)
    return y[:, :, :Lout]


# --------------------------------------------------------------------------
# Polyphase ConvTranspose1d (no zero-stuffing)
# --------------------------------------------------------------------------
def conv_transpose_polyphase(x, w, b, *, stride, padding, lrelu_slope=None):
    """PyTorch ConvTranspose1d(Cin, Cout, K, stride=s, padding=p).  The s
    output phases are folded into the output-channel dim of one stride-1
    Pallas conv on the un-stuffed input, then interleaved."""
    B, Cin, L = x.shape
    Cin_w, Cout, K = w.shape
    assert Cin_w == Cin
    s = stride
    Kmax = -(-K // s)
    wt = jnp.transpose(w, (1, 0, 2))                       # (Cout, Cin, K)
    phases = []
    for r in range(s):
        taps = []
        for t in range(Kmax):
            k = r + t * s
            taps.append(wt[:, :, k] if k < K else jnp.zeros_like(wt[:, :, 0]))
        wr = jnp.stack(taps, axis=-1)                      # (Cout, Cin, Kmax)
        phases.append(jnp.flip(wr, axis=-1))               # correlation form
    w_all = jnp.concatenate(phases, axis=0)                # (s*Cout, Cin, Kmax)
    b_all = jnp.tile(b, (s,))

    Lout = (L - 1) * s - 2 * padding + K
    q_max = (Lout + padding - 1) // s
    pad_r = max(0, q_max + 1 - L)
    yc = conv_stack(x, [dict(w=w_all, b=b_all, dil=1,
                             pad_l=Kmax - 1, pad_r=pad_r, lrelu=lrelu_slope)])
    Lq = L + pad_r
    y = yc.reshape(B, s, Cout, Lq)
    y = jnp.transpose(y, (0, 2, 3, 1)).reshape(B, Cout, Lq * s)
    return y[:, :, padding: padding + Lout]


# --------------------------------------------------------------------------
# Polyphase strided Conv1d (noise convs) with fused `x + x_source` add
# --------------------------------------------------------------------------
def strided_conv_polyphase(har, w, b, *, stride, padding, residual):
    """PyTorch Conv1d(1, Cout, K, stride=s, padding=p) on har (B, 1, Lx).
    Only the kept outputs are computed: the s input phases become input
    channels of a dense stride-1 Pallas conv.  The generator's `x + x_source`
    add is fused into the kernel epilogue via `residual`."""
    B, cin, Lx = har.shape
    assert cin == 1
    Cout, _, K = w.shape
    s = stride
    Lout = (Lx + 2 * padding - K) // s + 1
    if s == 1:
        assert residual.shape == (B, Cout, Lout)
        return conv_stack(har, [dict(w=w, b=b, dil=1, pad_l=padding,
                                     pad_r=padding, lrelu=None)],
                          residual=residual)
    assert Lx % s == 0 and Lout == Lx // s
    xp = jnp.transpose(har.reshape(B, Lx // s, s), (0, 2, 1))   # (B, s, Lx//s)
    t_min = -((padding + s - 1) // s)          # floor(-p / s)
    t_max = (K - 1 - padding) // s             # floor((K-1-p) / s)
    Kp = t_max - t_min + 1
    wp = jnp.zeros((Cout, s, Kp), w.dtype)
    for k in range(K):
        j = k - padding
        wp = wp.at[:, j % s, j // s - t_min].set(w[:, 0, k])
    assert residual.shape == (B, Cout, Lout)
    return conv_stack(xp, [dict(w=wp, b=b, dil=1, pad_l=-t_min, pad_r=t_max,
                                lrelu=None)], residual=residual)


# --------------------------------------------------------------------------
# ResBlock1 (hifigan) — each conv pair is ONE fused Pallas call
# --------------------------------------------------------------------------
def resblock1_fused(x, blk_params, k, dilations, *, extra=None, out_scale=None):
    """xt = c2(lrelu(c1(lrelu(x)))); x = xt + x, per dilation.  `extra` /
    `out_scale` fold the cross-resblock sum and the 1/num_kernels scale into
    the last pair's epilogue."""
    nd = len(dilations)
    for i, d in enumerate(dilations):
        last = i == nd - 1
        layers = [
            dict(w=blk_params['convs1'][i]['w'], b=blk_params['convs1'][i]['b'],
                 dil=d, pad_l=d * (k - 1) // 2, pad_r=d * (k - 1) // 2,
                 lrelu=LRELU_SLOPE),
            dict(w=blk_params['convs2'][i]['w'], b=blk_params['convs2'][i]['b'],
                 dil=1, pad_l=(k - 1) // 2, pad_r=(k - 1) // 2,
                 lrelu=LRELU_SLOPE),
        ]
        x = conv_stack(x, layers, internal_residual=True,
                       residual=extra if last else None,
                       out_scale=out_scale if last else None)
    return x


# --------------------------------------------------------------------------
# SineGen / SourceModuleHnNSF  (phase cumsum + interpolation: JAX glue)
# --------------------------------------------------------------------------
def _interp_linear_align_corners(x, upp):
    # F.interpolate(..., scale_factor=upp, mode='linear', align_corners=True)
    B, T, D = x.shape
    Lout = T * upp
    if T == 1:
        return jnp.repeat(x, upp, axis=1)
    pos = jnp.arange(Lout, dtype=jnp.float32) * (T - 1) / (Lout - 1)
    lo = jnp.minimum(jnp.floor(pos).astype(jnp.int32), T - 2)
    frac = pos - lo.astype(jnp.float32)
    xl = jnp.take(x, lo, axis=1)
    xh = jnp.take(x, lo + 1, axis=1)
    return xl * (1.0 - frac)[None, :, None] + xh * frac[None, :, None]


def sine_gen(f0, upp, sampling_rate, harmonic_num, key,
             sine_amp=0.1, noise_std=0.003, voiced_threshold=0.0):
    B, T = f0.shape
    dim = harmonic_num + 1
    f0e = f0[..., None]                                           # (B, T, 1)
    fn = f0e * jnp.arange(1, dim + 1, dtype=f0.dtype).reshape(1, 1, dim)
    rad_values = (fn / sampling_rate) % 1.0
    k_ini, k_noise = jax.random.split(key)
    # TODO(synk): torch uses torch.rand/randn; replaced with deterministic jax PRNG.
    rand_ini = jax.random.uniform(k_ini, (B, dim), dtype=f0.dtype)
    rand_ini = rand_ini.at[:, 0].set(0.0)
    rad_values = rad_values.at[:, 0, :].add(rand_ini)
    # TODO(synk): torch accumulates the phase in float64; float32 here (TPU default).
    tmp_over_one = jnp.cumsum(rad_values, axis=1) * upp
    tmp_over_one = _interp_linear_align_corners(tmp_over_one, upp)
    rad_values_up = jnp.repeat(rad_values, upp, axis=1)           # nearest
    tmp_over_one = tmp_over_one % 1.0
    wrap = (tmp_over_one[:, 1:, :] - tmp_over_one[:, :-1, :]) < 0
    cumsum_shift = jnp.concatenate(
        [jnp.zeros((B, 1, dim), f0.dtype), jnp.where(wrap, -1.0, 0.0)], axis=1)
    sine_waves = jnp.sin(jnp.cumsum(rad_values_up + cumsum_shift, axis=1)
                         * 2.0 * jnp.pi) * sine_amp
    uv = (f0e > voiced_threshold).astype(f0.dtype)
    uv = jnp.repeat(uv, upp, axis=1)
    noise_amp = uv * noise_std + (1.0 - uv) * sine_amp / 3.0
    noise = noise_amp * jax.random.normal(k_noise, sine_waves.shape, f0.dtype)
    sine_waves = sine_waves * uv + noise
    return sine_waves, uv


# --------------------------------------------------------------------------
# Parameters (deterministic synthetic init, shapes match the torch module)
# --------------------------------------------------------------------------
ATTRS = dict(
    num_mels=8,
    upsample_initial_channel=16,
    upsample_rates=[4, 4],
    upsample_kernel_sizes=[8, 8],
    resblock='1',
    resblock_kernel_sizes=[3, 5],
    resblock_dilation_sizes=[[1, 3], [1, 3]],
    sampling_rate=16000,
)
HARMONIC_NUM = 8


def init_params(key, attrs, harmonic_num=HARMONIC_NUM):
    """Arrays only (jit-friendly pytree); static structure comes from `attrs`."""
    rates, ksz = attrs['upsample_rates'], attrs['upsample_kernel_sizes']
    rk, rd = attrs['resblock_kernel_sizes'], attrs['resblock_dilation_sizes']
    c0, nm = attrs['upsample_initial_channel'], attrs['num_mels']
    kit = iter(jax.random.split(key, 256))

    def w(shape, scale=0.1):
        return scale * jax.random.normal(next(kit), shape, jnp.float32)

    p = {
        'l_linear_w': w((1, harmonic_num + 1, 1), 0.3),   # Linear(9,1) as 1x1 conv
        'l_linear_b': w((1,), 0.1),
        'conv_pre_w': w((c0, nm, 7)),
        'conv_pre_b': w((c0,)),
        'ups': [], 'noise': [], 'res': [],
    }
    ch = c0
    for i, (u, k) in enumerate(zip(rates, ksz)):
        cin, cout = ch, ch // 2
        p['ups'].append({'w': w((cin, cout, k), 0.05), 'b': w((cout,), 0.01)})
        if i + 1 < len(rates):
            s = int(np.prod(rates[i + 1:]))
            p['noise'].append({'w': w((cout, 1, 2 * s)), 'b': w((cout,))})
        else:
            p['noise'].append({'w': w((cout, 1, 1)), 'b': w((cout,))})
        ch = cout
        blocks = []
        for kk, dd in zip(rk, rd):
            blocks.append({
                'convs1': [{'w': w((ch, ch, kk)), 'b': w((ch,))} for _ in dd],
                'convs2': [{'w': w((ch, ch, kk)), 'b': w((ch,))} for _ in dd],
            })
        p['res'].append(blocks)
    p['conv_post_w'] = w((1, ch, 7), 0.05)
    p['conv_post_b'] = w((1,))
    return p


# --------------------------------------------------------------------------
# Full forward: NSFHiFiGANONNX.forward(mel, f0)
# --------------------------------------------------------------------------
def nsf_hifigan_forward(params, mel, f0, noise_key, attrs=ATTRS,
                        harmonic_num=HARMONIC_NUM):
    rates, ksz = attrs['upsample_rates'], attrs['upsample_kernel_sizes']
    rk, rd = attrs['resblock_kernel_sizes'], attrs['resblock_dilation_sizes']
    num_kernels = len(rk)
    upp = int(np.prod(rates))

    # mel.transpose(1, 2) * 2.30259
    x = jnp.transpose(mel, (0, 2, 1)) * 2.30259                   # (B, num_mels, T)

    # SourceModuleHnNSF: SineGen -> Linear(9,1) -> tanh, fused as 1x1 Pallas conv.
    sine_wavs, _ = sine_gen(f0, upp, attrs['sampling_rate'], harmonic_num, noise_key)
    har = conv_stack(jnp.transpose(sine_wavs, (0, 2, 1)),
                     [dict(w=params['l_linear_w'], b=params['l_linear_b'],
                           dil=1, pad_l=0, pad_r=0, lrelu=None)],
                     out_act='tanh')                              # (B, 1, T*upp)

    x = conv_stack(x, [dict(w=params['conv_pre_w'], b=params['conv_pre_b'],
                            dil=1, pad_l=3, pad_r=3, lrelu=None)])

    for i, (u, k) in enumerate(zip(rates, ksz)):
        # F.leaky_relu(x, 0.1) is fused into the polyphase transposed conv.
        x = conv_transpose_polyphase(x, params['ups'][i]['w'], params['ups'][i]['b'],
                                     stride=u, padding=(k - u) // 2,
                                     lrelu_slope=LRELU_SLOPE)
        if i + 1 < len(rates):
            s_noise = int(np.prod(rates[i + 1:]))
            pad_noise = s_noise // 2
        else:
            s_noise, pad_noise = 1, 0
        # noise conv on the harmonic source, `x + x_source` fused in epilogue
        x = strided_conv_polyphase(har, params['noise'][i]['w'],
                                   params['noise'][i]['b'],
                                   stride=s_noise, padding=pad_noise, residual=x)
        blocks = params['res'][i]
        acc, x_next = None, x
        for bi, blk in enumerate(blocks):
            last = bi == len(blocks) - 1
            y = resblock1_fused(x, blk, rk[bi], rd[bi],
                                extra=acc if last else None,
                                out_scale=(1.0 / num_kernels) if last else None)
            if last:
                x_next = y
            else:
                acc = y if acc is None else acc + y
        x = x_next

    # F.leaky_relu(x) (default slope 0.01) + conv_post + tanh, fused in kernel
    x = conv_stack(x, [dict(w=params['conv_post_w'], b=params['conv_post_b'],
                            dil=1, pad_l=3, pad_r=3, lrelu=0.01)],
                   out_act='tanh', out_dtype=jnp.float32)
    return x[:, 0, :]                                             # wav.squeeze(1)


# --------------------------------------------------------------------------
if __name__ == "__main__":
    key = jax.random.PRNGKey(0)
    kp, kmel, kf0, knoise = jax.random.split(key, 4)

    B, T = 2, 8
    params = init_params(kp, ATTRS)
    mel = jax.random.normal(kmel, (B, T, ATTRS['num_mels']), jnp.float32)
    f0 = 220.0 + 60.0 * jax.random.uniform(kf0, (B, T), jnp.float32)
    f0 = f0.at[:, -2:].set(0.0)   # a couple of unvoiced frames

    fwd = jax.jit(nsf_hifigan_forward)
    wav = jax.block_until_ready(fwd(params, mel, f0, knoise))

    upp = int(np.prod(ATTRS['upsample_rates']))
    assert wav.shape == (B, T * upp), wav.shape
    assert bool(jnp.all(jnp.isfinite(wav)))
    print("KERNEL_OK")
</pallas_src>

<mosaic_0001>
module attributes {stable_mosaic.version = 11 : i64} {
  func.func @kernel(%arg0: i32, %arg1: i32, %arg2: memref<1x9x128xbf16, #tpu.memory_space<vmem>>, %arg3: memref<1x9xbf16, #tpu.memory_space<vmem>>, %arg4: memref<1x1xf32, #tpu.memory_space<vmem>>, %arg5: memref<1x1x128xbf16, #tpu.memory_space<vmem>>) attributes {dimension_semantics = [#tpu.dimension_semantics<parallel>, #tpu.dimension_semantics<parallel>], iteration_bounds = array<i64: 2, 1>, scalar_prefetch = 0 : i64, scratch_operands = 0 : i64, tpu.core_type = #tpu.core_type<tc>, window_params = [{transform_indices = @transform_0, window_bounds = array<i64: 1, 9, 128>}, {pipeline_mode = #tpu.pipeline_mode<synchronous>, transform_indices = @transform_1, window_bounds = array<i64: 1, 9>}, {pipeline_mode = #tpu.pipeline_mode<synchronous>, transform_indices = @transform_2, window_bounds = array<i64: 1, 1>}, {transform_indices = @transform_3, window_bounds = array<i64: 1, 1, 128>}]} {
    %c0 = arith.constant 0 : index
    %c0_0 = arith.constant 0 : index
    %c0_1 = arith.constant 0 : index
    %0 = vector.load %arg2[%c0, %c0_0, %c0_1] : memref<1x9x128xbf16, #tpu.memory_space<vmem>>, vector<1x9x128xbf16>
    %1 = vector.shape_cast %0 : vector<1x9x128xbf16> to vector<9x128xbf16>
    %c0_2 = arith.constant 0 : index
    %c0_3 = arith.constant 0 : index
    %2 = vector.load %arg3[%c0_2, %c0_3] : memref<1x9xbf16, #tpu.memory_space<vmem>>, vector<1x9xbf16>
    %cst = arith.constant dense<0.000000e+00> : vector<1x128xf32>
    %3 = tpu.matmul %2, %1, %cst {dimension_numbers = #tpu.dot_dimension_numbers<[1], [0], [0], [1], [0, 0, 1, 1], [], []>} : vector<1x9xbf16>, vector<9x128xbf16>, vector<1x128xf32> -> vector<1x128xf32>
    %c0_4 = arith.constant 0 : index
    %c0_5 = arith.constant 0 : index
    %4 = vector.load %arg4[%c0_4, %c0_5] : memref<1x1xf32, #tpu.memory_space<vmem>>, vector<1x1xf32>
    %5 = vector.broadcast %4 : vector<1x1xf32> to vector<1x128xf32>
    %6 = arith.addf %3, %5 : vector<1x128xf32>
    %7 = math.tanh %6 : vector<1x128xf32>
    %8 = vector.shape_cast %7 : vector<1x128xf32> to vector<1x1x128xf32>
    %9 = arith.truncf %8 : vector<1x1x128xf32> to vector<1x1x128xbf16>
    %c0_6 = arith.constant 0 : index
    %c0_7 = arith.constant 0 : index
    %c0_8 = arith.constant 0 : index
    %10 = vector.load %arg5[%c0_6, %c0_7, %c0_8] : memref<1x1x128xbf16, #tpu.memory_space<vmem>>, vector<1x1x128xbf16>
    tpu.vector_store %arg5[%c0_6, %c0_7, %c0_8], %9 {strides = array<i32>} : memref<1x1x128xbf16, #tpu.memory_space<vmem>>, vector<1x1x128xbf16>,
    return
  }
  func.func @transform_0(%arg0: i32, %arg1: i32) -> (i32, i32, i32) {
    %c0_i32 = arith.constant 0 : i32
    %c0_i32_0 = arith.constant 0 : i32
    return %arg0, %c0_i32, %arg1 : i32, i32, i32
  }
  func.func @transform_1(%arg0: i32, %arg1: i32) -> (i32, i32) {
    %c0_i32 = arith.constant 0 : i32
    %c0_i32_0 = arith.constant 0 : i32
    %c0_i32_1 = arith.constant 0 : i32
    return %c0_i32, %c0_i32_0 : i32, i32
  }
  func.func @transform_2(%arg0: i32, %arg1: i32) -> (i32, i32) {
    %c0_i32 = arith.constant 0 : i32
    %c0_i32_0 = arith.constant 0 : i32
    %c0_i32_1 = arith.constant 0 : i32
    return %c0_i32, %c0_i32_0 : i32, i32
  }
  func.func @transform_3(%arg0: i32, %arg1: i32) -> (i32, i32, i32) {
    %c0_i32 = arith.constant 0 : i32
    %c0_i32_0 = arith.constant 0 : i32
    return %arg0, %c0_i32, %arg1 : i32, i32, i32
  }
}

module attributes {stable_mosaic.version = 11 : i64} {
  func.func @kernel(%arg0: i32, %arg1: i32, %arg2: memref<1x8x128xbf16, #tpu.memory_space<vmem>>, %arg3: memref<1x8x128xbf16, #tpu.memory_space<vmem>>, %arg4: memref<16x56xbf16, #tpu.memory_space<vmem>>, %arg5: memref<16x1xf32, #tpu.memory_space<vmem>>, %arg6: memref<1x16x128xbf16, #tpu.memory_space<vmem>>) attributes {dimension_semantics = [#tpu.dimension_semantics<parallel>, #tpu.dimension_semantics<parallel>], iteration_bounds = array<i64: 2, 1>, scalar_prefetch = 0 : i64, scratch_operands = 0 : i64, tpu.core_type = #tpu.core_type<tc>, window_params = [{transform_indices = @transform_0, window_bounds = array<i64: 1, 8, 128>}, {transform_indices = @transform_1, window_bounds = array<i64: 1, 8, 128>}, {pipeline_mode = #tpu.pipeline_mode<synchronous>, transform_indices = @transform_2, window_bounds = array<i64: 16, 56>}, {pipeline_mode = #tpu.pipeline_mode<synchronous>, transform_indices = @transform_3, window_bounds = array<i64: 16, 1>}, {transform_indices = @transform_4, window_bounds = array<i64: 1, 16, 128>}]} {
    %c0 = arith.constant 0 : index
    %c0_0 = arith.constant 0 : index
    %c0_1 = arith.constant 0 : index
    %0 = vector.load %arg2[%c0, %c0_0, %c0_1] : memref<1x8x128xbf16, #tpu.memory_space<vmem>>, vector<1x8x128xbf16>
    %1 = vector.shape_cast %0 : vector<1x8x128xbf16> to vector<8x128xbf16>
    %c0_2 = arith.constant 0 : index
    %c0_3 = arith.constant 0 : index
    %c0_4 = arith.constant 0 : index
    %2 = vector.load %arg3[%c0_2, %c0_3, %c0_4] : memref<1x8x128xbf16, #tpu.memory_space<vmem>>, vector<1x8x128xbf16>
    %3 = vector.shape_cast %2 : vector<1x8x128xbf16> to vector<8x128xbf16>
    %4 = vector.extract_strided_slice %3 {offsets = [0, 0], sizes = [8, 6], strides = [1, 1]} : vector<8x128xbf16> to vector<8x6xbf16>
    %5 = tpu.concatenate %1, %4 in 1 : vector<8x128xbf16>, vector<8x6xbf16> -> vector<8x134xbf16>
    %6 = vector.extract_strided_slice %5 {offsets = [0, 0], sizes = [8, 128], strides = [1, 1]} : vector<8x134xbf16> to vector<8x128xbf16>
    %7 = vector.extract_strided_slice %5 {offsets = [0, 1], sizes = [8, 128], strides = [1, 1]} : vector<8x134xbf16> to vector<8x128xbf16>
    %8 = vector.extract_strided_slice %5 {offsets = [0, 2], sizes = [8, 128], strides = [1, 1]} : vector<8x134xbf16> to vector<8x128xbf16>
    %9 = vector.extract_strided_slice %5 {offsets = [0, 3], sizes = [8, 128], strides = [1, 1]} : vector<8x134xbf16> to vector<8x128xbf16>
    %10 = vector.extract_strided_slice %5 {offsets = [0, 4], sizes = [8, 128], strides = [1, 1]} : vector<8x134xbf16> to vector<8x128xbf16>
    %11 = vector.extract_strided_slice %5 {offsets = [0, 5], sizes = [8, 128], strides = [1, 1]} : vector<8x134xbf16> to vector<8x128xbf16>
    %12 = vector.extract_strided_slice %5 {offsets = [0, 6], sizes = [8, 128], strides = [1, 1]} : vector<8x134xbf16> to vector<8x128xbf16>
    %13 = tpu.concatenate %6, %7, %8, %9, %10, %11, %12 in 0 : vector<8x128xbf16>, vector<8x128xbf16>, vector<8x128xbf16>, vector<8x128xbf16>, vector<8x128xbf16>, vector<8x128xbf16>, vector<8x128xbf16> -> vector<56x128xbf16>
    %c0_5 = arith.constant 0 : index
    %c0_6 = arith.constant 0 : index
    %14 = vector.load %arg4[%c0_5, %c0_6] : memref<16x56xbf16, #tpu.memory_space<vmem>>, vector<16x56xbf16>
    %cst = arith.constant dense<0.000000e+00> : vector<16x128xf32>
    %15 = tpu.matmul %14, %13, %cst {dimension_numbers = #tpu.dot_dimension_numbers<[1], [0], [0], [1], [0, 0, 1, 1], [], []>} : vector<16x56xbf16>, vector<56x128xbf16>, vector<16x128xf32> -> vector<16x128xf32>
    %c0_7 = arith.constant 0 : index
    %c0_8 = arith.constant 0 : index
    %16 = vector.load %arg5[%c0_7, %c0_8] : memref<16x1xf32, #tpu.memory_space<vmem>>, vector<16x1xf32>
    %17 = vector.broadcast %16 : vector<16x1xf32> to vector<16x128xf32>
    %18 = arith.addf %15, %17 : vector<16x128xf32>
    %19 = vector.shape_cast %18 : vector<16x128xf32> to vector<1x16x128xf32>
    %20 = arith.truncf %19 : vector<1x16x128xf32> to vector<1x16x128xbf16>
    %c0_9 = arith.constant 0 : index
    %c0_10 = arith.constant 0 : index
    %c0_11 = arith.constant 0 : index
    %21 = vector.load %arg6[%c0_9, %c0_10, %c0_11] : memref<1x16x128xbf16, #tpu.memory_space<vmem>>, vector<1x16x128xbf16>
    tpu.vector_store %arg6[%c0_9, %c0_10, %c0_11], %20 {strides = array<i32>} : memref<1x16x128xbf16, #tpu.memory_space<vmem>>, vector<1x16x128xbf16>,
    return
  }
  func.func @transform_0(%arg0: i32, %arg1: i32) -> (i32, i32, i32) {
    %c0_i32 = arith.constant 0 : i32
    %c0_i32_0 = arith.constant 0 : i32
    return %arg0, %c0_i32, %arg1 : i32, i32, i32
  }
  func.func @transform_1(%arg0: i32, %arg1: i32) -> (i32, i32, i32) {
    %c1_i32 = arith.constant 1 : i32
    %0 = arith.addi %arg1, %c1_i32 : i32
    %c1_i32_0 = arith.constant 1 : i32
    %1 = arith.muli %0, %c1_i32_0 : i32
    %c0_i32 = arith.constant 0 : i32
    %c0_i32_1 = arith.constant 0 : i32
    return %arg0, %c0_i32, %1 : i32, i32, i32
  }
  func.func @transform_2(%arg0: i32, %arg1: i32) -> (i32, i32) {
    %c0_i32 = arith.constant 0 : i32
    %c0_i32_0 = arith.constant 0 : i32
    %c0_i32_1 = arith.constant 0 : i32
    return %c0_i32, %c0_i32_0 : i32, i32
  }
  func.func @transform_3(%arg0: i32, %arg1: i32) -> (i32, i32) {
    %c0_i32 = arith.constant 0 : i32
    %c0_i32_0 = arith.constant 0 : i32
    %c0_i32_1 = arith.constant 0 : i32
    return %c0_i32, %c0_i32_0 : i32, i32
  }
  func.func @transform_4(%arg0: i32, %arg1: i32) -> (i32, i32, i32) {
    %c0_i32 = arith.constant 0 : i32
    %c0_i32_0 = arith.constant 0 : i32
    return %arg0, %c0_i32, %arg1 : i32, i32, i32
  }
}

module attributes {stable_mosaic.version = 11 : i64} {
  func.func @kernel(%arg0: i32, %arg1: i32, %arg2: memref<1x16x128xbf16, #tpu.memory_space<vmem>>, %arg3: memref<1x16x128xbf16, #tpu.memory_space<vmem>>, %arg4: memref<32x32xbf16, #tpu.memory_space<vmem>>, %arg5: memref<32x1xf32, #tpu.memory_space<vmem>>, %arg6: memref<1x32x128xbf16, #tpu.memory_space<vmem>>) attributes {dimension_semantics = [#tpu.dimension_semantics<parallel>, #tpu.dimension_semantics<parallel>], iteration_bounds = array<i64: 2, 1>, scalar_prefetch = 0 : i64, scratch_operands = 0 : i64, tpu.core_type = #tpu.core_type<tc>, window_params = [{transform_indices = @transform_0, window_bounds = array<i64: 1, 16, 128>}, {transform_indices = @transform_1, window_bounds = array<i64: 1, 16, 128>}, {pipeline_mode = #tpu.pipeline_mode<synchronous>, transform_indices = @transform_2, window_bounds = array<i64: 32, 32>}, {pipeline_mode = #tpu.pipeline_mode<synchronous>, transform_indices = @transform_3, window_bounds = array<i64: 32, 1>}, {transform_indices = @transform_4, window_bounds = array<i64: 1, 32, 128>}]} {
    %c0 = arith.constant 0 : index
    %c0_0 = arith.constant 0 : index
    %c0_1 = arith.constant 0 : index
    %0 = vector.load %arg2[%c0, %c0_0, %c0_1] : memref<1x16x128xbf16, #tpu.memory_space<vmem>>, vector<1x16x128xbf16>
    %1 = vector.shape_cast %0 : vector<1x16x128xbf16> to vector<16x128xbf16>
    %c0_2 = arith.constant 0 : index
    %c0_3 = arith.constant 0 : index
    %c0_4 = arith.constant 0 : index
    %2 = vector.load %arg3[%c0_2, %c0_3, %c0_4] : memref<1x16x128xbf16, #tpu.memory_space<vmem>>, vector<1x16x128xbf16>
    %3 = vector.shape_cast %2 : vector<1x16x128xbf16> to vector<16x128xbf16>
    %4 = vector.extract_strided_slice %3 {offsets = [0, 0], sizes = [16, 1], strides = [1, 1]} : vector<16x128xbf16> to vector<16x1xbf16>
    %5 = tpu.concatenate %1, %4 in 1 : vector<16x128xbf16>, vector<16x1xbf16> -> vector<16x129xbf16>
    %cst = arith.constant 0.000000e+00 : bf16
    %6 = vector.broadcast %cst : bf16 to vector<16x129xbf16>
    %7 = arith.cmpf oge, %5, %6 : vector<16x129xbf16>
    %cst_5 = arith.constant 1.000980e-01 : bf16
    %8 = vector.broadcast %cst_5 : bf16 to vector<16x129xbf16>
    %9 = arith.mulf %5, %8 : vector<16x129xbf16>
    %10 = arith.select %7, %5, %9 : vector<16x129xi1>, vector<16x129xbf16>
    %11 = vector.extract_strided_slice %10 {offsets = [0, 0], sizes = [16, 128], strides = [1, 1]} : vector<16x129xbf16> to vector<16x128xbf16>
    %12 = vector.extract_strided_slice %10 {offsets = [0, 1], sizes = [16, 128], strides = [1, 1]} : vector<16x129xbf16> to vector<16x128xbf16>
    %13 = tpu.concatenate %11, %12 in 0 : vector<16x128xbf16>, vector<16x128xbf16> -> vector<32x128xbf16>
    %c0_6 = arith.constant 0 : index
    %c0_7 = arith.constant 0 : index
    %14 = vector.load %arg4[%c0_6, %c0_7] : memref<32x32xbf16, #tpu.memory_space<vmem>>, vector<32x32xbf16>
    %cst_8 = arith.constant dense<0.000000e+00> : vector<32x128xf32>
    %15 = tpu.matmul %14, %13, %cst_8 {dimension_numbers = #tpu.dot_dimension_numbers<[1], [0], [0], [1], [0, 0, 1, 1], [], []>} : vector<32x32xbf16>, vector<32x128xbf16>, vector<32x128xf32> -> vector<32x128xf32>
    %c0_9 = arith.constant 0 : index
    %c0_10 = arith.constant 0 : index
    %16 = vector.load %arg5[%c0_9, %c0_10] : memref<32x1xf32, #tpu.memory_space<vmem>>, vector<32x1xf32>
    %17 = vector.broadcast %16 : vector<32x1xf32> to vector<32x128xf32>
    %18 = arith.addf %15, %17 : vector<32x128xf32>
    %19 = vector.shape_cast %18 : vector<32x128xf32> to vector<1x32x128xf32>
    %20 = arith.truncf %19 : vector<1x32x128xf32> to vector<1x32x128xbf16>
    %c0_11 = arith.constant 0 : index
    %c0_12 = arith.constant 0 : index
    %c0_13 = arith.constant 0 : index
    %21 = vector.load %arg6[%c0_11, %c0_12, %c0_13] : memref<1x32x128xbf16, #tpu.memory_space<vmem>>, vector<1x32x128xbf16>
    tpu.vector_store %arg6[%c0_11, %c0_12, %c0_13], %20 {strides = array<i32>} : memref<1x32x128xbf16, #tpu.memory_space<vmem>>, vector<1x32x128xbf16>,
    return
  }
  func.func @transform_0(%arg0: i32, %arg1: i32) -> (i32, i32, i32) {
    %c0_i32 = arith.constant 0 : i32
    %c0_i32_0 = arith.constant 0 : i32
    return %arg0, %c0_i32, %arg1 : i32, i32, i32
  }
  func.func @transform_1(%arg0: i32, %arg1: i32) -> (i32, i32, i32) {
    %c1_i32 = arith.constant 1 : i32
    %0 = arith.addi %arg1, %c1_i32 : i32
    %c1_i32_0 = arith.constant 1 : i32
    %1 = arith.muli %0, %c1_i32_0 : i32
    %c0_i32 = arith.constant 0 : i32
    %c0_i32_1 = arith.constant 0 : i32
    return %arg0, %c0_i32, %1 : i32, i32, i32
  }
  func.func @transform_2(%arg0: i32, %arg1: i32) -> (i32, i32) {
    %c0_i32 = arith.constant 0 : i32
    %c0_i32_0 = arith.constant 0 : i32
    %c0_i32_1 = arith.constant 0 : i32
    return %c0_i32, %c0_i32_0 : i32, i32
  }
  func.func @transform_3(%arg0: i32, %arg1: i32) -> (i32, i32) {
    %c0_i32 = arith.constant 0 : i32
    %c0_i32_0 = arith.constant 0 : i32
    %c0_i32_1 = arith.constant 0 : i32
    return %c0_i32, %c0_i32_0 : i32, i32
  }
  func.func @transform_4(%arg0: i32, %arg1: i32) -> (i32, i32, i32) {
    %c0_i32 = arith.constant 0 : i32
    %c0_i32_0 = arith.constant 0 : i32
    return %arg0, %c0_i32, %arg1 : i32, i32, i32
  }
}

module attributes {stable_mosaic.version = 11 : i64} {
  func.func @kernel(%arg0: i32, %arg1: i32, %arg2: memref<1x4x128xbf16, #tpu.memory_space<vmem>>, %arg3: memref<1x4x128xbf16, #tpu.memory_space<vmem>>, %arg4: memref<1x8x128xbf16, #tpu.memory_space<vmem>>, %arg5: memref<8x12xbf16, #tpu.memory_space<vmem>>, %arg6: memref<8x1xf32, #tpu.memory_space<vmem>>, %arg7: memref<1x8x128xbf16, #tpu.memory_space<vmem>>) attributes {dimension_semantics = [#tpu.dimension_semantics<parallel>, #tpu.dimension_semantics<parallel>], iteration_bounds = array<i64: 2, 1>, scalar_prefetch = 0 : i64, scratch_operands = 0 : i64, tpu.core_type = #tpu.core_type<tc>, window_params = [{transform_indices = @transform_0, window_bounds = array<i64: 1, 4, 128>}, {transform_indices = @transform_1, window_bounds = array<i64: 1, 4, 128>}, {transform_indices = @transform_2, window_bounds = array<i64: 1, 8, 128>}, {pipeline_mode = #tpu.pipeline_mode<synchronous>, transform_indices = @transform_3, window_bounds = array<i64: 8, 12>}, {pipeline_mode = #tpu.pipeline_mode<synchronous>, transform_indices = @transform_4, window_bounds = array<i64: 8, 1>}, {transform_indices = @transform_5, window_bounds = array<i64: 1, 8, 128>}]} {
    %c0 = arith.constant 0 : index
    %c0_0 = arith.constant 0 : index
    %c0_1 = arith.constant 0 : index
    %0 = vector.load %arg2[%c0, %c0_0, %c0_1] : memref<1x4x128xbf16, #tpu.memory_space<vmem>>, vector<1x4x128xbf16>
    %1 = vector.shape_cast %0 : vector<1x4x128xbf16> to vector<4x128xbf16>
    %c0_2 = arith.constant 0 : index
    %c0_3 = arith.constant 0 : index
    %c0_4 = arith.constant 0 : index
    %2 = vector.load %arg3[%c0_2, %c0_3, %c0_4] : memref<1x4x128xbf16, #tpu.memory_space<vmem>>, vector<1x4x128xbf16>
    %3 = vector.shape_cast %2 : vector<1x4x128xbf16> to vector<4x128xbf16>
    %4 = vector.extract_strided_slice %3 {offsets = [0, 0], sizes = [4, 2], strides = [1, 1]} : vector<4x128xbf16> to vector<4x2xbf16>
    %5 = tpu.concatenate %1, %4 in 1 : vector<4x128xbf16>, vector<4x2xbf16> -> vector<4x130xbf16>
    %6 = vector.extract_strided_slice %5 {offsets = [0, 0], sizes = [4, 128], strides = [1, 1]} : vector<4x130xbf16> to vector<4x128xbf16>
    %7 = vector.extract_strided_slice %5 {offsets = [0, 1], sizes = [4, 128], strides = [1, 1]} : vector<4x130xbf16> to vector<4x128xbf16>
    %8 = vector.extract_strided_slice %5 {offsets = [0, 2], sizes = [4, 128], strides = [1, 1]} : vector<4x130xbf16> to vector<4x128xbf16>
    %9 = tpu.concatenate %6, %7, %8 in 0 : vector<4x128xbf16>, vector<4x128xbf16>, vector<4x128xbf16> -> vector<12x128xbf16>
    %c0_5 = arith.constant 0 : index
    %c0_6 = arith.constant 0 : index
    %10 = vector.load %arg5[%c0_5, %c0_6] : memref<8x12xbf16, #tpu.memory_space<vmem>>, vector<8x12xbf16>
    %cst = arith.constant dense<0.000000e+00> : vector<8x128xf32>
    %11 = tpu.matmul %10, %9, %cst {dimension_numbers = #tpu.dot_dimension_numbers<[1], [0], [0], [1], [0, 0, 1, 1], [], []>} : vector<8x12xbf16>, vector<12x128xbf16>, vector<8x128xf32> -> vector<8x128xf32>
    %c0_7 = arith.constant 0 : index
    %c0_8 = arith.constant 0 : index
    %12 = vector.load %arg6[%c0_7, %c0_8] : memref<8x1xf32, #tpu.memory_space<vmem>>, vector<8x1xf32>
    %13 = vector.broadcast %12 : vector<8x1xf32> to vector<8x128xf32>
    %14 = arith.addf %11, %13 : vector<8x128xf32>
    %c0_9 = arith.constant 0 : index
    %c0_10 = arith.constant 0 : index
    %c0_11 = arith.constant 0 : index
    %15 = vector.load %arg4[%c0_9, %c0_10, %c0_11] : memref<1x8x128xbf16, #tpu.memory_space<vmem>>, vector<1x8x128xbf16>
    %16 = vector.shape_cast %15 : vector<1x8x128xbf16> to vector<8x128xbf16>
    %17 = arith.extf %16 : vector<8x128xbf16> to vector<8x128xf32>
    %18 = arith.addf %14, %17 : vector<8x128xf32>
    %19 = vector.shape_cast %18 : vector<8x128xf32> to vector<1x8x128xf32>
    %20 = arith.truncf %19 : vector<1x8x128xf32> to vector<1x8x128xbf16>
    %c0_12 = arith.constant 0 : index
    %c0_13 = arith.constant 0 : index
    %c0_14 = arith.constant 0 : index
    %21 = vector.load %arg7[%c0_12, %c0_13, %c0_14] : memref<1x8x128xbf16, #tpu.memory_space<vmem>>, vector<1x8x128xbf16>
    tpu.vector_store %arg7[%c0_12, %c0_13, %c0_14], %20 {strides = array<i32>} : memref<1x8x128xbf16, #tpu.memory_space<vmem>>, vector<1x8x128xbf16>,
    return
  }
  func.func @transform_0(%arg0: i32, %arg1: i32) -> (i32, i32, i32) {
    %c0_i32 = arith.constant 0 : i32
    %c0_i32_0 = arith.constant 0 : i32
    return %arg0, %c0_i32, %arg1 : i32, i32, i32
  }
  func.func @transform_1(%arg0: i32, %arg1: i32) -> (i32, i32, i32) {
    %c1_i32 = arith.constant 1 : i32
    %0 = arith.addi %arg1, %c1_i32 : i32
    %c1_i32_0 = arith.constant 1 : i32
    %1 = arith.muli %0, %c1_i32_0 : i32
    %c0_i32 = arith.constant 0 : i32
    %c0_i32_1 = arith.constant 0 : i32
    return %arg0, %c0_i32, %1 : i32, i32, i32
  }
  func.func @transform_2(%arg0: i32, %arg1: i32) -> (i32, i32, i32) {
    %c0_i32 = arith.constant 0 : i32
    %c0_i32_0 = arith.constant 0 : i32
    return %arg0, %c0_i32, %arg1 : i32, i32, i32
  }
  func.func @transform_3(%arg0: i32, %arg1: i32) -> (i32, i32) {
    %c0_i32 = arith.constant 0 : i32
    %c0_i32_0 = arith.constant 0 : i32
    %c0_i32_1 = arith.constant 0 : i32
    return %c0_i32, %c0_i32_0 : i32, i32
  }
  func.func @transform_4(%arg0: i32, %arg1: i32) -> (i32, i32) {
    %c0_i32 = arith.constant 0 : i32
    %c0_i32_0 = arith.constant 0 : i32
    %c0_i32_1 = arith.constant 0 : i32
    return %c0_i32, %c0_i32_0 : i32, i32
  }
  func.func @transform_5(%arg0: i32, %arg1: i32) -> (i32, i32, i32) {
    %c0_i32 = arith.constant 0 : i32
    %c0_i32_0 = arith.constant 0 : i32
    return %arg0, %c0_i32, %arg1 : i32, i32, i32
  }
}

module attributes {stable_mosaic.version = 11 : i64} {
  func.func @kernel(%arg0: i32, %arg1: i32, %arg2: memref<1x8x128xbf16, #tpu.memory_space<vmem>>, %arg3: memref<1x8x128xbf16, #tpu.memory_space<vmem>>, %arg4: memref<8x24xbf16, #tpu.memory_space<vmem>>, %arg5: memref<8x1xf32, #tpu.memory_space<vmem>>, %arg6: memref<8x24xbf16, #tpu.memory_space<vmem>>, %arg7: memref<8x1xf32, #tpu.memory_space<vmem>>, %arg8: memref<1x8x128xbf16, #tpu.memory_space<vmem>>) attributes {dimension_semantics = [#tpu.dimension_semantics<parallel>, #tpu.dimension_semantics<parallel>], iteration_bounds = array<i64: 2, 1>, scalar_prefetch = 0 : i64, scratch_operands = 0 : i64, tpu.core_type = #tpu.core_type<tc>, window_params = [{transform_indices = @transform_0, window_bounds = array<i64: 1, 8, 128>}, {transform_indices = @transform_1, window_bounds = array<i64: 1, 8, 128>}, {pipeline_mode = #tpu.pipeline_mode<synchronous>, transform_indices = @transform_2, window_bounds = array<i64: 8, 24>}, {pipeline_mode = #tpu.pipeline_mode<synchronous>, transform_indices = @transform_3, window_bounds = array<i64: 8, 1>}, {pipeline_mode = #tpu.pipeline_mode<synchronous>, transform_indices = @transform_4, window_bounds = array<i64: 8, 24>}, {pipeline_mode = #tpu.pipeline_mode<synchronous>, transform_indices = @transform_5, window_bounds = array<i64: 8, 1>}, {transform_indices = @transform_6, window_bounds = array<i64: 1, 8, 128>}]} {
    %c0 = arith.constant 0 : index
    %c0_0 = arith.constant 0 : index
    %c0_1 = arith.constant 0 : index
    %0 = vector.load %arg2[%c0, %c0_0, %c0_1] : memref<1x8x128xbf16, #tpu.memory_space<vmem>>, vector<1x8x128xbf16>
    %1 = vector.shape_cast %0 : vector<1x8x128xbf16> to vector<8x128xbf16>
    %c0_2 = arith.constant 0 : index
    %c0_3 = arith.constant 0 : index
    %c0_4 = arith.constant 0 : index
    %2 = vector.load %arg3[%c0_2, %c0_3, %c0_4] : memref<1x8x128xbf16, #tpu.memory_space<vmem>>, vector<1x8x128xbf16>
    %3 = vector.shape_cast %2 : vector<1x8x128xbf16> to vector<8x128xbf16>
    %4 = vector.extract_strided_slice %3 {offsets = [0, 0], sizes = [8, 4], strides = [1, 1]} : vector<8x128xbf16> to vector<8x4xbf16>
    %5 = tpu.concatenate %1, %4 in 1 : vector<8x128xbf16>, vector<8x4xbf16> -> vector<8x132xbf16>
    %6 = vector.extract_strided_slice %5 {offsets = [0, 2], sizes = [8, 128], strides = [1, 1]} : vector<8x132xbf16> to vector<8x128xbf16>
    %7 = arith.extf %6 : vector<8x128xbf16> to vector<8x128xf32>
    %cst = arith.constant 0.000000e+00 : bf16
    %8 = vector.broadcast %cst : bf16 to vector<8x132xbf16>
    %9 = arith.cmpf oge, %5, %8 : vector<8x132xbf16>
    %cst_5 = arith.constant 1.000980e-01 : bf16
    %10 = vector.broadcast %cst_5 : bf16 to vector<8x132xbf16>
    %11 = arith.mulf %5, %10 : vector<8x132xbf16>
    %12 = arith.select %9, %5, %11 : vector<8x132xi1>, vector<8x132xbf16>
    %13 = vector.extract_strided_slice %12 {offsets = [0, 0], sizes = [8, 130], strides = [1, 1]} : vector<8x132xbf16> to vector<8x130xbf16>
    %14 = vector.extract_strided_slice %12 {offsets = [0, 1], sizes = [8, 130], strides = [1, 1]} : vector<8x132xbf16> to vector<8x130xbf16>
    %15 = vector.extract_strided_slice %12 {offsets = [0, 2], sizes = [8, 130], strides = [1, 1]} : vector<8x132xbf16> to vector<8x130xbf16>
    %16 = tpu.concatenate %13, %14, %15 in 0 : vector<8x130xbf16>, vector<8x130xbf16>, vector<8x130xbf16> -> vector<24x130xbf16>
    %c0_6 = arith.constant 0 : index
    %c0_7 = arith.constant 0 : index
    %17 = vector.load %arg4[%c0_6, %c0_7] : memref<8x24xbf16, #tpu.memory_space<vmem>>, vector<8x24xbf16>
    %cst_8 = arith.constant dense<0.000000e+00> : vector<8x130xf32>
    %18 = tpu.matmul %17, %16, %cst_8 {dimension_numbers = #tpu.dot_dimension_numbers<[1], [0], [0], [1], [0, 0, 1, 1], [], []>} : vector<8x24xbf16>, vector<24x130xbf16>, vector<8x130xf32> -> vector<8x130xf32>
    %c0_9 = arith.constant 0 : index
    %c0_10 = arith.constant 0 : index
    %19 = vector.load %arg5[%c0_9, %c0_10] : memref<8x1xf32, #tpu.memory_space<vmem>>, vector<8x1xf32>
    %20 = vector.broadcast %19 : vector<8x1xf32> to vector<8x130xf32>
    %21 = arith.addf %18, %20 : vector<8x130xf32>
    %c128_i32 = arith.constant 128 : i32
    %22 = arith.muli %arg1, %c128_i32 : i32
    %c1_i32 = arith.constant 1 : i32
    %23 = arith.subi %22, %c1_i32 : i32
    %24 = tpu.iota {dimensions = array<i32: 1>} : vector<1x130xi32>
    %25 = vector.broadcast %23 : i32 to vector<1x130xi32>
    %26 = arith.addi %25, %24 : vector<1x130xi32>
    %c0_i32 = arith.constant 0 : i32
    %27 = vector.broadcast %c0_i32 : i32 to vector<1x130xi32>
    %28 = arith.cmpi sge, %26, %27 : vector<1x130xi32>
    %c32_i32 = arith.constant 32 : i32
    %29 = vector.broadcast %c32_i32 : i32 to vector<1x130xi32>
    %30 = arith.cmpi slt, %26, %29 : vector<1x130xi32>
    %31 = arith.andi %28, %30 : vector<1x130xi1>
    %cst_11 = arith.constant 0.000000e+00 : f32
    %32 = vector.shape_cast %31 : vector<1x130xi1> to vector<1x130xi1>
    %33 = vector.broadcast %32 : vector<1x130xi1> to vector<8x130xi1>
    %34 = vector.broadcast %cst_11 : f32 to vector<8x130xf32>
    %35 = arith.select %33, %21, %34 : vector<8x130xi1>, vector<8x130xf32>
    %cst_12 = arith.constant 0.000000e+00 : f32
    %36 = vector.broadcast %cst_12 : f32 to vector<8x130xf32>
    %37 = arith.cmpf oge, %35, %36 : vector<8x130xf32>
    %cst_13 = arith.constant 1.000000e-01 : f32
    %38 = vector.broadcast %cst_13 : f32 to vector<8x130xf32>
    %39 = arith.mulf %35, %38 : vector<8x130xf32>
    %40 = arith.select %37, %35, %39 : vector<8x130xi1>, vector<8x130xf32>
    %41 = vector.extract_strided_slice %40 {offsets = [0, 0], sizes = [8, 128], strides = [1, 1]} : vector<8x130xf32> to vector<8x128xf32>
    %42 = vector.extract_strided_slice %40 {offsets = [0, 1], sizes = [8, 128], strides = [1, 1]} : vector<8x130xf32> to vector<8x128xf32>
    %43 = vector.extract_strided_slice %40 {offsets = [0, 2], sizes = [8, 128], strides = [1, 1]} : vector<8x130xf32> to vector<8x128xf32>
    %44 = tpu.concatenate %41, %42, %43 in 0 : vector<8x128xf32>, vector<8x128xf32>, vector<8x128xf32> -> vector<24x128xf32>
    %c0_14 = arith.constant 0 : index
    %c0_15 = arith.constant 0 : index
    %45 = vector.load %arg6[%c0_14, %c0_15] : memref<8x24xbf16, #tpu.memory_space<vmem>>, vector<8x24xbf16>
    %46 = arith.truncf %44 : vector<24x128xf32> to vector<24x128xbf16>
    %cst_16 = arith.constant dense<0.000000e+00> : vector<8x128xf32>
    %47 = tpu.matmul %45, %46, %cst_16 {dimension_numbers = #tpu.dot_dimension_numbers<[1], [0], [0], [1], [0, 0, 1, 1], [], []>} : vector<8x24xbf16>, vector<24x128xbf16>, vector<8x128xf32> -> vector<8x128xf32>
    %c0_17 = arith.constant 0 : index
    %c0_18 = arith.constant 0 : index
    %48 = vector.load %arg7[%c0_17, %c0_18] : memref<8x1xf32, #tpu.memory_space<vmem>>, vector<8x1xf32>
    %49 = vector.broadcast %48 : vector<8x1xf32> to vector<8x128xf32>
    %50 = arith.addf %47, %49 : vector<8x128xf32>
    %51 = arith.addf %50, %7 : vector<8x128xf32>
    %52 = vector.shape_cast %51 : vector<8x128xf32> to vector<1x8x128xf32>
    %53 = arith.truncf %52 : vector<1x8x128xf32> to vector<1x8x128xbf16>
    %c0_19 = arith.constant 0 : index
    %c0_20 = arith.constant 0 : index
    %c0_21 = arith.constant 0 : index
    %54 = vector.load %arg8[%c0_19, %c0_20, %c0_21] : memref<1x8x128xbf16, #tpu.memory_space<vmem>>, vector<1x8x128xbf16>
    tpu.vector_store %arg8[%c0_19, %c0_20, %c0_21], %53 {strides = array<i32>} : memref<1x8x128xbf16, #tpu.memory_space<vmem>>, vector<1x8x128xbf16>,
    return
  }
  func.func @transform_0(%arg0: i32, %arg1: i32) -> (i32, i32, i32) {
    %c0_i32 = arith.constant 0 : i32
    %c0_i32_0 = arith.constant 0 : i32
    return %arg0, %c0_i32, %arg1 : i32, i32, i32
  }
  func.func @transform_1(%arg0: i32, %arg1: i32) -> (i32, i32, i32) {
    %c1_i32 = arith.constant 1 : i32
    %0 = arith.addi %arg1, %c1_i32 : i32
    %c1_i32_0 = arith.constant 1 : i32
    %1 = arith.muli %0, %c1_i32_0 : i32
    %c0_i32 = arith.constant 0 : i32
    %c0_i32_1 = arith.constant 0 : i32
    return %arg0, %c0_i32, %1 : i32, i32, i32
  }
  func.func @transform_2(%arg0: i32, %arg1: i32) -> (i32, i32) {
    %c0_i32 = arith.constant 0 : i32
    %c0_i32_0 = arith.constant 0 : i32
    %c0_i32_1 = arith.constant 0 : i32
    return %c0_i32, %c0_i32_0 : i32, i32
  }
  func.func @transform_3(%arg0: i32, %arg1: i32) -> (i32, i32) {
    %c0_i32 = arith.constant 0 : i32
    %c0_i32_0 = arith.constant 0 : i32
    %c0_i32_1 = arith.constant 0 : i32
    return %c0_i32, %c0_i32_0 : i32, i32
  }
  func.func @transform_4(%arg0: i32, %arg1: i32) -> (i32, i32) {
    %c0_i32 = arith.constant 0 : i32
    %c0_i32_0 = arith.constant 0 : i32
    %c0_i32_1 = arith.constant 0 : i32
    return %c0_i32, %c0_i32_0 : i32, i32
  }
  func.func @transform_5(%arg0: i32, %arg1: i32) -> (i32, i32) {
    %c0_i32 = arith.constant 0 : i32
    %c0_i32_0 = arith.constant 0 : i32
    %c0_i32_1 = arith.constant 0 : i32
    return %c0_i32, %c0_i32_0 : i32, i32
  }
  func.func @transform_6(%arg0: i32, %arg1: i32) -> (i32, i32, i32) {
    %c0_i32 = arith.constant 0 : i32
    %c0_i32_0 = arith.constant 0 : i32
    return %arg0, %c0_i32, %arg1 : i32, i32, i32
  }
}

module attributes {stable_mosaic.version = 11 : i64} {
  func.func @kernel(%arg0: i32, %arg1: i32, %arg2: memref<1x8x128xbf16, #tpu.memory_space<vmem>>, %arg3: memref<1x8x128xbf16, #tpu.memory_space<vmem>>, %arg4: memref<8x24xbf16, #tpu.memory_space<vmem>>, %arg5: memref<8x1xf32, #tpu.memory_space<vmem>>, %arg6: memref<8x24xbf16, #tpu.memory_space<vmem>>, %arg7: memref<8x1xf32, #tpu.memory_space<vmem>>, %arg8: memref<1x8x128xbf16, #tpu.memory_space<vmem>>) attributes {dimension_semantics = [#tpu.dimension_semantics<parallel>, #tpu.dimension_semantics<parallel>], iteration_bounds = array<i64: 2, 1>, scalar_prefetch = 0 : i64, scratch_operands = 0 : i64, tpu.core_type = #tpu.core_type<tc>, window_params = [{transform_indices = @transform_0, window_bounds = array<i64: 1, 8, 128>}, {transform_indices = @transform_1, window_bounds = array<i64: 1, 8, 128>}, {pipeline_mode = #tpu.pipeline_mode<synchronous>, transform_indices = @transform_2, window_bounds = array<i64: 8, 24>}, {pipeline_mode = #tpu.pipeline_mode<synchronous>, transform_indices = @transform_3, window_bounds = array<i64: 8, 1>}, {pipeline_mode = #tpu.pipeline_mode<synchronous>, transform_indices = @transform_4, window_bounds = array<i64: 8, 24>}, {pipeline_mode = #tpu.pipeline_mode<synchronous>, transform_indices = @transform_5, window_bounds = array<i64: 8, 1>}, {transform_indices = @transform_6, window_bounds = array<i64: 1, 8, 128>}]} {
    %c0 = arith.constant 0 : index
    %c0_0 = arith.constant 0 : index
    %c0_1 = arith.constant 0 : index
    %0 = vector.load %arg2[%c0, %c0_0, %c0_1] : memref<1x8x128xbf16, #tpu.memory_space<vmem>>, vector<1x8x128xbf16>
    %1 = vector.shape_cast %0 : vector<1x8x128xbf16> to vector<8x128xbf16>
    %c0_2 = arith.constant 0 : index
    %c0_3 = arith.constant 0 : index
    %c0_4 = arith.constant 0 : index
    %2 = vector.load %arg3[%c0_2, %c0_3, %c0_4] : memref<1x8x128xbf16, #tpu.memory_space<vmem>>, vector<1x8x128xbf16>
    %3 = vector.shape_cast %2 : vector<1x8x128xbf16> to vector<8x128xbf16>
    %4 = vector.extract_strided_slice %3 {offsets = [0, 0], sizes = [8, 8], strides = [1, 1]} : vector<8x128xbf16> to vector<8x8xbf16>
    %5 = tpu.concatenate %1, %4 in 1 : vector<8x128xbf16>, vector<8x8xbf16> -> vector<8x136xbf16>
    %6 = vector.extract_strided_slice %5 {offsets = [0, 4], sizes = [8, 128], strides = [1, 1]} : vector<8x136xbf16> to vector<8x128xbf16>
    %7 = arith.extf %6 : vector<8x128xbf16> to vector<8x128xf32>
    %cst = arith.constant 0.000000e+00 : bf16
    %8 = vector.broadcast %cst : bf16 to vector<8x136xbf16>
    %9 = arith.cmpf oge, %5, %8 : vector<8x136xbf16>
    %cst_5 = arith.constant 1.000980e-01 : bf16
    %10 = vector.broadcast %cst_5 : bf16 to vector<8x136xbf16>
    %11 = arith.mulf %5, %10 : vector<8x136xbf16>
    %12 = arith.select %9, %5, %11 : vector<8x136xi1>, vector<8x136xbf16>
    %13 = vector.extract_strided_slice %12 {offsets = [0, 0], sizes = [8, 130], strides = [1, 1]} : vector<8x136xbf16> to vector<8x130xbf16>
    %14 = vector.extract_strided_slice %12 {offsets = [0, 3], sizes = [8, 130], strides = [1, 1]} : vector<8x136xbf16> to vector<8x130xbf16>
    %15 = vector.extract_strided_slice %12 {offsets = [0, 6], sizes = [8, 130], strides = [1, 1]} : vector<8x136xbf16> to vector<8x130xbf16>
    %16 = tpu.concatenate %13, %14, %15 in 0 : vector<8x130xbf16>, vector<8x130xbf16>, vector<8x130xbf16> -> vector<24x130xbf16>
    %c0_6 = arith.constant 0 : index
    %c0_7 = arith.constant 0 : index
    %17 = vector.load %arg4[%c0_6, %c0_7] : memref<8x24xbf16, #tpu.memory_space<vmem>>, vector<8x24xbf16>
    %cst_8 = arith.constant dense<0.000000e+00> : vector<8x130xf32>
    %18 = tpu.matmul %17, %16, %cst_8 {dimension_numbers = #tpu.dot_dimension_numbers<[1], [0], [0], [1], [0, 0, 1, 1], [], []>} : vector<8x24xbf16>, vector<24x130xbf16>, vector<8x130xf32> -> vector<8x130xf32>
    %c0_9 = arith.constant 0 : index
    %c0_10 = arith.constant 0 : index
    %19 = vector.load %arg5[%c0_9, %c0_10] : memref<8x1xf32, #tpu.memory_space<vmem>>, vector<8x1xf32>
    %20 = vector.broadcast %19 : vector<8x1xf32> to vector<8x130xf32>
    %21 = arith.addf %18, %20 : vector<8x130xf32>
    %c128_i32 = arith.constant 128 : i32
    %22 = arith.muli %arg1, %c128_i32 : i32
    %c1_i32 = arith.constant 1 : i32
    %23 = arith.subi %22, %c1_i32 : i32
    %24 = tpu.iota {dimensions = array<i32: 1>} : vector<1x130xi32>
    %25 = vector.broadcast %23 : i32 to vector<1x130xi32>
    %26 = arith.addi %25, %24 : vector<1x130xi32>
    %c0_i32 = arith.constant 0 : i32
    %27 = vector.broadcast %c0_i32 : i32 to vector<1x130xi32>
    %28 = arith.cmpi sge, %26, %27 : vector<1x130xi32>
    %c32_i32 = arith.constant 32 : i32
    %29 = vector.broadcast %c32_i32 : i32 to vector<1x130xi32>
    %30 = arith.cmpi slt, %26, %29 : vector<1x130xi32>
    %31 = arith.andi %28, %30 : vector<1x130xi1>
    %cst_11 = arith.constant 0.000000e+00 : f32
    %32 = vector.shape_cast %31 : vector<1x130xi1> to vector<1x130xi1>
    %33 = vector.broadcast %32 : vector<1x130xi1> to vector<8x130xi1>
    %34 = vector.broadcast %cst_11 : f32 to vector<8x130xf32>
    %35 = arith.select %33, %21, %34 : vector<8x130xi1>, vector<8x130xf32>
    %cst_12 = arith.constant 0.000000e+00 : f32
    %36 = vector.broadcast %cst_12 : f32 to vector<8x130xf32>
    %37 = arith.cmpf oge, %35, %36 : vector<8x130xf32>
    %cst_13 = arith.constant 1.000000e-01 : f32
    %38 = vector.broadcast %cst_13 : f32 to vector<8x130xf32>
    %39 = arith.mulf %35, %38 : vector<8x130xf32>
    %40 = arith.select %37, %35, %39 : vector<8x130xi1>, vector<8x130xf32>
    %41 = vector.extract_strided_slice %40 {offsets = [0, 0], sizes = [8, 128], strides = [1, 1]} : vector<8x130xf32> to vector<8x128xf32>
    %42 = vector.extract_strided_slice %40 {offsets = [0, 1], sizes = [8, 128], strides = [1, 1]} : vector<8x130xf32> to vector<8x128xf32>
    %43 = vector.extract_strided_slice %40 {offsets = [0, 2], sizes = [8, 128], strides = [1, 1]} : vector<8x130xf32> to vector<8x128xf32>
    %44 = tpu.concatenate %41, %42, %43 in 0 : vector<8x128xf32>, vector<8x128xf32>, vector<8x128xf32> -> vector<24x128xf32>
    %c0_14 = arith.constant 0 : index
    %c0_15 = arith.constant 0 : index
    %45 = vector.load %arg6[%c0_14, %c0_15] : memref<8x24xbf16, #tpu.memory_space<vmem>>, vector<8x24xbf16>
    %46 = arith.truncf %44 : vector<24x128xf32> to vector<24x128xbf16>
    %cst_16 = arith.constant dense<0.000000e+00> : vector<8x128xf32>
    %47 = tpu.matmul %45, %46, %cst_16 {dimension_numbers = #tpu.dot_dimension_numbers<[1], [0], [0], [1], [0, 0, 1, 1], [], []>} : vector<8x24xbf16>, vector<24x128xbf16>, vector<8x128xf32> -> vector<8x128xf32>
    %c0_17 = arith.constant 0 : index
    %c0_18 = arith.constant 0 : index
    %48 = vector.load %arg7[%c0_17, %c0_18] : memref<8x1xf32, #tpu.memory_space<vmem>>, vector<8x1xf32>
    %49 = vector.broadcast %48 : vector<8x1xf32> to vector<8x128xf32>
    %50 = arith.addf %47, %49 : vector<8x128xf32>
    %51 = arith.addf %50, %7 : vector<8x128xf32>
    %52 = vector.shape_cast %51 : vector<8x128xf32> to vector<1x8x128xf32>
    %53 = arith.truncf %52 : vector<1x8x128xf32> to vector<1x8x128xbf16>
    %c0_19 = arith.constant 0 : index
    %c0_20 = arith.constant 0 : index
    %c0_21 = arith.constant 0 : index
    %54 = vector.load %arg8[%c0_19, %c0_20, %c0_21] : memref<1x8x128xbf16, #tpu.memory_space<vmem>>, vector<1x8x128xbf16>
    tpu.vector_store %arg8[%c0_19, %c0_20, %c0_21], %53 {strides = array<i32>} : memref<1x8x128xbf16, #tpu.memory_space<vmem>>, vector<1x8x128xbf16>,
    return
  }
  func.func @transform_0(%arg0: i32, %arg1: i32) -> (i32, i32, i32) {
    %c0_i32 = arith.constant 0 : i32
    %c0_i32_0 = arith.constant 0 : i32
    return %arg0, %c0_i32, %arg1 : i32, i32, i32
  }
  func.func @transform_1(%arg0: i32, %arg1: i32) -> (i32, i32, i32) {
    %c1_i32 = arith.constant 1 : i32
    %0 = arith.addi %arg1, %c1_i32 : i32
    %c1_i32_0 = arith.constant 1 : i32
    %1 = arith.muli %0, %c1_i32_0 : i32
    %c0_i32 = arith.constant 0 : i32
    %c0_i32_1 = arith.constant 0 : i32
    return %arg0, %c0_i32, %1 : i32, i32, i32
  }
  func.func @transform_2(%arg0: i32, %arg1: i32) -> (i32, i32) {
    %c0_i32 = arith.constant 0 : i32
    %c0_i32_0 = arith.constant 0 : i32
    %c0_i32_1 = arith.constant 0 : i32
    return %c0_i32, %c0_i32_0 : i32, i32
  }
  func.func @transform_3(%arg0: i32, %arg1: i32) -> (i32, i32) {
    %c0_i32 = arith.constant 0 : i32
    %c0_i32_0 = arith.constant 0 : i32
    %c0_i32_1 = arith.constant 0 : i32
    return %c0_i32, %c0_i32_0 : i32, i32
  }
  func.func @transform_4(%arg0: i32, %arg1: i32) -> (i32, i32) {
    %c0_i32 = arith.constant 0 : i32
    %c0_i32_0 = arith.constant 0 : i32
    %c0_i32_1 = arith.constant 0 : i32
    return %c0_i32, %c0_i32_0 : i32, i32
  }
  func.func @transform_5(%arg0: i32, %arg1: i32) -> (i32, i32) {
    %c0_i32 = arith.constant 0 : i32
    %c0_i32_0 = arith.constant 0 : i32
    %c0_i32_1 = arith.constant 0 : i32
    return %c0_i32, %c0_i32_0 : i32, i32
  }
  func.func @transform_6(%arg0: i32, %arg1: i32) -> (i32, i32, i32) {
    %c0_i32 = arith.constant 0 : i32
    %c0_i32_0 = arith.constant 0 : i32
    return %arg0, %c0_i32, %arg1 : i32, i32, i32
  }
}

module attributes {stable_mosaic.version = 11 : i64} {
  func.func @kernel(%arg0: i32, %arg1: i32, %arg2: memref<1x8x128xbf16, #tpu.memory_space<vmem>>, %arg3: memref<1x8x128xbf16, #tpu.memory_space<vmem>>, %arg4: memref<8x40xbf16, #tpu.memory_space<vmem>>, %arg5: memref<8x1xf32, #tpu.memory_space<vmem>>, %arg6: memref<8x40xbf16, #tpu.memory_space<vmem>>, %arg7: memref<8x1xf32, #tpu.memory_space<vmem>>, %arg8: memref<1x8x128xbf16, #tpu.memory_space<vmem>>) attributes {dimension_semantics = [#tpu.dimension_semantics<parallel>, #tpu.dimension_semantics<parallel>], iteration_bounds = array<i64: 2, 1>, scalar_prefetch = 0 : i64, scratch_operands = 0 : i64, tpu.core_type = #tpu.core_type<tc>, window_params = [{transform_indices = @transform_0, window_bounds = array<i64: 1, 8, 128>}, {transform_indices = @transform_1, window_bounds = array<i64: 1, 8, 128>}, {pipeline_mode = #tpu.pipeline_mode<synchronous>, transform_indices = @transform_2, window_bounds = array<i64: 8, 40>}, {pipeline_mode = #tpu.pipeline_mode<synchronous>, transform_indices = @transform_3, window_bounds = array<i64: 8, 1>}, {pipeline_mode = #tpu.pipeline_mode<synchronous>, transform_indices = @transform_4, window_bounds = array<i64: 8, 40>}, {pipeline_mode = #tpu.pipeline_mode<synchronous>, transform_indices = @transform_5, window_bounds = array<i64: 8, 1>}, {transform_indices = @transform_6, window_bounds = array<i64: 1, 8, 128>}]} {
    %c0 = arith.constant 0 : index
    %c0_0 = arith.constant 0 : index
    %c0_1 = arith.constant 0 : index
    %0 = vector.load %arg2[%c0, %c0_0, %c0_1] : memref<1x8x128xbf16, #tpu.memory_space<vmem>>, vector<1x8x128xbf16>
    %1 = vector.shape_cast %0 : vector<1x8x128xbf16> to vector<8x128xbf16>
    %c0_2 = arith.constant 0 : index
    %c0_3 = arith.constant 0 : index
    %c0_4 = arith.constant 0 : index
    %2 = vector.load %arg3[%c0_2, %c0_3, %c0_4] : memref<1x8x128xbf16, #tpu.memory_space<vmem>>, vector<1x8x128xbf16>
    %3 = vector.shape_cast %2 : vector<1x8x128xbf16> to vector<8x128xbf16>
    %4 = vector.extract_strided_slice %3 {offsets = [0, 0], sizes = [8, 8], strides = [1, 1]} : vector<8x128xbf16> to vector<8x8xbf16>
    %5 = tpu.concatenate %1, %4 in 1 : vector<8x128xbf16>, vector<8x8xbf16> -> vector<8x136xbf16>
    %6 = vector.extract_strided_slice %5 {offsets = [0, 4], sizes = [8, 128], strides = [1, 1]} : vector<8x136xbf16> to vector<8x128xbf16>
    %7 = arith.extf %6 : vector<8x128xbf16> to vector<8x128xf32>
    %cst = arith.constant 0.000000e+00 : bf16
    %8 = vector.broadcast %cst : bf16 to vector<8x136xbf16>
    %9 = arith.cmpf oge, %5, %8 : vector<8x136xbf16>
    %cst_5 = arith.constant 1.000980e-01 : bf16
    %10 = vector.broadcast %cst_5 : bf16 to vector<8x136xbf16>
    %11 = arith.mulf %5, %10 : vector<8x136xbf16>
    %12 = arith.select %9, %5, %11 : vector<8x136xi1>, vector<8x136xbf16>
    %13 = vector.extract_strided_slice %12 {offsets = [0, 0], sizes = [8, 132], strides = [1, 1]} : vector<8x136xbf16> to vector<8x132xbf16>
    %14 = vector.extract_strided_slice %12 {offsets = [0, 1], sizes = [8, 132], strides = [1, 1]} : vector<8x136xbf16> to vector<8x132xbf16>
    %15 = vector.extract_strided_slice %12 {offsets = [0, 2], sizes = [8, 132], strides = [1, 1]} : vector<8x136xbf16> to vector<8x132xbf16>
    %16 = vector.extract_strided_slice %12 {offsets = [0, 3], sizes = [8, 132], strides = [1, 1]} : vector<8x136xbf16> to vector<8x132xbf16>
    %17 = vector.extract_strided_slice %12 {offsets = [0, 4], sizes = [8, 132], strides = [1, 1]} : vector<8x136xbf16> to vector<8x132xbf16>
    %18 = tpu.concatenate %13, %14, %15, %16, %17 in 0 : vector<8x132xbf16>, vector<8x132xbf16>, vector<8x132xbf16>, vector<8x132xbf16>, vector<8x132xbf16> -> vector<40x132xbf16>
    %c0_6 = arith.constant 0 : index
    %c0_7 = arith.constant 0 : index
    %19 = vector.load %arg4[%c0_6, %c0_7] : memref<8x40xbf16, #tpu.memory_space<vmem>>, vector<8x40xbf16>
    %cst_8 = arith.constant dense<0.000000e+00> : vector<8x132xf32>
    %20 = tpu.matmul %19, %18, %cst_8 {dimension_numbers = #tpu.dot_dimension_numbers<[1], [0], [0], [1], [0, 0, 1, 1], [], []>} : vector<8x40xbf16>, vector<40x132xbf16>, vector<8x132xf32> -> vector<8x132xf32>
    %c0_9 = arith.constant 0 : index
    %c0_10 = arith.constant 0 : index
    %21 = vector.load %arg5[%c0_9, %c0_10] : memref<8x1xf32, #tpu.memory_space<vmem>>, vector<8x1xf32>
    %22 = vector.broadcast %21 : vector<8x1xf32> to vector<8x132xf32>
    %23 = arith.addf %20, %22 : vector<8x132xf32>
    %c128_i32 = arith.constant 128 : i32
    %24 = arith.muli %arg1, %c128_i32 : i32
    %c2_i32 = arith.constant 2 : i32
    %25 = arith.subi %24, %c2_i32 : i32
    %26 = tpu.iota {dimensions = array<i32: 1>} : vector<1x132xi32>
    %27 = vector.broadcast %25 : i32 to vector<1x132xi32>
    %28 = arith.addi %27, %26 : vector<1x132xi32>
    %c0_i32 = arith.constant 0 : i32
    %29 = vector.broadcast %c0_i32 : i32 to vector<1x132xi32>
    %30 = arith.cmpi sge, %28, %29 : vector<1x132xi32>
    %c32_i32 = arith.constant 32 : i32
    %31 = vector.broadcast %c32_i32 : i32 to vector<1x132xi32>
    %32 = arith.cmpi slt, %28, %31 : vector<1x132xi32>
    %33 = arith.andi %30, %32 : vector<1x132xi1>
    %cst_11 = arith.constant 0.000000e+00 : f32
    %34 = vector.shape_cast %33 : vector<1x132xi1> to vector<1x132xi1>
    %35 = vector.broadcast %34 : vector<1x132xi1> to vector<8x132xi1>
    %36 = vector.broadcast %cst_11 : f32 to vector<8x132xf32>
    %37 = arith.select %35, %23, %36 : vector<8x132xi1>, vector<8x132xf32>
    %cst_12 = arith.constant 0.000000e+00 : f32
    %38 = vector.broadcast %cst_12 : f32 to vector<8x132xf32>
    %39 = arith.cmpf oge, %37, %38 : vector<8x132xf32>
    %cst_13 = arith.constant 1.000000e-01 : f32
    %40 = vector.broadcast %cst_13 : f32 to vector<8x132xf32>
    %41 = arith.mulf %37, %40 : vector<8x132xf32>
    %42 = arith.select %39, %37, %41 : vector<8x132xi1>, vector<8x132xf32>
    %43 = vector.extract_strided_slice %42 {offsets = [0, 0], sizes = [8, 128], strides = [1, 1]} : vector<8x132xf32> to vector<8x128xf32>
    %44 = vector.extract_strided_slice %42 {offsets = [0, 1], sizes = [8, 128], strides = [1, 1]} : vector<8x132xf32> to vector<8x128xf32>
    %45 = vector.extract_strided_slice %42 {offsets = [0, 2], sizes = [8, 128], strides = [1, 1]} : vector<8x132xf32> to vector<8x128xf32>
    %46 = vector.extract_strided_slice %42 {offsets = [0, 3], sizes = [8, 128], strides = [1, 1]} : vector<8x132xf32> to vector<8x128xf32>
    %47 = vector.extract_strided_slice %42 {offsets = [0, 4], sizes = [8, 128], strides = [1, 1]} : vector<8x132xf32> to vector<8x128xf32>
    %48 = tpu.concatenate %43, %44, %45, %46, %47 in 0 : vector<8x128xf32>, vector<8x128xf32>, vector<8x128xf32>, vector<8x128xf32>, vector<8x128xf32> -> vector<40x128xf32>
    %c0_14 = arith.constant 0 : index
    %c0_15 = arith.constant 0 : index
    %49 = vector.load %arg6[%c0_14, %c0_15] : memref<8x40xbf16, #tpu.memory_space<vmem>>, vector<8x40xbf16>
    %50 = arith.truncf %48 : vector<40x128xf32> to vector<40x128xbf16>
    %cst_16 = arith.constant dense<0.000000e+00> : vector<8x128xf32>
    %51 = tpu.matmul %49, %50, %cst_16 {dimension_numbers = #tpu.dot_dimension_numbers<[1], [0], [0], [1], [0, 0, 1, 1], [], []>} : vector<8x40xbf16>, vector<40x128xbf16>, vector<8x128xf32> -> vector<8x128xf32>
    %c0_17 = arith.constant 0 : index
    %c0_18 = arith.constant 0 : index
    %52 = vector.load %arg7[%c0_17, %c0_18] : memref<8x1xf32, #tpu.memory_space<vmem>>, vector<8x1xf32>
    %53 = vector.broadcast %52 : vector<8x1xf32> to vector<8x128xf32>
    %54 = arith.addf %51, %53 : vector<8x128xf32>
    %55 = arith.addf %54, %7 : vector<8x128xf32>
    %56 = vector.shape_cast %55 : vector<8x128xf32> to vector<1x8x128xf32>
    %57 = arith.truncf %56 : vector<1x8x128xf32> to vector<1x8x128xbf16>
    %c0_19 = arith.constant 0 : index
    %c0_20 = arith.constant 0 : index
    %c0_21 = arith.constant 0 : index
    %58 = vector.load %arg8[%c0_19, %c0_20, %c0_21] : memref<1x8x128xbf16, #tpu.memory_space<vmem>>, vector<1x8x128xbf16>
    tpu.vector_store %arg8[%c0_19, %c0_20, %c0_21], %57 {strides = array<i32>} : memref<1x8x128xbf16, #tpu.memory_space<vmem>>, vector<1x8x128xbf16>,
    return
  }
  func.func @transform_0(%arg0: i32, %arg1: i32) -> (i32, i32, i32) {
    %c0_i32 = arith.constant 0 : i32
    %c0_i32_0 = arith.constant 0 : i32
    return %arg0, %c0_i32, %arg1 : i32, i32, i32
  }
  func.func @transform_1(%arg0: i32, %arg1: i32) -> (i32, i32, i32) {
    %c1_i32 = arith.constant 1 : i32
    %0 = arith.addi %arg1, %c1_i32 : i32
    %c1_i32_0 = arith.constant 1 : i32
    %1 = arith.muli %0, %c1_i32_0 : i32
    %c0_i32 = arith.constant 0 : i32
    %c0_i32_1 = arith.constant 0 : i32
    return %arg0, %c0_i32, %1 : i32, i32, i32
  }
  func.func @transform_2(%arg0: i32, %arg1: i32) -> (i32, i32) {
    %c0_i32 = arith.constant 0 : i32
    %c0_i32_0 = arith.constant 0 : i32
    %c0_i32_1 = arith.constant 0 : i32
    return %c0_i32, %c0_i32_0 : i32, i32
  }
  func.func @transform_3(%arg0: i32, %arg1: i32) -> (i32, i32) {
    %c0_i32 = arith.constant 0 : i32
    %c0_i32_0 = arith.constant 0 : i32
    %c0_i32_1 = arith.constant 0 : i32
    return %c0_i32, %c0_i32_0 : i32, i32
  }
  func.func @transform_4(%arg0: i32, %arg1: i32) -> (i32, i32) {
    %c0_i32 = arith.constant 0 : i32
    %c0_i32_0 = arith.constant 0 : i32
    %c0_i32_1 = arith.constant 0 : i32
    return %c0_i32, %c0_i32_0 : i32, i32
  }
  func.func @transform_5(%arg0: i32, %arg1: i32) -> (i32, i32) {
    %c0_i32 = arith.constant 0 : i32
    %c0_i32_0 = arith.constant 0 : i32
    %c0_i32_1 = arith.constant 0 : i32
    return %c0_i32, %c0_i32_0 : i32, i32
  }
  func.func @transform_6(%arg0: i32, %arg1: i32) -> (i32, i32, i32) {
    %c0_i32 = arith.constant 0 : i32
    %c0_i32_0 = arith.constant 0 : i32
    return %arg0, %c0_i32, %arg1 : i32, i32, i32
  }
}

module attributes {stable_mosaic.version = 11 : i64} {
  func.func @kernel(%arg0: i32, %arg1: i32, %arg2: memref<1x8x128xbf16, #tpu.memory_space<vmem>>, %arg3: memref<1x8x128xbf16, #tpu.memory_space<vmem>>, %arg4: memref<1x8x128xbf16, #tpu.memory_space<vmem>>, %arg5: memref<8x40xbf16, #tpu.memory_space<vmem>>, %arg6: memref<8x1xf32, #tpu.memory_space<vmem>>, %arg7: memref<8x40xbf16, #tpu.memory_space<vmem>>, %arg8: memref<8x1xf32, #tpu.memory_space<vmem>>, %arg9: memref<1x8x128xbf16, #tpu.memory_space<vmem>>) attributes {dimension_semantics = [#tpu.dimension_semantics<parallel>, #tpu.dimension_semantics<parallel>], iteration_bounds = array<i64: 2, 1>, scalar_prefetch = 0 : i64, scratch_operands = 0 : i64, tpu.core_type = #tpu.core_type<tc>, window_params = [{transform_indices = @transform_0, window_bounds = array<i64: 1, 8, 128>}, {transform_indices = @transform_1, window_bounds = array<i64: 1, 8, 128>}, {transform_indices = @transform_2, window_bounds = array<i64: 1, 8, 128>}, {pipeline_mode = #tpu.pipeline_mode<synchronous>, transform_indices = @transform_3, window_bounds = array<i64: 8, 40>}, {pipeline_mode = #tpu.pipeline_mode<synchronous>, transform_indices = @transform_4, window_bounds = array<i64: 8, 1>}, {pipeline_mode = #tpu.pipeline_mode<synchronous>, transform_indices = @transform_5, window_bounds = array<i64: 8, 40>}, {pipeline_mode = #tpu.pipeline_mode<synchronous>, transform_indices = @transform_6, window_bounds = array<i64: 8, 1>}, {transform_indices = @transform_7, window_bounds = array<i64: 1, 8, 128>}]} {
    %c0 = arith.constant 0 : index
    %c0_0 = arith.constant 0 : index
    %c0_1 = arith.constant 0 : index
    %0 = vector.load %arg2[%c0, %c0_0, %c0_1] : memref<1x8x128xbf16, #tpu.memory_space<vmem>>, vector<1x8x128xbf16>
    %1 = vector.shape_cast %0 : vector<1x8x128xbf16> to vector<8x128xbf16>
    %c0_2 = arith.constant 0 : index
    %c0_3 = arith.constant 0 : index
    %c0_4 = arith.constant 0 : index
    %2 = vector.load %arg3[%c0_2, %c0_3, %c0_4] : memref<1x8x128xbf16, #tpu.memory_space<vmem>>, vector<1x8x128xbf16>
    %3 = vector.shape_cast %2 : vector<1x8x128xbf16> to vector<8x128xbf16>
    %4 = vector.extract_strided_slice %3 {offsets = [0, 0], sizes = [8, 16], strides = [1, 1]} : vector<8x128xbf16> to vector<8x16xbf16>
    %5 = tpu.concatenate %1, %4 in 1 : vector<8x128xbf16>, vector<8x16xbf16> -> vector<8x144xbf16>
    %6 = vector.extract_strided_slice %5 {offsets = [0, 8], sizes = [8, 128], strides = [1, 1]} : vector<8x144xbf16> to vector<8x128xbf16>
    %7 = arith.extf %6 : vector<8x128xbf16> to vector<8x128xf32>
    %cst = arith.constant 0.000000e+00 : bf16
    %8 = vector.broadcast %cst : bf16 to vector<8x144xbf16>
    %9 = arith.cmpf oge, %5, %8 : vector<8x144xbf16>
    %cst_5 = arith.constant 1.000980e-01 : bf16
    %10 = vector.broadcast %cst_5 : bf16 to vector<8x144xbf16>
    %11 = arith.mulf %5, %10 : vector<8x144xbf16>
    %12 = arith.select %9, %5, %11 : vector<8x144xi1>, vector<8x144xbf16>
    %13 = vector.extract_strided_slice %12 {offsets = [0, 0], sizes = [8, 132], strides = [1, 1]} : vector<8x144xbf16> to vector<8x132xbf16>
    %14 = vector.extract_strided_slice %12 {offsets = [0, 3], sizes = [8, 132], strides = [1, 1]} : vector<8x144xbf16> to vector<8x132xbf16>
    %15 = vector.extract_strided_slice %12 {offsets = [0, 6], sizes = [8, 132], strides = [1, 1]} : vector<8x144xbf16> to vector<8x132xbf16>
    %16 = vector.extract_strided_slice %12 {offsets = [0, 9], sizes = [8, 132], strides = [1, 1]} : vector<8x144xbf16> to vector<8x132xbf16>
    %17 = vector.extract_strided_slice %12 {offsets = [0, 12], sizes = [8, 132], strides = [1, 1]} : vector<8x144xbf16> to vector<8x132xbf16>
    %18 = tpu.concatenate %13, %14, %15, %16, %17 in 0 : vector<8x132xbf16>, vector<8x132xbf16>, vector<8x132xbf16>, vector<8x132xbf16>, vector<8x132xbf16> -> vector<40x132xbf16>
    %c0_6 = arith.constant 0 : index
    %c0_7 = arith.constant 0 : index
    %19 = vector.load %arg5[%c0_6, %c0_7] : memref<8x40xbf16, #tpu.memory_space<vmem>>, vector<8x40xbf16>
    %cst_8 = arith.constant dense<0.000000e+00> : vector<8x132xf32>
    %20 = tpu.matmul %19, %18, %cst_8 {dimension_numbers = #tpu.dot_dimension_numbers<[1], [0], [0], [1], [0, 0, 1, 1], [], []>} : vector<8x40xbf16>, vector<40x132xbf16>, vector<8x132xf32> -> vector<8x132xf32>
    %c0_9 = arith.constant 0 : index
    %c0_10 = arith.constant 0 : index
    %21 = vector.load %arg6[%c0_9, %c0_10] : memref<8x1xf32, #tpu.memory_space<vmem>>, vector<8x1xf32>
    %22 = vector.broadcast %21 : vector<8x1xf32> to vector<8x132xf32>
    %23 = arith.addf %20, %22 : vector<8x132xf32>
    %c128_i32 = arith.constant 128 : i32
    %24 = arith.muli %arg1, %c128_i32 : i32
    %c2_i32 = arith.constant 2 : i32
    %25 = arith.subi %24, %c2_i32 : i32
    %26 = tpu.iota {dimensions = array<i32: 1>} : vector<1x132xi32>
    %27 = vector.broadcast %25 : i32 to vector<1x132xi32>
    %28 = arith.addi %27, %26 : vector<1x132xi32>
    %c0_i32 = arith.constant 0 : i32
    %29 = vector.broadcast %c0_i32 : i32 to vector<1x132xi32>
    %30 = arith.cmpi sge, %28, %29 : vector<1x132xi32>
    %c32_i32 = arith.constant 32 : i32
    %31 = vector.broadcast %c32_i32 : i32 to vector<1x132xi32>
    %32 = arith.cmpi slt, %28, %31 : vector<1x132xi32>
    %33 = arith.andi %30, %32 : vector<1x132xi1>
    %cst_11 = arith.constant 0.000000e+00 : f32
    %34 = vector.shape_cast %33 : vector<1x132xi1> to vector<1x132xi1>
    %35 = vector.broadcast %34 : vector<1x132xi1> to vector<8x132xi1>
    %36 = vector.broadcast %cst_11 : f32 to vector<8x132xf32>
    %37 = arith.select %35, %23, %36 : vector<8x132xi1>, vector<8x132xf32>
    %cst_12 = arith.constant 0.000000e+00 : f32
    %38 = vector.broadcast %cst_12 : f32 to vector<8x132xf32>
    %39 = arith.cmpf oge, %37, %38 : vector<8x132xf32>
    %cst_13 = arith.constant 1.000000e-01 : f32
    %40 = vector.broadcast %cst_13 : f32 to vector<8x132xf32>
    %41 = arith.mulf %37, %40 : vector<8x132xf32>
    %42 = arith.select %39, %37, %41 : vector<8x132xi1>, vector<8x132xf32>
    %43 = vector.extract_strided_slice %42 {offsets = [0, 0], sizes = [8, 128], strides = [1, 1]} : vector<8x132xf32> to vector<8x128xf32>
    %44 = vector.extract_strided_slice %42 {offsets = [0, 1], sizes = [8, 128], strides = [1, 1]} : vector<8x132xf32> to vector<8x128xf32>
    %45 = vector.extract_strided_slice %42 {offsets = [0, 2], sizes = [8, 128], strides = [1, 1]} : vector<8x132xf32> to vector<8x128xf32>
    %46 = vector.extract_strided_slice %42 {offsets = [0, 3], sizes = [8, 128], strides = [1, 1]} : vector<8x132xf32> to vector<8x128xf32>
    %47 = vector.extract_strided_slice %42 {offsets = [0, 4], sizes = [8, 128], strides = [1, 1]} : vector<8x132xf32> to vector<8x128xf32>
    %48 = tpu.concatenate %43, %44, %45, %46, %47 in 0 : vector<8x128xf32>, vector<8x128xf32>, vector<8x128xf32>, vector<8x128xf32>, vector<8x128xf32> -> vector<40x128xf32>
    %c0_14 = arith.constant 0 : index
    %c0_15 = arith.constant 0 : index
    %49 = vector.load %arg7[%c0_14, %c0_15] : memref<8x40xbf16, #tpu.memory_space<vmem>>, vector<8x40xbf16>
    %50 = arith.truncf %48 : vector<40x128xf32> to vector<40x128xbf16>
    %cst_16 = arith.constant dense<0.000000e+00> : vector<8x128xf32>
    %51 = tpu.matmul %49, %50, %cst_16 {dimension_numbers = #tpu.dot_dimension_numbers<[1], [0], [0], [1], [0, 0, 1, 1], [], []>} : vector<8x40xbf16>, vector<40x128xbf16>, vector<8x128xf32> -> vector<8x128xf32>
    %c0_17 = arith.constant 0 : index
    %c0_18 = arith.constant 0 : index
    %52 = vector.load %arg8[%c0_17, %c0_18] : memref<8x1xf32, #tpu.memory_space<vmem>>, vector<8x1xf32>
    %53 = vector.broadcast %52 : vector<8x1xf32> to vector<8x128xf32>
    %54 = arith.addf %51, %53 : vector<8x128xf32>
    %55 = arith.addf %54, %7 : vector<8x128xf32>
    %c0_19 = arith.constant 0 : index
    %c0_20 = arith.constant 0 : index
    %c0_21 = arith.constant 0 : index
    %56 = vector.load %arg4[%c0_19, %c0_20, %c0_21] : memref<1x8x128xbf16, #tpu.memory_space<vmem>>, vector<1x8x128xbf16>
    %57 = vector.shape_cast %56 : vector<1x8x128xbf16> to vector<8x128xbf16>
    %58 = arith.extf %57 : vector<8x128xbf16> to vector<8x128xf32>
    %59 = arith.addf %55, %58 : vector<8x128xf32>
    %cst_22 = arith.constant 5.000000e-01 : f32
    %60 = vector.broadcast %cst_22 : f32 to vector<8x128xf32>
    %61 = arith.mulf %59, %60 : vector<8x128xf32>
    %62 = vector.shape_cast %61 : vector<8x128xf32> to vector<1x8x128xf32>
    %63 = arith.truncf %62 : vector<1x8x128xf32> to vector<1x8x128xbf16>
    %c0_23 = arith.constant 0 : index
    %c0_24 = arith.constant 0 : index
    %c0_25 = arith.constant 0 : index
    %64 = vector.load %arg9[%c0_23, %c0_24, %c0_25] : memref<1x8x128xbf16, #tpu.memory_space<vmem>>, vector<1x8x128xbf16>
    tpu.vector_store %arg9[%c0_23, %c0_24, %c0_25], %63 {strides = array<i32>} : memref<1x8x128xbf16, #tpu.memory_space<vmem>>, vector<1x8x128xbf16>,
    return
  }
  func.func @transform_0(%arg0: i32, %arg1: i32) -> (i32, i32, i32) {
    %c0_i32 = arith.constant 0 : i32
    %c0_i32_0 = arith.constant 0 : i32
    return %arg0, %c0_i32, %arg1 : i32, i32, i32
  }
  func.func @transform_1(%arg0: i32, %arg1: i32) -> (i32, i32, i32) {
    %c1_i32 = arith.constant 1 : i32
    %0 = arith.addi %arg1, %c1_i32 : i32
    %c1_i32_0 = arith.constant 1 : i32
    %1 = arith.muli %0, %c1_i32_0 : i32
    %c0_i32 = arith.constant 0 : i32
    %c0_i32_1 = arith.constant 0 : i32
    return %arg0, %c0_i32, %1 : i32, i32, i32
  }
  func.func @transform_2(%arg0: i32, %arg1: i32) -> (i32, i32, i32) {
    %c0_i32 = arith.constant 0 : i32
    %c0_i32_0 = arith.constant 0 : i32
    return %arg0, %c0_i32, %arg1 : i32, i32, i32
  }
  func.func @transform_3(%arg0: i32, %arg1: i32) -> (i32, i32) {
    %c0_i32 = arith.constant 0 : i32
    %c0_i32_0 = arith.constant 0 : i32
    %c0_i32_1 = arith.constant 0 : i32
    return %c0_i32, %c0_i32_0 : i32, i32
  }
  func.func @transform_4(%arg0: i32, %arg1: i32) -> (i32, i32) {
    %c0_i32 = arith.constant 0 : i32
    %c0_i32_0 = arith.constant 0 : i32
    %c0_i32_1 = arith.constant 0 : i32
    return %c0_i32, %c0_i32_0 : i32, i32
  }
  func.func @transform_5(%arg0: i32, %arg1: i32) -> (i32, i32) {
    %c0_i32 = arith.constant 0 : i32
    %c0_i32_0 = arith.constant 0 : i32
    %c0_i32_1 = arith.constant 0 : i32
    return %c0_i32, %c0_i32_0 : i32, i32
  }
  func.func @transform_6(%arg0: i32, %arg1: i32) -> (i32, i32) {
    %c0_i32 = arith.constant 0 : i32
    %c0_i32_0 = arith.constant 0 : i32
    %c0_i32_1 = arith.constant 0 : i32
    return %c0_i32, %c0_i32_0 : i32, i32
  }
  func.func @transform_7(%arg0: i32, %arg1: i32) -> (i32, i32, i32) {
    %c0_i32 = arith.constant 0 : i32
    %c0_i32_0 = arith.constant 0 : i32
    return %arg0, %c0_i32, %arg1 : i32, i32, i32
  }
}

module attributes {stable_mosaic.version = 11 : i64} {
  func.func @kernel(%arg0: i32, %arg1: i32, %arg2: memref<1x8x128xbf16, #tpu.memory_space<vmem>>, %arg3: memref<1x8x128xbf16, #tpu.memory_space<vmem>>, %arg4: memref<16x16xbf16, #tpu.memory_space<vmem>>, %arg5: memref<16x1xf32, #tpu.memory_space<vmem>>, %arg6: memref<1x16x128xbf16, #tpu.memory_space<vmem>>) attributes {dimension_semantics = [#tpu.dimension_semantics<parallel>, #tpu.dimension_semantics<parallel>], iteration_bounds = array<i64: 2, 1>, scalar_prefetch = 0 : i64, scratch_operands = 0 : i64, tpu.core_type = #tpu.core_type<tc>, window_params = [{transform_indices = @transform_0, window_bounds = array<i64: 1, 8, 128>}, {transform_indices = @transform_1, window_bounds = array<i64: 1, 8, 128>}, {pipeline_mode = #tpu.pipeline_mode<synchronous>, transform_indices = @transform_2, window_bounds = array<i64: 16, 16>}, {pipeline_mode = #tpu.pipeline_mode<synchronous>, transform_indices = @transform_3, window_bounds = array<i64: 16, 1>}, {transform_indices = @transform_4, window_bounds = array<i64: 1, 16, 128>}]} {
    %c0 = arith.constant 0 : index
    %c0_0 = arith.constant 0 : index
    %c0_1 = arith.constant 0 : index
    %0 = vector.load %arg2[%c0, %c0_0, %c0_1] : memref<1x8x128xbf16, #tpu.memory_space<vmem>>, vector<1x8x128xbf16>
    %1 = vector.shape_cast %0 : vector<1x8x128xbf16> to vector<8x128xbf16>
    %c0_2 = arith.constant 0 : index
    %c0_3 = arith.constant 0 : index
    %c0_4 = arith.constant 0 : index
    %2 = vector.load %arg3[%c0_2, %c0_3, %c0_4] : memref<1x8x128xbf16, #tpu.memory_space<vmem>>, vector<1x8x128xbf16>
    %3 = vector.shape_cast %2 : vector<1x8x128xbf16> to vector<8x128xbf16>
    %4 = vector.extract_strided_slice %3 {offsets = [0, 0], sizes = [8, 1], strides = [1, 1]} : vector<8x128xbf16> to vector<8x1xbf16>
    %5 = tpu.concatenate %1, %4 in 1 : vector<8x128xbf16>, vector<8x1xbf16> -> vector<8x129xbf16>
    %cst = arith.constant 0.000000e+00 : bf16
    %6 = vector.broadcast %cst : bf16 to vector<8x129xbf16>
    %7 = arith.cmpf oge, %5, %6 : vector<8x129xbf16>
    %cst_5 = arith.constant 1.000980e-01 : bf16
    %8 = vector.broadcast %cst_5 : bf16 to vector<8x129xbf16>
    %9 = arith.mulf %5, %8 : vector<8x129xbf16>
    %10 = arith.select %7, %5, %9 : vector<8x129xi1>, vector<8x129xbf16>
    %11 = vector.extract_strided_slice %10 {offsets = [0, 0], sizes = [8, 128], strides = [1, 1]} : vector<8x129xbf16> to vector<8x128xbf16>
    %12 = vector.extract_strided_slice %10 {offsets = [0, 1], sizes = [8, 128], strides = [1, 1]} : vector<8x129xbf16> to vector<8x128xbf16>
    %13 = tpu.concatenate %11, %12 in 0 : vector<8x128xbf16>, vector<8x128xbf16> -> vector<16x128xbf16>
    %c0_6 = arith.constant 0 : index
    %c0_7 = arith.constant 0 : index
    %14 = vector.load %arg4[%c0_6, %c0_7] : memref<16x16xbf16, #tpu.memory_space<vmem>>, vector<16x16xbf16>
    %cst_8 = arith.constant dense<0.000000e+00> : vector<16x128xf32>
    %15 = tpu.matmul %14, %13, %cst_8 {dimension_numbers = #tpu.dot_dimension_numbers<[1], [0], [0], [1], [0, 0, 1, 1], [], []>} : vector<16x16xbf16>, vector<16x128xbf16>, vector<16x128xf32> -> vector<16x128xf32>
    %c0_9 = arith.constant 0 : index
    %c0_10 = arith.constant 0 : index
    %16 = vector.load %arg5[%c0_9, %c0_10] : memref<16x1xf32, #tpu.memory_space<vmem>>, vector<16x1xf32>
    %17 = vector.broadcast %16 : vector<16x1xf32> to vector<16x128xf32>
    %18 = arith.addf %15, %17 : vector<16x128xf32>
    %19 = vector.shape_cast %18 : vector<16x128xf32> to vector<1x16x128xf32>
    %20 = arith.truncf %19 : vector<1x16x128xf32> to vector<1x16x128xbf16>
    %c0_11 = arith.constant 0 : index
    %c0_12 = arith.constant 0 : index
    %c0_13 = arith.constant 0 : index
    %21 = vector.load %arg6[%c0_11, %c0_12, %c0_13] : memref<1x16x128xbf16, #tpu.memory_space<vmem>>, vector<1x16x128xbf16>
    tpu.vector_store %arg6[%c0_11, %c0_12, %c0_13], %20 {strides = array<i32>} : memref<1x16x128xbf16, #tpu.memory_space<vmem>>, vector<1x16x128xbf16>,
    return
  }
  func.func @transform_0(%arg0: i32, %arg1: i32) -> (i32, i32, i32) {
    %c0_i32 = arith.constant 0 : i32
    %c0_i32_0 = arith.constant 0 : i32
    return %arg0, %c0_i32, %arg1 : i32, i32, i32
  }
  func.func @transform_1(%arg0: i32, %arg1: i32) -> (i32, i32, i32) {
    %c1_i32 = arith.constant 1 : i32
    %0 = arith.addi %arg1, %c1_i32 : i32
    %c1_i32_0 = arith.constant 1 : i32
    %1 = arith.muli %0, %c1_i32_0 : i32
    %c0_i32 = arith.constant 0 : i32
    %c0_i32_1 = arith.constant 0 : i32
    return %arg0, %c0_i32, %1 : i32, i32, i32
  }
  func.func @transform_2(%arg0: i32, %arg1: i32) -> (i32, i32) {
    %c0_i32 = arith.constant 0 : i32
    %c0_i32_0 = arith.constant 0 : i32
    %c0_i32_1 = arith.constant 0 : i32
    return %c0_i32, %c0_i32_0 : i32, i32
  }
  func.func @transform_3(%arg0: i32, %arg1: i32) -> (i32, i32) {
    %c0_i32 = arith.constant 0 : i32
    %c0_i32_0 = arith.constant 0 : i32
    %c0_i32_1 = arith.constant 0 : i32
    return %c0_i32, %c0_i32_0 : i32, i32
  }
  func.func @transform_4(%arg0: i32, %arg1: i32) -> (i32, i32, i32) {
    %c0_i32 = arith.constant 0 : i32
    %c0_i32_0 = arith.constant 0 : i32
    return %arg0, %c0_i32, %arg1 : i32, i32, i32
  }
}

module attributes {stable_mosaic.version = 11 : i64} {
  func.func @kernel(%arg0: i32, %arg1: i32, %arg2: memref<1x1x128xbf16, #tpu.memory_space<vmem>>, %arg3: memref<1x4x128xbf16, #tpu.memory_space<vmem>>, %arg4: memref<4x1xbf16, #tpu.memory_space<vmem>>, %arg5: memref<4x1xf32, #tpu.memory_space<vmem>>, %arg6: memref<1x4x128xbf16, #tpu.memory_space<vmem>>) attributes {dimension_semantics = [#tpu.dimension_semantics<parallel>, #tpu.dimension_semantics<parallel>], iteration_bounds = array<i64: 2, 1>, scalar_prefetch = 0 : i64, scratch_operands = 0 : i64, tpu.core_type = #tpu.core_type<tc>, window_params = [{transform_indices = @transform_0, window_bounds = array<i64: 1, 1, 128>}, {transform_indices = @transform_1, window_bounds = array<i64: 1, 4, 128>}, {pipeline_mode = #tpu.pipeline_mode<synchronous>, transform_indices = @transform_2, window_bounds = array<i64: 4, 1>}, {pipeline_mode = #tpu.pipeline_mode<synchronous>, transform_indices = @transform_3, window_bounds = array<i64: 4, 1>}, {transform_indices = @transform_4, window_bounds = array<i64: 1, 4, 128>}]} {
    %c0 = arith.constant 0 : index
    %c0_0 = arith.constant 0 : index
    %c0_1 = arith.constant 0 : index
    %0 = vector.load %arg2[%c0, %c0_0, %c0_1] : memref<1x1x128xbf16, #tpu.memory_space<vmem>>, vector<1x1x128xbf16>
    %1 = vector.shape_cast %0 : vector<1x1x128xbf16> to vector<1x128xbf16>
    %c0_2 = arith.constant 0 : index
    %c0_3 = arith.constant 0 : index
    %2 = vector.load %arg4[%c0_2, %c0_3] : memref<4x1xbf16, #tpu.memory_space<vmem>>, vector<4x1xbf16>
    %cst = arith.constant dense<0.000000e+00> : vector<4x128xf32>
    %3 = tpu.matmul %2, %1, %cst {dimension_numbers = #tpu.dot_dimension_numbers<[1], [0], [0], [1], [0, 0, 1, 1], [], []>} : vector<4x1xbf16>, vector<1x128xbf16>, vector<4x128xf32> -> vector<4x128xf32>
    %c0_4 = arith.constant 0 : index
    %c0_5 = arith.constant 0 : index
    %4 = vector.load %arg5[%c0_4, %c0_5] : memref<4x1xf32, #tpu.memory_space<vmem>>, vector<4x1xf32>
    %5 = vector.broadcast %4 : vector<4x1xf32> to vector<4x128xf32>
    %6 = arith.addf %3, %5 : vector<4x128xf32>
    %c0_6 = arith.constant 0 : index
    %c0_7 = arith.constant 0 : index
    %c0_8 = arith.constant 0 : index
    %7 = vector.load %arg3[%c0_6, %c0_7, %c0_8] : memref<1x4x128xbf16, #tpu.memory_space<vmem>>, vector<1x4x128xbf16>
    %8 = vector.shape_cast %7 : vector<1x4x128xbf16> to vector<4x128xbf16>
    %9 = arith.extf %8 : vector<4x128xbf16> to vector<4x128xf32>
    %10 = arith.addf %6, %9 : vector<4x128xf32>
    %11 = vector.shape_cast %10 : vector<4x128xf32> to vector<1x4x128xf32>
    %12 = arith.truncf %11 : vector<1x4x128xf32> to vector<1x4x128xbf16>
    %c0_9 = arith.constant 0 : index
    %c0_10 = arith.constant 0 : index
    %c0_11 = arith.constant 0 : index
    %13 = vector.load %arg6[%c0_9, %c0_10, %c0_11] : memref<1x4x128xbf16, #tpu.memory_space<vmem>>, vector<1x4x128xbf16>
    tpu.vector_store %arg6[%c0_9, %c0_10, %c0_11], %12 {strides = array<i32>} : memref<1x4x128xbf16, #tpu.memory_space<vmem>>, vector<1x4x128xbf16>,
    return
  }
  func.func @transform_0(%arg0: i32, %arg1: i32) -> (i32, i32, i32) {
    %c0_i32 = arith.constant 0 : i32
    %c0_i32_0 = arith.constant 0 : i32
    return %arg0, %c0_i32, %arg1 : i32, i32, i32
  }
  func.func @transform_1(%arg0: i32, %arg1: i32) -> (i32, i32, i32) {
    %c0_i32 = arith.constant 0 : i32
    %c0_i32_0 = arith.constant 0 : i32
    return %arg0, %c0_i32, %arg1 : i32, i32, i32
  }
  func.func @transform_2(%arg0: i32, %arg1: i32) -> (i32, i32) {
    %c0_i32 = arith.constant 0 : i32
    %c0_i32_0 = arith.constant 0 : i32
    %c0_i32_1 = arith.constant 0 : i32
    return %c0_i32, %c0_i32_0 : i32, i32
  }
  func.func @transform_3(%arg0: i32, %arg1: i32) -> (i32, i32) {
    %c0_i32 = arith.constant 0 : i32
    %c0_i32_0 = arith.constant 0 : i32
    %c0_i32_1 = arith.constant 0 : i32
    return %c0_i32, %c0_i32_0 : i32, i32
  }
  func.func @transform_4(%arg0: i32, %arg1: i32) -> (i32, i32, i32) {
    %c0_i32 = arith.constant 0 : i32
    %c0_i32_0 = arith.constant 0 : i32
    return %arg0, %c0_i32, %arg1 : i32, i32, i32
  }
}

module attributes {stable_mosaic.version = 11 : i64} {
  func.func @kernel(%arg0: i32, %arg1: i32, %arg2: memref<1x4x128xbf16, #tpu.memory_space<vmem>>, %arg3: memref<1x4x128xbf16, #tpu.memory_space<vmem>>, %arg4: memref<4x12xbf16, #tpu.memory_space<vmem>>, %arg5: memref<4x1xf32, #tpu.memory_space<vmem>>, %arg6: memref<4x12xbf16, #tpu.memory_space<vmem>>, %arg7: memref<4x1xf32, #tpu.memory_space<vmem>>, %arg8: memref<1x4x128xbf16, #tpu.memory_space<vmem>>) attributes {dimension_semantics = [#tpu.dimension_semantics<parallel>, #tpu.dimension_semantics<parallel>], iteration_bounds = array<i64: 2, 1>, scalar_prefetch = 0 : i64, scratch_operands = 0 : i64, tpu.core_type = #tpu.core_type<tc>, window_params = [{transform_indices = @transform_0, window_bounds = array<i64: 1, 4, 128>}, {transform_indices = @transform_1, window_bounds = array<i64: 1, 4, 128>}, {pipeline_mode = #tpu.pipeline_mode<synchronous>, transform_indices = @transform_2, window_bounds = array<i64: 4, 12>}, {pipeline_mode = #tpu.pipeline_mode<synchronous>, transform_indices = @transform_3, window_bounds = array<i64: 4, 1>}, {pipeline_mode = #tpu.pipeline_mode<synchronous>, transform_indices = @transform_4, window_bounds = array<i64: 4, 12>}, {pipeline_mode = #tpu.pipeline_mode<synchronous>, transform_indices = @transform_5, window_bounds = array<i64: 4, 1>}, {transform_indices = @transform_6, window_bounds = array<i64: 1, 4, 128>}]} {
    %c0 = arith.constant 0 : index
    %c0_0 = arith.constant 0 : index
    %c0_1 = arith.constant 0 : index
    %0 = vector.load %arg2[%c0, %c0_0, %c0_1] : memref<1x4x128xbf16, #tpu.memory_space<vmem>>, vector<1x4x128xbf16>
    %1 = vector.shape_cast %0 : vector<1x4x128xbf16> to vector<4x128xbf16>
    %c0_2 = arith.constant 0 : index
    %c0_3 = arith.constant 0 : index
    %c0_4 = arith.constant 0 : index
    %2 = vector.load %arg3[%c0_2, %c0_3, %c0_4] : memref<1x4x128xbf16, #tpu.memory_space<vmem>>, vector<1x4x128xbf16>
    %3 = vector.shape_cast %2 : vector<1x4x128xbf16> to vector<4x128xbf16>
    %4 = vector.extract_strided_slice %3 {offsets = [0, 0], sizes = [4, 8], strides = [1, 1]} : vector<4x128xbf16> to vector<4x8xbf16>
    %5 = tpu.concatenate %1, %4 in 1 : vector<4x128xbf16>, vector<4x8xbf16> -> vector<4x136xbf16>
    %6 = vector.extract_strided_slice %5 {offsets = [0, 4], sizes = [4, 128], strides = [1, 1]} : vector<4x136xbf16> to vector<4x128xbf16>
    %7 = arith.extf %6 : vector<4x128xbf16> to vector<4x128xf32>
    %cst = arith.constant 0.000000e+00 : bf16
    %8 = vector.broadcast %cst : bf16 to vector<4x136xbf16>
    %9 = arith.cmpf oge, %5, %8 : vector<4x136xbf16>
    %cst_5 = arith.constant 1.000980e-01 : bf16
    %10 = vector.broadcast %cst_5 : bf16 to vector<4x136xbf16>
    %11 = arith.mulf %5, %10 : vector<4x136xbf16>
    %12 = arith.select %9, %5, %11 : vector<4x136xi1>, vector<4x136xbf16>
    %13 = vector.extract_strided_slice %12 {offsets = [0, 0], sizes = [4, 130], strides = [1, 1]} : vector<4x136xbf16> to vector<4x130xbf16>
    %14 = vector.extract_strided_slice %12 {offsets = [0, 3], sizes = [4, 130], strides = [1, 1]} : vector<4x136xbf16> to vector<4x130xbf16>
    %15 = vector.extract_strided_slice %12 {offsets = [0, 6], sizes = [4, 130], strides = [1, 1]} : vector<4x136xbf16> to vector<4x130xbf16>
    %16 = tpu.concatenate %13, %14, %15 in 0 : vector<4x130xbf16>, vector<4x130xbf16>, vector<4x130xbf16> -> vector<12x130xbf16>
    %c0_6 = arith.constant 0 : index
    %c0_7 = arith.constant 0 : index
    %17 = vector.load %arg4[%c0_6, %c0_7] : memref<4x12xbf16, #tpu.memory_space<vmem>>, vector<4x12xbf16>
    %cst_8 = arith.constant dense<0.000000e+00> : vector<4x130xf32>
    %18 = tpu.matmul %17, %16, %cst_8 {dimension_numbers = #tpu.dot_dimension_numbers<[1], [0], [0], [1], [0, 0, 1, 1], [], []>} : vector<4x12xbf16>, vector<12x130xbf16>, vector<4x130xf32> -> vector<4x130xf32>
    %c0_9 = arith.constant 0 : index
    %c0_10 = arith.constant 0 : index
    %19 = vector.load %arg5[%c0_9, %c0_10] : memref<4x1xf32, #tpu.memory_space<vmem>>, vector<4x1xf32>
    %20 = vector.broadcast %19 : vector<4x1xf32> to vector<4x130xf32>
    %21 = arith.addf %18, %20 : vector<4x130xf32>
    %c128_i32 = arith.constant 128 : i32
    %22 = arith.muli %arg1, %c128_i32 : i32
    %c1_i32 = arith.constant 1 : i32
    %23 = arith.subi %22, %c1_i32 : i32
    %24 = tpu.iota {dimensions = array<i32: 1>} : vector<1x130xi32>
    %25 = vector.broadcast %23 : i32 to vector<1x130xi32>
    %26 = arith.addi %25, %24 : vector<1x130xi32>
    %c0_i32 = arith.constant 0 : i32
    %27 = vector.broadcast %c0_i32 : i32 to vector<1x130xi32>
    %28 = arith.cmpi sge, %26, %27 : vector<1x130xi32>
    %c128_i32_11 = arith.constant 128 : i32
    %29 = vector.broadcast %c128_i32_11 : i32 to vector<1x130xi32>
    %30 = arith.cmpi slt, %26, %29 : vector<1x130xi32>
    %31 = arith.andi %28, %30 : vector<1x130xi1>
    %cst_12 = arith.constant 0.000000e+00 : f32
    %32 = vector.shape_cast %31 : vector<1x130xi1> to vector<1x130xi1>
    %33 = vector.broadcast %32 : vector<1x130xi1> to vector<4x130xi1>
    %34 = vector.broadcast %cst_12 : f32 to vector<4x130xf32>
    %35 = arith.select %33, %21, %34 : vector<4x130xi1>, vector<4x130xf32>
    %cst_13 = arith.constant 0.000000e+00 : f32
    %36 = vector.broadcast %cst_13 : f32 to vector<4x130xf32>
    %37 = arith.cmpf oge, %35, %36 : vector<4x130xf32>
    %cst_14 = arith.constant 1.000000e-01 : f32
    %38 = vector.broadcast %cst_14 : f32 to vector<4x130xf32>
    %39 = arith.mulf %35, %38 : vector<4x130xf32>
    %40 = arith.select %37, %35, %39 : vector<4x130xi1>, vector<4x130xf32>
    %41 = vector.extract_strided_slice %40 {offsets = [0, 0], sizes = [4, 128], strides = [1, 1]} : vector<4x130xf32> to vector<4x128xf32>
    %42 = vector.extract_strided_slice %40 {offsets = [0, 1], sizes = [4, 128], strides = [1, 1]} : vector<4x130xf32> to vector<4x128xf32>
    %43 = vector.extract_strided_slice %40 {offsets = [0, 2], sizes = [4, 128], strides = [1, 1]} : vector<4x130xf32> to vector<4x128xf32>
    %44 = tpu.concatenate %41, %42, %43 in 0 : vector<4x128xf32>, vector<4x128xf32>, vector<4x128xf32> -> vector<12x128xf32>
    %c0_15 = arith.constant 0 : index
    %c0_16 = arith.constant 0 : index
    %45 = vector.load %arg6[%c0_15, %c0_16] : memref<4x12xbf16, #tpu.memory_space<vmem>>, vector<4x12xbf16>
    %46 = arith.truncf %44 : vector<12x128xf32> to vector<12x128xbf16>
    %cst_17 = arith.constant dense<0.000000e+00> : vector<4x128xf32>
    %47 = tpu.matmul %45, %46, %cst_17 {dimension_numbers = #tpu.dot_dimension_numbers<[1], [0], [0], [1], [0, 0, 1, 1], [], []>} : vector<4x12xbf16>, vector<12x128xbf16>, vector<4x128xf32> -> vector<4x128xf32>
    %c0_18 = arith.constant 0 : index
    %c0_19 = arith.constant 0 : index
    %48 = vector.load %arg7[%c0_18, %c0_19] : memref<4x1xf32, #tpu.memory_space<vmem>>, vector<4x1xf32>
    %49 = vector.broadcast %48 : vector<4x1xf32> to vector<4x128xf32>
    %50 = arith.addf %47, %49 : vector<4x128xf32>
    %51 = arith.addf %50, %7 : vector<4x128xf32>
    %52 = vector.shape_cast %51 : vector<4x128xf32> to vector<1x4x128xf32>
    %53 = arith.truncf %52 : vector<1x4x128xf32> to vector<1x4x128xbf16>
    %c0_20 = arith.constant 0 : index
    %c0_21 = arith.constant 0 : index
    %c0_22 = arith.constant 0 : index
    %54 = vector.load %arg8[%c0_20, %c0_21, %c0_22] : memref<1x4x128xbf16, #tpu.memory_space<vmem>>, vector<1x4x128xbf16>
    tpu.vector_store %arg8[%c0_20, %c0_21, %c0_22], %53 {strides = array<i32>} : memref<1x4x128xbf16, #tpu.memory_space<vmem>>, vector<1x4x128xbf16>,
    return
  }
  func.func @transform_0(%arg0: i32, %arg1: i32) -> (i32, i32, i32) {
    %c0_i32 = arith.constant 0 : i32
    %c0_i32_0 = arith.constant 0 : i32
    return %arg0, %c0_i32, %arg1 : i32, i32, i32
  }
  func.func @transform_1(%arg0: i32, %arg1: i32) -> (i32, i32, i32) {
    %c1_i32 = arith.constant 1 : i32
    %0 = arith.addi %arg1, %c1_i32 : i32
    %c1_i32_0 = arith.constant 1 : i32
    %1 = arith.muli %0, %c1_i32_0 : i32
    %c0_i32 = arith.constant 0 : i32
    %c0_i32_1 = arith.constant 0 : i32
    return %arg0, %c0_i32, %1 : i32, i32, i32
  }
  func.func @transform_2(%arg0: i32, %arg1: i32) -> (i32, i32) {
    %c0_i32 = arith.constant 0 : i32
    %c0_i32_0 = arith.constant 0 : i32
    %c0_i32_1 = arith.constant 0 : i32
    return %c0_i32, %c0_i32_0 : i32, i32
  }
  func.func @transform_3(%arg0: i32, %arg1: i32) -> (i32, i32) {
    %c0_i32 = arith.constant 0 : i32
    %c0_i32_0 = arith.constant 0 : i32
    %c0_i32_1 = arith.constant 0 : i32
    return %c0_i32, %c0_i32_0 : i32, i32
  }
  func.func @transform_4(%arg0: i32, %arg1: i32) -> (i32, i32) {
    %c0_i32 = arith.constant 0 : i32
    %c0_i32_0 = arith.constant 0 : i32
    %c0_i32_1 = arith.constant 0 : i32
    return %c0_i32, %c0_i32_0 : i32, i32
  }
  func.func @transform_5(%arg0: i32, %arg1: i32) -> (i32, i32) {
    %c0_i32 = arith.constant 0 : i32
    %c0_i32_0 = arith.constant 0 : i32
    %c0_i32_1 = arith.constant 0 : i32
    return %c0_i32, %c0_i32_0 : i32, i32
  }
  func.func @transform_6(%arg0: i32, %arg1: i32) -> (i32, i32, i32) {
    %c0_i32 = arith.constant 0 : i32
    %c0_i32_0 = arith.constant 0 : i32
    return %arg0, %c0_i32, %arg1 : i32, i32, i32
  }
}

module attributes {stable_mosaic.version = 11 : i64} {
  func.func @kernel(%arg0: i32, %arg1: i32, %arg2: memref<1x4x128xbf16, #tpu.memory_space<vmem>>, %arg3: memref<1x4x128xbf16, #tpu.memory_space<vmem>>, %arg4: memref<4x12xbf16, #tpu.memory_space<vmem>>, %arg5: memref<4x1xf32, #tpu.memory_space<vmem>>, %arg6: memref<4x12xbf16, #tpu.memory_space<vmem>>, %arg7: memref<4x1xf32, #tpu.memory_space<vmem>>, %arg8: memref<1x4x128xbf16, #tpu.memory_space<vmem>>) attributes {dimension_semantics = [#tpu.dimension_semantics<parallel>, #tpu.dimension_semantics<parallel>], iteration_bounds = array<i64: 2, 1>, scalar_prefetch = 0 : i64, scratch_operands = 0 : i64, tpu.core_type = #tpu.core_type<tc>, window_params = [{transform_indices = @transform_0, window_bounds = array<i64: 1, 4, 128>}, {transform_indices = @transform_1, window_bounds = array<i64: 1, 4, 128>}, {pipeline_mode = #tpu.pipeline_mode<synchronous>, transform_indices = @transform_2, window_bounds = array<i64: 4, 12>}, {pipeline_mode = #tpu.pipeline_mode<synchronous>, transform_indices = @transform_3, window_bounds = array<i64: 4, 1>}, {pipeline_mode = #tpu.pipeline_mode<synchronous>, transform_indices = @transform_4, window_bounds = array<i64: 4, 12>}, {pipeline_mode = #tpu.pipeline_mode<synchronous>, transform_indices = @transform_5, window_bounds = array<i64: 4, 1>}, {transform_indices = @transform_6, window_bounds = array<i64: 1, 4, 128>}]} {
    %c0 = arith.constant 0 : index
    %c0_0 = arith.constant 0 : index
    %c0_1 = arith.constant 0 : index
    %0 = vector.load %arg2[%c0, %c0_0, %c0_1] : memref<1x4x128xbf16, #tpu.memory_space<vmem>>, vector<1x4x128xbf16>
    %1 = vector.shape_cast %0 : vector<1x4x128xbf16> to vector<4x128xbf16>
    %c0_2 = arith.constant 0 : index
    %c0_3 = arith.constant 0 : index
    %c0_4 = arith.constant 0 : index
    %2 = vector.load %arg3[%c0_2, %c0_3, %c0_4] : memref<1x4x128xbf16, #tpu.memory_space<vmem>>, vector<1x4x128xbf16>
    %3 = vector.shape_cast %2 : vector<1x4x128xbf16> to vector<4x128xbf16>
    %4 = vector.extract_strided_slice %3 {offsets = [0, 0], sizes = [4, 4], strides = [1, 1]} : vector<4x128xbf16> to vector<4x4xbf16>
    %5 = tpu.concatenate %1, %4 in 1 : vector<4x128xbf16>, vector<4x4xbf16> -> vector<4x132xbf16>
    %6 = vector.extract_strided_slice %5 {offsets = [0, 2], sizes = [4, 128], strides = [1, 1]} : vector<4x132xbf16> to vector<4x128xbf16>
    %7 = arith.extf %6 : vector<4x128xbf16> to vector<4x128xf32>
    %cst = arith.constant 0.000000e+00 : bf16
    %8 = vector.broadcast %cst : bf16 to vector<4x132xbf16>
    %9 = arith.cmpf oge, %5, %8 : vector<4x132xbf16>
    %cst_5 = arith.constant 1.000980e-01 : bf16
    %10 = vector.broadcast %cst_5 : bf16 to vector<4x132xbf16>
    %11 = arith.mulf %5, %10 : vector<4x132xbf16>
    %12 = arith.select %9, %5, %11 : vector<4x132xi1>, vector<4x132xbf16>
    %13 = vector.extract_strided_slice %12 {offsets = [0, 0], sizes = [4, 130], strides = [1, 1]} : vector<4x132xbf16> to vector<4x130xbf16>
    %14 = vector.extract_strided_slice %12 {offsets = [0, 1], sizes = [4, 130], strides = [1, 1]} : vector<4x132xbf16> to vector<4x130xbf16>
    %15 = vector.extract_strided_slice %12 {offsets = [0, 2], sizes = [4, 130], strides = [1, 1]} : vector<4x132xbf16> to vector<4x130xbf16>
    %16 = tpu.concatenate %13, %14, %15 in 0 : vector<4x130xbf16>, vector<4x130xbf16>, vector<4x130xbf16> -> vector<12x130xbf16>
    %c0_6 = arith.constant 0 : index
    %c0_7 = arith.constant 0 : index
    %17 = vector.load %arg4[%c0_6, %c0_7] : memref<4x12xbf16, #tpu.memory_space<vmem>>, vector<4x12xbf16>
    %cst_8 = arith.constant dense<0.000000e+00> : vector<4x130xf32>
    %18 = tpu.matmul %17, %16, %cst_8 {dimension_numbers = #tpu.dot_dimension_numbers<[1], [0], [0], [1], [0, 0, 1, 1], [], []>} : vector<4x12xbf16>, vector<12x130xbf16>, vector<4x130xf32> -> vector<4x130xf32>
    %c0_9 = arith.constant 0 : index
    %c0_10 = arith.constant 0 : index
    %19 = vector.load %arg5[%c0_9, %c0_10] : memref<4x1xf32, #tpu.memory_space<vmem>>, vector<4x1xf32>
    %20 = vector.broadcast %19 : vector<4x1xf32> to vector<4x130xf32>
    %21 = arith.addf %18, %20 : vector<4x130xf32>
    %c128_i32 = arith.constant 128 : i32
    %22 = arith.muli %arg1, %c128_i32 : i32
    %c1_i32 = arith.constant 1 : i32
    %23 = arith.subi %22, %c1_i32 : i32
    %24 = tpu.iota {dimensions = array<i32: 1>} : vector<1x130xi32>
    %25 = vector.broadcast %23 : i32 to vector<1x130xi32>
    %26 = arith.addi %25, %24 : vector<1x130xi32>
    %c0_i32 = arith.constant 0 : i32
    %27 = vector.broadcast %c0_i32 : i32 to vector<1x130xi32>
    %28 = arith.cmpi sge, %26, %27 : vector<1x130xi32>
    %c128_i32_11 = arith.constant 128 : i32
    %29 = vector.broadcast %c128_i32_11 : i32 to vector<1x130xi32>
    %30 = arith.cmpi slt, %26, %29 : vector<1x130xi32>
    %31 = arith.andi %28, %30 : vector<1x130xi1>
    %cst_12 = arith.constant 0.000000e+00 : f32
    %32 = vector.shape_cast %31 : vector<1x130xi1> to vector<1x130xi1>
    %33 = vector.broadcast %32 : vector<1x130xi1> to vector<4x130xi1>
    %34 = vector.broadcast %cst_12 : f32 to vector<4x130xf32>
    %35 = arith.select %33, %21, %34 : vector<4x130xi1>, vector<4x130xf32>
    %cst_13 = arith.constant 0.000000e+00 : f32
    %36 = vector.broadcast %cst_13 : f32 to vector<4x130xf32>
    %37 = arith.cmpf oge, %35, %36 : vector<4x130xf32>
    %cst_14 = arith.constant 1.000000e-01 : f32
    %38 = vector.broadcast %cst_14 : f32 to vector<4x130xf32>
    %39 = arith.mulf %35, %38 : vector<4x130xf32>
    %40 = arith.select %37, %35, %39 : vector<4x130xi1>, vector<4x130xf32>
    %41 = vector.extract_strided_slice %40 {offsets = [0, 0], sizes = [4, 128], strides = [1, 1]} : vector<4x130xf32> to vector<4x128xf32>
    %42 = vector.extract_strided_slice %40 {offsets = [0, 1], sizes = [4, 128], strides = [1, 1]} : vector<4x130xf32> to vector<4x128xf32>
    %43 = vector.extract_strided_slice %40 {offsets = [0, 2], sizes = [4, 128], strides = [1, 1]} : vector<4x130xf32> to vector<4x128xf32>
    %44 = tpu.concatenate %41, %42, %43 in 0 : vector<4x128xf32>, vector<4x128xf32>, vector<4x128xf32> -> vector<12x128xf32>
    %c0_15 = arith.constant 0 : index
    %c0_16 = arith.constant 0 : index
    %45 = vector.load %arg6[%c0_15, %c0_16] : memref<4x12xbf16, #tpu.memory_space<vmem>>, vector<4x12xbf16>
    %46 = arith.truncf %44 : vector<12x128xf32> to vector<12x128xbf16>
    %cst_17 = arith.constant dense<0.000000e+00> : vector<4x128xf32>
    %47 = tpu.matmul %45, %46, %cst_17 {dimension_numbers = #tpu.dot_dimension_numbers<[1], [0], [0], [1], [0, 0, 1, 1], [], []>} : vector<4x12xbf16>, vector<12x128xbf16>, vector<4x128xf32> -> vector<4x128xf32>
    %c0_18 = arith.constant 0 : index
    %c0_19 = arith.constant 0 : index
    %48 = vector.load %arg7[%c0_18, %c0_19] : memref<4x1xf32, #tpu.memory_space<vmem>>, vector<4x1xf32>
    %49 = vector.broadcast %48 : vector<4x1xf32> to vector<4x128xf32>
    %50 = arith.addf %47, %49 : vector<4x128xf32>
    %51 = arith.addf %50, %7 : vector<4x128xf32>
    %52 = vector.shape_cast %51 : vector<4x128xf32> to vector<1x4x128xf32>
    %53 = arith.truncf %52 : vector<1x4x128xf32> to vector<1x4x128xbf16>
    %c0_20 = arith.constant 0 : index
    %c0_21 = arith.constant 0 : index
    %c0_22 = arith.constant 0 : index
    %54 = vector.load %arg8[%c0_20, %c0_21, %c0_22] : memref<1x4x128xbf16, #tpu.memory_space<vmem>>, vector<1x4x128xbf16>
    tpu.vector_store %arg8[%c0_20, %c0_21, %c0_22], %53 {strides = array<i32>} : memref<1x4x128xbf16, #tpu.memory_space<vmem>>, vector<1x4x128xbf16>,
    return
  }
  func.func @transform_0(%arg0: i32, %arg1: i32) -> (i32, i32, i32) {
    %c0_i32 = arith.constant 0 : i32
    %c0_i32_0 = arith.constant 0 : i32
    return %arg0, %c0_i32, %arg1 : i32, i32, i32
  }
  func.func @transform_1(%arg0: i32, %arg1: i32) -> (i32, i32, i32) {
    %c1_i32 = arith.constant 1 : i32
    %0 = arith.addi %arg1, %c1_i32 : i32
    %c1_i32_0 = arith.constant 1 : i32
    %1 = arith.muli %0, %c1_i32_0 : i32
    %c0_i32 = arith.constant 0 : i32
    %c0_i32_1 = arith.constant 0 : i32
    return %arg0, %c0_i32, %1 : i32, i32, i32
  }
  func.func @transform_2(%arg0: i32, %arg1: i32) -> (i32, i32) {
    %c0_i32 = arith.constant 0 : i32
    %c0_i32_0 = arith.constant 0 : i32
    %c0_i32_1 = arith.constant 0 : i32
    return %c0_i32, %c0_i32_0 : i32, i32
  }
  func.func @transform_3(%arg0: i32, %arg1: i32) -> (i32, i32) {
    %c0_i32 = arith.constant 0 : i32
    %c0_i32_0 = arith.constant 0 : i32
    %c0_i32_1 = arith.constant 0 : i32
    return %c0_i32, %c0_i32_0 : i32, i32
  }
  func.func @transform_4(%arg0: i32, %arg1: i32) -> (i32, i32) {
    %c0_i32 = arith.constant 0 : i32
    %c0_i32_0 = arith.constant 0 : i32
    %c0_i32_1 = arith.constant 0 : i32
    return %c0_i32, %c0_i32_0 : i32, i32
  }
  func.func @transform_5(%arg0: i32, %arg1: i32) -> (i32, i32) {
    %c0_i32 = arith.constant 0 : i32
    %c0_i32_0 = arith.constant 0 : i32
    %c0_i32_1 = arith.constant 0 : i32
    return %c0_i32, %c0_i32_0 : i32, i32
  }
  func.func @transform_6(%arg0: i32, %arg1: i32) -> (i32, i32, i32) {
    %c0_i32 = arith.constant 0 : i32
    %c0_i32_0 = arith.constant 0 : i32
    return %arg0, %c0_i32, %arg1 : i32, i32, i32
  }
}

module attributes {stable_mosaic.version = 11 : i64} {
  func.func @kernel(%arg0: i32, %arg1: i32, %arg2: memref<1x4x128xbf16, #tpu.memory_space<vmem>>, %arg3: memref<1x4x128xbf16, #tpu.memory_space<vmem>>, %arg4: memref<1x4x128xbf16, #tpu.memory_space<vmem>>, %arg5: memref<4x20xbf16, #tpu.memory_space<vmem>>, %arg6: memref<4x1xf32, #tpu.memory_space<vmem>>, %arg7: memref<4x20xbf16, #tpu.memory_space<vmem>>, %arg8: memref<4x1xf32, #tpu.memory_space<vmem>>, %arg9: memref<1x4x128xbf16, #tpu.memory_space<vmem>>) attributes {dimension_semantics = [#tpu.dimension_semantics<parallel>, #tpu.dimension_semantics<parallel>], iteration_bounds = array<i64: 2, 1>, scalar_prefetch = 0 : i64, scratch_operands = 0 : i64, tpu.core_type = #tpu.core_type<tc>, window_params = [{transform_indices = @transform_0, window_bounds = array<i64: 1, 4, 128>}, {transform_indices = @transform_1, window_bounds = array<i64: 1, 4, 128>}, {transform_indices = @transform_2, window_bounds = array<i64: 1, 4, 128>}, {pipeline_mode = #tpu.pipeline_mode<synchronous>, transform_indices = @transform_3, window_bounds = array<i64: 4, 20>}, {pipeline_mode = #tpu.pipeline_mode<synchronous>, transform_indices = @transform_4, window_bounds = array<i64: 4, 1>}, {pipeline_mode = #tpu.pipeline_mode<synchronous>, transform_indices = @transform_5, window_bounds = array<i64: 4, 20>}, {pipeline_mode = #tpu.pipeline_mode<synchronous>, transform_indices = @transform_6, window_bounds = array<i64: 4, 1>}, {transform_indices = @transform_7, window_bounds = array<i64: 1, 4, 128>}]} {
    %c0 = arith.constant 0 : index
    %c0_0 = arith.constant 0 : index
    %c0_1 = arith.constant 0 : index
    %0 = vector.load %arg2[%c0, %c0_0, %c0_1] : memref<1x4x128xbf16, #tpu.memory_space<vmem>>, vector<1x4x128xbf16>
    %1 = vector.shape_cast %0 : vector<1x4x128xbf16> to vector<4x128xbf16>
    %c0_2 = arith.constant 0 : index
    %c0_3 = arith.constant 0 : index
    %c0_4 = arith.constant 0 : index
    %2 = vector.load %arg3[%c0_2, %c0_3, %c0_4] : memref<1x4x128xbf16, #tpu.memory_space<vmem>>, vector<1x4x128xbf16>
    %3 = vector.shape_cast %2 : vector<1x4x128xbf16> to vector<4x128xbf16>
    %4 = vector.extract_strided_slice %3 {offsets = [0, 0], sizes = [4, 16], strides = [1, 1]} : vector<4x128xbf16> to vector<4x16xbf16>
    %5 = tpu.concatenate %1, %4 in 1 : vector<4x128xbf16>, vector<4x16xbf16> -> vector<4x144xbf16>
    %6 = vector.extract_strided_slice %5 {offsets = [0, 8], sizes = [4, 128], strides = [1, 1]} : vector<4x144xbf16> to vector<4x128xbf16>
    %7 = arith.extf %6 : vector<4x128xbf16> to vector<4x128xf32>
    %cst = arith.constant 0.000000e+00 : bf16
    %8 = vector.broadcast %cst : bf16 to vector<4x144xbf16>
    %9 = arith.cmpf oge, %5, %8 : vector<4x144xbf16>
    %cst_5 = arith.constant 1.000980e-01 : bf16
    %10 = vector.broadcast %cst_5 : bf16 to vector<4x144xbf16>
    %11 = arith.mulf %5, %10 : vector<4x144xbf16>
    %12 = arith.select %9, %5, %11 : vector<4x144xi1>, vector<4x144xbf16>
    %13 = vector.extract_strided_slice %12 {offsets = [0, 0], sizes = [4, 132], strides = [1, 1]} : vector<4x144xbf16> to vector<4x132xbf16>
    %14 = vector.extract_strided_slice %12 {offsets = [0, 3], sizes = [4, 132], strides = [1, 1]} : vector<4x144xbf16> to vector<4x132xbf16>
    %15 = vector.extract_strided_slice %12 {offsets = [0, 6], sizes = [4, 132], strides = [1, 1]} : vector<4x144xbf16> to vector<4x132xbf16>
    %16 = vector.extract_strided_slice %12 {offsets = [0, 9], sizes = [4, 132], strides = [1, 1]} : vector<4x144xbf16> to vector<4x132xbf16>
    %17 = vector.extract_strided_slice %12 {offsets = [0, 12], sizes = [4, 132], strides = [1, 1]} : vector<4x144xbf16> to vector<4x132xbf16>
    %18 = tpu.concatenate %13, %14, %15, %16, %17 in 0 : vector<4x132xbf16>, vector<4x132xbf16>, vector<4x132xbf16>, vector<4x132xbf16>, vector<4x132xbf16> -> vector<20x132xbf16>
    %c0_6 = arith.constant 0 : index
    %c0_7 = arith.constant 0 : index
    %19 = vector.load %arg5[%c0_6, %c0_7] : memref<4x20xbf16, #tpu.memory_space<vmem>>, vector<4x20xbf16>
    %cst_8 = arith.constant dense<0.000000e+00> : vector<4x132xf32>
    %20 = tpu.matmul %19, %18, %cst_8 {dimension_numbers = #tpu.dot_dimension_numbers<[1], [0], [0], [1], [0, 0, 1, 1], [], []>} : vector<4x20xbf16>, vector<20x132xbf16>, vector<4x132xf32> -> vector<4x132xf32>
    %c0_9 = arith.constant 0 : index
    %c0_10 = arith.constant 0 : index
    %21 = vector.load %arg6[%c0_9, %c0_10] : memref<4x1xf32, #tpu.memory_space<vmem>>, vector<4x1xf32>
    %22 = vector.broadcast %21 : vector<4x1xf32> to vector<4x132xf32>
    %23 = arith.addf %20, %22 : vector<4x132xf32>
    %c128_i32 = arith.constant 128 : i32
    %24 = arith.muli %arg1, %c128_i32 : i32
    %c2_i32 = arith.constant 2 : i32
    %25 = arith.subi %24, %c2_i32 : i32
    %26 = tpu.iota {dimensions = array<i32: 1>} : vector<1x132xi32>
    %27 = vector.broadcast %25 : i32 to vector<1x132xi32>
    %28 = arith.addi %27, %26 : vector<1x132xi32>
    %c0_i32 = arith.constant 0 : i32
    %29 = vector.broadcast %c0_i32 : i32 to vector<1x132xi32>
    %30 = arith.cmpi sge, %28, %29 : vector<1x132xi32>
    %c128_i32_11 = arith.constant 128 : i32
    %31 = vector.broadcast %c128_i32_11 : i32 to vector<1x132xi32>
    %32 = arith.cmpi slt, %28, %31 : vector<1x132xi32>
    %33 = arith.andi %30, %32 : vector<1x132xi1>
    %cst_12 = arith.constant 0.000000e+00 : f32
    %34 = vector.shape_cast %33 : vector<1x132xi1> to vector<1x132xi1>
    %35 = vector.broadcast %34 : vector<1x132xi1> to vector<4x132xi1>
    %36 = vector.broadcast %cst_12 : f32 to vector<4x132xf32>
    %37 = arith.select %35, %23, %36 : vector<4x132xi1>, vector<4x132xf32>
    %cst_13 = arith.constant 0.000000e+00 : f32
    %38 = vector.broadcast %cst_13 : f32 to vector<4x132xf32>
    %39 = arith.cmpf oge, %37, %38 : vector<4x132xf32>
    %cst_14 = arith.constant 1.000000e-01 : f32
    %40 = vector.broadcast %cst_14 : f32 to vector<4x132xf32>
    %41 = arith.mulf %37, %40 : vector<4x132xf32>
    %42 = arith.select %39, %37, %41 : vector<4x132xi1>, vector<4x132xf32>
    %43 = vector.extract_strided_slice %42 {offsets = [0, 0], sizes = [4, 128], strides = [1, 1]} : vector<4x132xf32> to vector<4x128xf32>
    %44 = vector.extract_strided_slice %42 {offsets = [0, 1], sizes = [4, 128], strides = [1, 1]} : vector<4x132xf32> to vector<4x128xf32>
    %45 = vector.extract_strided_slice %42 {offsets = [0, 2], sizes = [4, 128], strides = [1, 1]} : vector<4x132xf32> to vector<4x128xf32>
    %46 = vector.extract_strided_slice %42 {offsets = [0, 3], sizes = [4, 128], strides = [1, 1]} : vector<4x132xf32> to vector<4x128xf32>
    %47 = vector.extract_strided_slice %42 {offsets = [0, 4], sizes = [4, 128], strides = [1, 1]} : vector<4x132xf32> to vector<4x128xf32>
    %48 = tpu.concatenate %43, %44, %45, %46, %47 in 0 : vector<4x128xf32>, vector<4x128xf32>, vector<4x128xf32>, vector<4x128xf32>, vector<4x128xf32> -> vector<20x128xf32>
    %c0_15 = arith.constant 0 : index
    %c0_16 = arith.constant 0 : index
    %49 = vector.load %arg7[%c0_15, %c0_16] : memref<4x20xbf16, #tpu.memory_space<vmem>>, vector<4x20xbf16>
    %50 = arith.truncf %48 : vector<20x128xf32> to vector<20x128xbf16>
    %cst_17 = arith.constant dense<0.000000e+00> : vector<4x128xf32>
    %51 = tpu.matmul %49, %50, %cst_17 {dimension_numbers = #tpu.dot_dimension_numbers<[1], [0], [0], [1], [0, 0, 1, 1], [], []>} : vector<4x20xbf16>, vector<20x128xbf16>, vector<4x128xf32> -> vector<4x128xf32>
    %c0_18 = arith.constant 0 : index
    %c0_19 = arith.constant 0 : index
    %52 = vector.load %arg8[%c0_18, %c0_19] : memref<4x1xf32, #tpu.memory_space<vmem>>, vector<4x1xf32>
    %53 = vector.broadcast %52 : vector<4x1xf32> to vector<4x128xf32>
    %54 = arith.addf %51, %53 : vector<4x128xf32>
    %55 = arith.addf %54, %7 : vector<4x128xf32>
    %c0_20 = arith.constant 0 : index
    %c0_21 = arith.constant 0 : index
    %c0_22 = arith.constant 0 : index
    %56 = vector.load %arg4[%c0_20, %c0_21, %c0_22] : memref<1x4x128xbf16, #tpu.memory_space<vmem>>, vector<1x4x128xbf16>
    %57 = vector.shape_cast %56 : vector<1x4x128xbf16> to vector<4x128xbf16>
    %58 = arith.extf %57 : vector<4x128xbf16> to vector<4x128xf32>
    %59 = arith.addf %55, %58 : vector<4x128xf32>
    %cst_23 = arith.constant 5.000000e-01 : f32
    %60 = vector.broadcast %cst_23 : f32 to vector<4x128xf32>
    %61 = arith.mulf %59, %60 : vector<4x128xf32>
    %62 = vector.shape_cast %61 : vector<4x128xf32> to vector<1x4x128xf32>
    %63 = arith.truncf %62 : vector<1x4x128xf32> to vector<1x4x128xbf16>
    %c0_24 = arith.constant 0 : index
    %c0_25 = arith.constant 0 : index
    %c0_26 = arith.constant 0 : index
    %64 = vector.load %arg9[%c0_24, %c0_25, %c0_26] : memref<1x4x128xbf16, #tpu.memory_space<vmem>>, vector<1x4x128xbf16>
    tpu.vector_store %arg9[%c0_24, %c0_25, %c0_26], %63 {strides = array<i32>} : memref<1x4x128xbf16, #tpu.memory_space<vmem>>, vector<1x4x128xbf16>,
    return
  }
  func.func @transform_0(%arg0: i32, %arg1: i32) -> (i32, i32, i32) {
    %c0_i32 = arith.constant 0 : i32
    %c0_i32_0 = arith.constant 0 : i32
    return %arg0, %c0_i32, %arg1 : i32, i32, i32
  }
  func.func @transform_1(%arg0: i32, %arg1: i32) -> (i32, i32, i32) {
    %c1_i32 = arith.constant 1 : i32
    %0 = arith.addi %arg1, %c1_i32 : i32
    %c1_i32_0 = arith.constant 1 : i32
    %1 = arith.muli %0, %c1_i32_0 : i32
    %c0_i32 = arith.constant 0 : i32
    %c0_i32_1 = arith.constant 0 : i32
    return %arg0, %c0_i32, %1 : i32, i32, i32
  }
  func.func @transform_2(%arg0: i32, %arg1: i32) -> (i32, i32, i32) {
    %c0_i32 = arith.constant 0 : i32
    %c0_i32_0 = arith.constant 0 : i32
    return %arg0, %c0_i32, %arg1 : i32, i32, i32
  }
  func.func @transform_3(%arg0: i32, %arg1: i32) -> (i32, i32) {
    %c0_i32 = arith.constant 0 : i32
    %c0_i32_0 = arith.constant 0 : i32
    %c0_i32_1 = arith.constant 0 : i32
    return %c0_i32, %c0_i32_0 : i32, i32
  }
  func.func @transform_4(%arg0: i32, %arg1: i32) -> (i32, i32) {
    %c0_i32 = arith.constant 0 : i32
    %c0_i32_0 = arith.constant 0 : i32
    %c0_i32_1 = arith.constant 0 : i32
    return %c0_i32, %c0_i32_0 : i32, i32
  }
  func.func @transform_5(%arg0: i32, %arg1: i32) -> (i32, i32) {
    %c0_i32 = arith.constant 0 : i32
    %c0_i32_0 = arith.constant 0 : i32
    %c0_i32_1 = arith.constant 0 : i32
    return %c0_i32, %c0_i32_0 : i32, i32
  }
  func.func @transform_6(%arg0: i32, %arg1: i32) -> (i32, i32) {
    %c0_i32 = arith.constant 0 : i32
    %c0_i32_0 = arith.constant 0 : i32
    %c0_i32_1 = arith.constant 0 : i32
    return %c0_i32, %c0_i32_0 : i32, i32
  }
  func.func @transform_7(%arg0: i32, %arg1: i32) -> (i32, i32, i32) {
    %c0_i32 = arith.constant 0 : i32
    %c0_i32_0 = arith.constant 0 : i32
    return %arg0, %c0_i32, %arg1 : i32, i32, i32
  }
}

module attributes {stable_mosaic.version = 11 : i64} {
  func.func @kernel(%arg0: i32, %arg1: i32, %arg2: memref<1x4x128xbf16, #tpu.memory_space<vmem>>, %arg3: memref<1x4x128xbf16, #tpu.memory_space<vmem>>, %arg4: memref<4x20xbf16, #tpu.memory_space<vmem>>, %arg5: memref<4x1xf32, #tpu.memory_space<vmem>>, %arg6: memref<4x20xbf16, #tpu.memory_space<vmem>>, %arg7: memref<4x1xf32, #tpu.memory_space<vmem>>, %arg8: memref<1x4x128xbf16, #tpu.memory_space<vmem>>) attributes {dimension_semantics = [#tpu.dimension_semantics<parallel>, #tpu.dimension_semantics<parallel>], iteration_bounds = array<i64: 2, 1>, scalar_prefetch = 0 : i64, scratch_operands = 0 : i64, tpu.core_type = #tpu.core_type<tc>, window_params = [{transform_indices = @transform_0, window_bounds = array<i64: 1, 4, 128>}, {transform_indices = @transform_1, window_bounds = array<i64: 1, 4, 128>}, {pipeline_mode = #tpu.pipeline_mode<synchronous>, transform_indices = @transform_2, window_bounds = array<i64: 4, 20>}, {pipeline_mode = #tpu.pipeline_mode<synchronous>, transform_indices = @transform_3, window_bounds = array<i64: 4, 1>}, {pipeline_mode = #tpu.pipeline_mode<synchronous>, transform_indices = @transform_4, window_bounds = array<i64: 4, 20>}, {pipeline_mode = #tpu.pipeline_mode<synchronous>, transform_indices = @transform_5, window_bounds = array<i64: 4, 1>}, {transform_indices = @transform_6, window_bounds = array<i64: 1, 4, 128>}]} {
    %c0 = arith.constant 0 : index
    %c0_0 = arith.constant 0 : index
    %c0_1 = arith.constant 0 : index
    %0 = vector.load %arg2[%c0, %c0_0, %c0_1] : memref<1x4x128xbf16, #tpu.memory_space<vmem>>, vector<1x4x128xbf16>
    %1 = vector.shape_cast %0 : vector<1x4x128xbf16> to vector<4x128xbf16>
    %c0_2 = arith.constant 0 : index
    %c0_3 = arith.constant 0 : index
    %c0_4 = arith.constant 0 : index
    %2 = vector.load %arg3[%c0_2, %c0_3, %c0_4] : memref<1x4x128xbf16, #tpu.memory_space<vmem>>, vector<1x4x128xbf16>
    %3 = vector.shape_cast %2 : vector<1x4x128xbf16> to vector<4x128xbf16>
    %4 = vector.extract_strided_slice %3 {offsets = [0, 0], sizes = [4, 8], strides = [1, 1]} : vector<4x128xbf16> to vector<4x8xbf16>
    %5 = tpu.concatenate %1, %4 in 1 : vector<4x128xbf16>, vector<4x8xbf16> -> vector<4x136xbf16>
    %6 = vector.extract_strided_slice %5 {offsets = [0, 4], sizes = [4, 128], strides = [1, 1]} : vector<4x136xbf16> to vector<4x128xbf16>
    %7 = arith.extf %6 : vector<4x128xbf16> to vector<4x128xf32>
    %cst = arith.constant 0.000000e+00 : bf16
    %8 = vector.broadcast %cst : bf16 to vector<4x136xbf16>
    %9 = arith.cmpf oge, %5, %8 : vector<4x136xbf16>
    %cst_5 = arith.constant 1.000980e-01 : bf16
    %10 = vector.broadcast %cst_5 : bf16 to vector<4x136xbf16>
    %11 = arith.mulf %5, %10 : vector<4x136xbf16>
    %12 = arith.select %9, %5, %11 : vector<4x136xi1>, vector<4x136xbf16>
    %13 = vector.extract_strided_slice %12 {offsets = [0, 0], sizes = [4, 132], strides = [1, 1]} : vector<4x136xbf16> to vector<4x132xbf16>
    %14 = vector.extract_strided_slice %12 {offsets = [0, 1], sizes = [4, 132], strides = [1, 1]} : vector<4x136xbf16> to vector<4x132xbf16>
    %15 = vector.extract_strided_slice %12 {offsets = [0, 2], sizes = [4, 132], strides = [1, 1]} : vector<4x136xbf16> to vector<4x132xbf16>
    %16 = vector.extract_strided_slice %12 {offsets = [0, 3], sizes = [4, 132], strides = [1, 1]} : vector<4x136xbf16> to vector<4x132xbf16>
    %17 = vector.extract_strided_slice %12 {offsets = [0, 4], sizes = [4, 132], strides = [1, 1]} : vector<4x136xbf16> to vector<4x132xbf16>
    %18 = tpu.concatenate %13, %14, %15, %16, %17 in 0 : vector<4x132xbf16>, vector<4x132xbf16>, vector<4x132xbf16>, vector<4x132xbf16>, vector<4x132xbf16> -> vector<20x132xbf16>
    %c0_6 = arith.constant 0 : index
    %c0_7 = arith.constant 0 : index
    %19 = vector.load %arg4[%c0_6, %c0_7] : memref<4x20xbf16, #tpu.memory_space<vmem>>, vector<4x20xbf16>
    %cst_8 = arith.constant dense<0.000000e+00> : vector<4x132xf32>
    %20 = tpu.matmul %19, %18, %cst_8 {dimension_numbers = #tpu.dot_dimension_numbers<[1], [0], [0], [1], [0, 0, 1, 1], [], []>} : vector<4x20xbf16>, vector<20x132xbf16>, vector<4x132xf32> -> vector<4x132xf32>
    %c0_9 = arith.constant 0 : index
    %c0_10 = arith.constant 0 : index
    %21 = vector.load %arg5[%c0_9, %c0_10] : memref<4x1xf32, #tpu.memory_space<vmem>>, vector<4x1xf32>
    %22 = vector.broadcast %21 : vector<4x1xf32> to vector<4x132xf32>
    %23 = arith.addf %20, %22 : vector<4x132xf32>
    %c128_i32 = arith.constant 128 : i32
    %24 = arith.muli %arg1, %c128_i32 : i32
    %c2_i32 = arith.constant 2 : i32
    %25 = arith.subi %24, %c2_i32 : i32
    %26 = tpu.iota {dimensions = array<i32: 1>} : vector<1x132xi32>
    %27 = vector.broadcast %25 : i32 to vector<1x132xi32>
    %28 = arith.addi %27, %26 : vector<1x132xi32>
    %c0_i32 = arith.constant 0 : i32
    %29 = vector.broadcast %c0_i32 : i32 to vector<1x132xi32>
    %30 = arith.cmpi sge, %28, %29 : vector<1x132xi32>
    %c128_i32_11 = arith.constant 128 : i32
    %31 = vector.broadcast %c128_i32_11 : i32 to vector<1x132xi32>
    %32 = arith.cmpi slt, %28, %31 : vector<1x132xi32>
    %33 = arith.andi %30, %32 : vector<1x132xi1>
    %cst_12 = arith.constant 0.000000e+00 : f32
    %34 = vector.shape_cast %33 : vector<1x132xi1> to vector<1x132xi1>
    %35 = vector.broadcast %34 : vector<1x132xi1> to vector<4x132xi1>
    %36 = vector.broadcast %cst_12 : f32 to vector<4x132xf32>
    %37 = arith.select %35, %23, %36 : vector<4x132xi1>, vector<4x132xf32>
    %cst_13 = arith.constant 0.000000e+00 : f32
    %38 = vector.broadcast %cst_13 : f32 to vector<4x132xf32>
    %39 = arith.cmpf oge, %37, %38 : vector<4x132xf32>
    %cst_14 = arith.constant 1.000000e-01 : f32
    %40 = vector.broadcast %cst_14 : f32 to vector<4x132xf32>
    %41 = arith.mulf %37, %40 : vector<4x132xf32>
    %42 = arith.select %39, %37, %41 : vector<4x132xi1>, vector<4x132xf32>
    %43 = vector.extract_strided_slice %42 {offsets = [0, 0], sizes = [4, 128], strides = [1, 1]} : vector<4x132xf32> to vector<4x128xf32>
    %44 = vector.extract_strided_slice %42 {offsets = [0, 1], sizes = [4, 128], strides = [1, 1]} : vector<4x132xf32> to vector<4x128xf32>
    %45 = vector.extract_strided_slice %42 {offsets = [0, 2], sizes = [4, 128], strides = [1, 1]} : vector<4x132xf32> to vector<4x128xf32>
    %46 = vector.extract_strided_slice %42 {offsets = [0, 3], sizes = [4, 128], strides = [1, 1]} : vector<4x132xf32> to vector<4x128xf32>
    %47 = vector.extract_strided_slice %42 {offsets = [0, 4], sizes = [4, 128], strides = [1, 1]} : vector<4x132xf32> to vector<4x128xf32>
    %48 = tpu.concatenate %43, %44, %45, %46, %47 in 0 : vector<4x128xf32>, vector<4x128xf32>, vector<4x128xf32>, vector<4x128xf32>, vector<4x128xf32> -> vector<20x128xf32>
    %c0_15 = arith.constant 0 : index
    %c0_16 = arith.constant 0 : index
    %49 = vector.load %arg6[%c0_15, %c0_16] : memref<4x20xbf16, #tpu.memory_space<vmem>>, vector<4x20xbf16>
    %50 = arith.truncf %48 : vector<20x128xf32> to vector<20x128xbf16>
    %cst_17 = arith.constant dense<0.000000e+00> : vector<4x128xf32>
    %51 = tpu.matmul %49, %50, %cst_17 {dimension_numbers = #tpu.dot_dimension_numbers<[1], [0], [0], [1], [0, 0, 1, 1], [], []>} : vector<4x20xbf16>, vector<20x128xbf16>, vector<4x128xf32> -> vector<4x128xf32>
    %c0_18 = arith.constant 0 : index
    %c0_19 = arith.constant 0 : index
    %52 = vector.load %arg7[%c0_18, %c0_19] : memref<4x1xf32, #tpu.memory_space<vmem>>, vector<4x1xf32>
    %53 = vector.broadcast %52 : vector<4x1xf32> to vector<4x128xf32>
    %54 = arith.addf %51, %53 : vector<4x128xf32>
    %55 = arith.addf %54, %7 : vector<4x128xf32>
    %56 = vector.shape_cast %55 : vector<4x128xf32> to vector<1x4x128xf32>
    %57 = arith.truncf %56 : vector<1x4x128xf32> to vector<1x4x128xbf16>
    %c0_20 = arith.constant 0 : index
    %c0_21 = arith.constant 0 : index
    %c0_22 = arith.constant 0 : index
    %58 = vector.load %arg8[%c0_20, %c0_21, %c0_22] : memref<1x4x128xbf16, #tpu.memory_space<vmem>>, vector<1x4x128xbf16>
    tpu.vector_store %arg8[%c0_20, %c0_21, %c0_22], %57 {strides = array<i32>} : memref<1x4x128xbf16, #tpu.memory_space<vmem>>, vector<1x4x128xbf16>,
    return
  }
  func.func @transform_0(%arg0: i32, %arg1: i32) -> (i32, i32, i32) {
    %c0_i32 = arith.constant 0 : i32
    %c0_i32_0 = arith.constant 0 : i32
    return %arg0, %c0_i32, %arg1 : i32, i32, i32
  }
  func.func @transform_1(%arg0: i32, %arg1: i32) -> (i32, i32, i32) {
    %c1_i32 = arith.constant 1 : i32
    %0 = arith.addi %arg1, %c1_i32 : i32
    %c1_i32_0 = arith.constant 1 : i32
    %1 = arith.muli %0, %c1_i32_0 : i32
    %c0_i32 = arith.constant 0 : i32
    %c0_i32_1 = arith.constant 0 : i32
    return %arg0, %c0_i32, %1 : i32, i32, i32
  }
  func.func @transform_2(%arg0: i32, %arg1: i32) -> (i32, i32) {
    %c0_i32 = arith.constant 0 : i32
    %c0_i32_0 = arith.constant 0 : i32
    %c0_i32_1 = arith.constant 0 : i32
    return %c0_i32, %c0_i32_0 : i32, i32
  }
  func.func @transform_3(%arg0: i32, %arg1: i32) -> (i32, i32) {
    %c0_i32 = arith.constant 0 : i32
    %c0_i32_0 = arith.constant 0 : i32
    %c0_i32_1 = arith.constant 0 : i32
    return %c0_i32, %c0_i32_0 : i32, i32
  }
  func.func @transform_4(%arg0: i32, %arg1: i32) -> (i32, i32) {
    %c0_i32 = arith.constant 0 : i32
    %c0_i32_0 = arith.constant 0 : i32
    %c0_i32_1 = arith.constant 0 : i32
    return %c0_i32, %c0_i32_0 : i32, i32
  }
  func.func @transform_5(%arg0: i32, %arg1: i32) -> (i32, i32) {
    %c0_i32 = arith.constant 0 : i32
    %c0_i32_0 = arith.constant 0 : i32
    %c0_i32_1 = arith.constant 0 : i32
    return %c0_i32, %c0_i32_0 : i32, i32
  }
  func.func @transform_6(%arg0: i32, %arg1: i32) -> (i32, i32, i32) {
    %c0_i32 = arith.constant 0 : i32
    %c0_i32_0 = arith.constant 0 : i32
    return %arg0, %c0_i32, %arg1 : i32, i32, i32
  }
}

module attributes {stable_mosaic.version = 11 : i64} {
  func.func @kernel(%arg0: i32, %arg1: i32, %arg2: memref<1x4x128xbf16, #tpu.memory_space<vmem>>, %arg3: memref<1x4x128xbf16, #tpu.memory_space<vmem>>, %arg4: memref<1x28xbf16, #tpu.memory_space<vmem>>, %arg5: memref<1x1xf32, #tpu.memory_space<vmem>>, %arg6: memref<1x1x128xf32, #tpu.memory_space<vmem>>) attributes {dimension_semantics = [#tpu.dimension_semantics<parallel>, #tpu.dimension_semantics<parallel>], iteration_bounds = array<i64: 2, 1>, scalar_prefetch = 0 : i64, scratch_operands = 0 : i64, tpu.core_type = #tpu.core_type<tc>, window_params = [{transform_indices = @transform_0, window_bounds = array<i64: 1, 4, 128>}, {transform_indices = @transform_1, window_bounds = array<i64: 1, 4, 128>}, {pipeline_mode = #tpu.pipeline_mode<synchronous>, transform_indices = @transform_2, window_bounds = array<i64: 1, 28>}, {pipeline_mode = #tpu.pipeline_mode<synchronous>, transform_indices = @transform_3, window_bounds = array<i64: 1, 1>}, {transform_indices = @transform_4, window_bounds = array<i64: 1, 1, 128>}]} {
    %c0 = arith.constant 0 : index
    %c0_0 = arith.constant 0 : index
    %c0_1 = arith.constant 0 : index
    %0 = vector.load %arg2[%c0, %c0_0, %c0_1] : memref<1x4x128xbf16, #tpu.memory_space<vmem>>, vector<1x4x128xbf16>
    %1 = vector.shape_cast %0 : vector<1x4x128xbf16> to vector<4x128xbf16>
    %c0_2 = arith.constant 0 : index
    %c0_3 = arith.constant 0 : index
    %c0_4 = arith.constant 0 : index
    %2 = vector.load %arg3[%c0_2, %c0_3, %c0_4] : memref<1x4x128xbf16, #tpu.memory_space<vmem>>, vector<1x4x128xbf16>
    %3 = vector.shape_cast %2 : vector<1x4x128xbf16> to vector<4x128xbf16>
    %4 = vector.extract_strided_slice %3 {offsets = [0, 0], sizes = [4, 6], strides = [1, 1]} : vector<4x128xbf16> to vector<4x6xbf16>
    %5 = tpu.concatenate %1, %4 in 1 : vector<4x128xbf16>, vector<4x6xbf16> -> vector<4x134xbf16>
    %cst = arith.constant 0.000000e+00 : bf16
    %6 = vector.broadcast %cst : bf16 to vector<4x134xbf16>
    %7 = arith.cmpf oge, %5, %6 : vector<4x134xbf16>
    %cst_5 = arith.constant 1.000980e-02 : bf16
    %8 = vector.broadcast %cst_5 : bf16 to vector<4x134xbf16>
    %9 = arith.mulf %5, %8 : vector<4x134xbf16>
    %10 = arith.select %7, %5, %9 : vector<4x134xi1>, vector<4x134xbf16>
    %11 = vector.extract_strided_slice %10 {offsets = [0, 0], sizes = [4, 128], strides = [1, 1]} : vector<4x134xbf16> to vector<4x128xbf16>
    %12 = vector.extract_strided_slice %10 {offsets = [0, 1], sizes = [4, 128], strides = [1, 1]} : vector<4x134xbf16> to vector<4x128xbf16>
    %13 = vector.extract_strided_slice %10 {offsets = [0, 2], sizes = [4, 128], strides = [1, 1]} : vector<4x134xbf16> to vector<4x128xbf16>
    %14 = vector.extract_strided_slice %10 {offsets = [0, 3], sizes = [4, 128], strides = [1, 1]} : vector<4x134xbf16> to vector<4x128xbf16>
    %15 = vector.extract_strided_slice %10 {offsets = [0, 4], sizes = [4, 128], strides = [1, 1]} : vector<4x134xbf16> to vector<4x128xbf16>
    %16 = vector.extract_strided_slice %10 {offsets = [0, 5], sizes = [4, 128], strides = [1, 1]} : vector<4x134xbf16> to vector<4x128xbf16>
    %17 = vector.extract_strided_slice %10 {offsets = [0, 6], sizes = [4, 128], strides = [1, 1]} : vector<4x134xbf16> to vector<4x128xbf16>
    %18 = tpu.concatenate %11, %12, %13, %14, %15, %16, %17 in 0 : vector<4x128xbf16>, vector<4x128xbf16>, vector<4x128xbf16>, vector<4x128xbf16>, vector<4x128xbf16>, vector<4x128xbf16>, vector<4x128xbf16> -> vector<28x128xbf16>
    %c0_6 = arith.constant 0 : index
    %c0_7 = arith.constant 0 : index
    %19 = vector.load %arg4[%c0_6, %c0_7] : memref<1x28xbf16, #tpu.memory_space<vmem>>, vector<1x28xbf16>
    %cst_8 = arith.constant dense<0.000000e+00> : vector<1x128xf32>
    %20 = tpu.matmul %19, %18, %cst_8 {dimension_numbers = #tpu.dot_dimension_numbers<[1], [0], [0], [1], [0, 0, 1, 1], [], []>} : vector<1x28xbf16>, vector<28x128xbf16>, vector<1x128xf32> -> vector<1x128xf32>
    %c0_9 = arith.constant 0 : index
    %c0_10 = arith.constant 0 : index
    %21 = vector.load %arg5[%c0_9, %c0_10] : memref<1x1xf32, #tpu.memory_space<vmem>>, vector<1x1xf32>
    %22 = vector.broadcast %21 : vector<1x1xf32> to vector<1x128xf32>
    %23 = arith.addf %20, %22 : vector<1x128xf32>
    %24 = math.tanh %23 : vector<1x128xf32>
    %25 = vector.shape_cast %24 : vector<1x128xf32> to vector<1x1x128xf32>
    %c0_11 = arith.constant 0 : index
    %c0_12 = arith.constant 0 : index
    %c0_13 = arith.constant 0 : index
    %26 = vector.load %arg6[%c0_11, %c0_12, %c0_13] : memref<1x1x128xf32, #tpu.memory_space<vmem>>, vector<1x1x128xf32>
    tpu.vector_store %arg6[%c0_11, %c0_12, %c0_13], %25 {strides = array<i32>} : memref<1x1x128xf32, #tpu.memory_space<vmem>>, vector<1x1x128xf32>,
    return
  }
  func.func @transform_0(%arg0: i32, %arg1: i32) -> (i32, i32, i32) {
    %c0_i32 = arith.constant 0 : i32
    %c0_i32_0 = arith.constant 0 : i32
    return %arg0, %c0_i32, %arg1 : i32, i32, i32
  }
  func.func @transform_1(%arg0: i32, %arg1: i32) -> (i32, i32, i32) {
    %c1_i32 = arith.constant 1 : i32
    %0 = arith.addi %arg1, %c1_i32 : i32
    %c1_i32_0 = arith.constant 1 : i32
    %1 = arith.muli %0, %c1_i32_0 : i32
    %c0_i32 = arith.constant 0 : i32
    %c0_i32_1 = arith.constant 0 : i32
    return %arg0, %c0_i32, %1 : i32, i32, i32
  }
  func.func @transform_2(%arg0: i32, %arg1: i32) -> (i32, i32) {
    %c0_i32 = arith.constant 0 : i32
    %c0_i32_0 = arith.constant 0 : i32
    %c0_i32_1 = arith.constant 0 : i32
    return %c0_i32, %c0_i32_0 : i32, i32
  }
  func.func @transform_3(%arg0: i32, %arg1: i32) -> (i32, i32) {
    %c0_i32 = arith.constant 0 : i32
    %c0_i32_0 = arith.constant 0 : i32
    %c0_i32_1 = arith.constant 0 : i32
    return %c0_i32, %c0_i32_0 : i32, i32
  }
  func.func @transform_4(%arg0: i32, %arg1: i32) -> (i32, i32, i32) {
    %c0_i32 = arith.constant 0 : i32
    %c0_i32_0 = arith.constant 0 : i32
    return %arg0, %c0_i32, %arg1 : i32, i32, i32
  }
}

</mosaic_0001>

<bundles_post_ra>
// kernel: nsf_hifigan_forward.15
= control target key start
LH: loop header
LB: loop body
LE: loop exit
PB: predicated region body
PF: predicated region fallthrough
CT: control target
= control target key end

     0   :  { %s452_s14 = smov 0   ;;  %s454_s15 = smov 0   ;;  %s492_s0 = inlined_call_operand.vmem [shape: bf16[2,9,128], index: 0, kind: input, shape index: {}]   ;;  %s493_s1 = inlined_call_operand.vmem [shape: bf16[1,9], index: 1, kind: input, shape index: {}]   ;;  %s494_s2 = inlined_call_operand.<no memory space> [shape: f32[1,1], index: 2, kind: input, shape index: {}]   ;;  %s495_s3 = inlined_call_operand.vmem [shape: bf16[2,1,128], index: 3, kind: output, shape index: {}]  }
   0x1   :  { %v8_v0 = vstv %s494_s2  ;;  %s456_s16 = smov 0  }
   0x2   :  { %9 = vst [vmem:[#allocation2] sm:$0x1] %v8_v0 }
   0x3 LB: > { %s27_s2 = sadd.s32 1, %s419_s15  ;;  %p353_p0 = scmp.ge.s32.totalorder %s423_s16, 1  ;;  %s423_s16 = sphi %s456_s16, %s15_s16   ;;  %s419_s15 = sphi %s454_s15, %s497_s15   ;;  %s415_s14 = sphi %s452_s14, %s496_s14  }
   0x4   : > { %p29_p1 = scmp.ge.s32.totalorder %s27_s2, 2  ;;  %p158_p2 = scmp.lt.s32.totalorder %s423_s16, 3 }
   0x6   : > { %s499_s2 = smov (%p29_p1, %s27_s2), 0  ;;  %p159_p3 = pnand %p353_p0, %p158_p2 }
   0x7   : > { %p186_p4 = scmp.lt.s32.totalorder (!%p159_p3), %s415_s14, 1  ;;  %vm223_vm0 = vcmask (!%p159_p3), 1043456   ;;  %v425_v1 = vmov (!%p159_p3), 0.0   ;;  %vm224_vm1 = vcmask (!%p159_p3), 1044480   ;;  %v426_v2 = vmov (!%p159_p3), 65535  }
   0x8   : > { %162 = sbr.rel (%p159_p3) target bundleno = 253 (0xfd), region = 32  ;;  %363 = vmatprep.subr.bf16.mxu0 (!%p159_p3), %v425_v1  ;;  %v225_v3 = vsel (!%p159_p3), %vm223_vm0, 4294967295, %v426_v2  ;;  %vm427_vm2 = vmmov (!%p159_p3), 0   ;;  %v428_v4 = vmov (!%p159_p3), 0   ;;  %v203_v9 = vld [vmem:[%s493_s1] sm:$0x1] (!%p159_p3)  ;;  %v210_v10 = vlaneseq (!%p159_p3) }
   0x9   : > { %365 = vmatprep.mubr.msk.bf16.mxu0 (!%p159_p3), %vm427_vm2, %v425_v1  ;;  %397 = vset.pattern.permute.xlu0 (!%p159_p3), %v428_v4  ;;  %v204_v5 = vld [vmem:[#allocation2] sm:$0x1] (!%p159_p3)  ;;  %v226_v6 = vsel (!%p159_p3), %vm224_vm1, %v225_v3, 0  ;;  %vm219_vm3 = vcmask (!%p159_p3), 72704   ;;  %vm272_vm4 = vcmask (!%p159_p3), 1040384  }
   0xa   : > { %207 = vperm.xlu0 (!%p159_p3), %397, %v204_v5   ;;  %v211_v11 = vshrl.u32 (!%p159_p3), %v210_v10, 7  ;;  %vm273_vm5 = vsmask.f32 (!%p159_p3), 256 }
   0xb   : > { %vm274_vm6 = vmand (!%p159_p3), %vm272_vm4, %vm273_vm5 }
   0xc   : > { %v212_v12 = vsub.s32 (!%p159_p3), 0, %v211_v11 }
   0xf   : > { %s501_s14 = smov (!%p186_p4, %s415_s14), 1 }
  0x10   : > { %s360_s17 = sshll.u32 %s501_s14, 3  ;;  %s199_s25 = scalar_lea.vmem %s495_s3, %s501_s14 }
  0x11   : > { %s193_s20 = scalar_lea.vmem %s492_s0, %s360_s17  ;;  %v275_v21 = vld [vmem:[%s199_s25] sm:$0x1] }
  0x12   : > { %v398_v7 = vld [vmem:[%s193_s20] sm:$0x1f]  }
  0x13   : > { %v228_v8 = vand.u32 %v398_v7, %v226_v6 }
  0x15   : > { %364 = vmatpush3.bf16.msra.mxu0 %v228_v8 }
  0x18   : > { %366 = vmatmul.mubr.msk.bf16.vlgmr.msra.gmra.mrb[0].mxu0 %vm219_vm3, %v203_v9 }
  0x89   : > { %v208_v13 = vpop.permute.xlu0 %207 }
  0x8a   : > { %v213_v14 = vrot.slane %v208_v13, %v212_v12 }
  0xeb   : > { %v264_v15 = vpop.f32.mrb[0].mxu0 }
  0xec   : > { %v265_v16 = vadd.f32 %v264_v15, %v213_v14  ;;  %v367_v17 = vpop.f32.mrb[1].mxu0 }
  0xed   : > { %v267_v18 = vpop.f32.mrb[2].mxu0 }
  0xee   : > { %399 = vtanh.f32 %v265_v16  ;;  %v368_v19 = vpop.f32.mrb[3].mxu0 }
  0xf8   : > { %v400_v20 = vpop.eup %399 }
  0xf9   : > { %v271_v22 = vpack.c.bf16 %v400_v20, %v400_v20 }
  0xfb   : > { %v276_v23 = vsel %vm274_vm6, %v271_v22, %v275_v21 }
  0xfc   : > { %277 = vst [vmem:[%s199_s25] sm:$0x1] %v276_v23 }
  0xfd PF: > { %s15_s16 = sadd.s32 1, %s423_s16   ;;  %s496_s14 = smov %s419_s15 }
  0xfe   : > { %p12_p5 = scmp.ge.s32.totalorder %s15_s16, 4   ;;  %s497_s15 = smov %s499_s2 }
 0x100   :  { %14 = sbr.rel (!%p12_p5) target bundleno = 3 (0x3), region = 62 }

// kernel: tile.13
= control target key start
LH: loop header
LB: loop body
LE: loop exit
PB: predicated region body
PF: predicated region fallthrough
CT: control target
= control target key end

     0   :  { %s22_s0 = inlined_call_operand.vmem [shape: f32[8], index: 0, kind: input, shape index: {}]   ;;  %s23_s1 = inlined_call_operand.vmem [shape: f32[4,8], index: 1, kind: output, shape index: {}]  }
   0x1   :  { %v4_v0 = vld [vmem:[%s22_s0] ss:$0 sm:$0xff] }
   0x2   :  { %5 = vst [vmem:[%s23_s1] sm:$0xf] %v4_v0 }

// kernel: tile.0
= control target key start
LH: loop header
LB: loop body
LE: loop exit
PB: predicated region body
PF: predicated region fallthrough
CT: control target
= control target key end

     0   :  { %s66_s8 = smov 125   ;;  %vm7_vm0 = vcmask 7168   ;;  %s67_s11 = smov 126   ;;  %s117_s0 = inlined_call_operand.vmem [shape: f32[4,8], index: 0, kind: input, shape index: {}]   ;;  %s118_s1 = inlined_call_operand.vmem [shape: f32[32,1], index: 1, kind: output, shape index: {}]  }
   0x1   :  { %v4_v0 = vld [vmem:[%s117_s0] sm:$0xf]  ;;  %s65_s0 = smov 127   ;;  %s68_s12 = smov 124  }
   0x2   :  { %5 = vst [vmem:[#allocation0] sm:$0xf] %v4_v0  ;;  %s69_s13 = smov 123   ;;  %s70_s14 = smov 122  }
   0x3   :  { %s71_s15 = smov 121  }
   0x9   :  { %v9_v1 = vld [vmem:[#allocation0] sm:$0xf]  }
   0xa   :  { %v21_v2 = vld [vmem:[#allocation0] sm:$0xf]   ;;  %10 = vrot.lane.b32.xlu0 %v9_v1, %s65_s0 }
   0xb   :  { %22 = vrot.lane.b32.xlu1 %v21_v2, %s66_s8  ;;  %v15_v3 = vld [vmem:[#allocation0] sm:$0xf]  }
   0xc   :  { %v27_v4 = vld [vmem:[#allocation0] sm:$0xf]  }
   0xd   :  { %v6_v5 = vld [vmem:[#allocation0] sm:$0xf]  }
   0xe   :  { %8 = vst.msk [vmem:[%s118_s1] ss:$8 sm:$0xf] %vm7_vm0, %v6_v5   ;;  %16 = vrot.lane.b32.xlu0 %v15_v3, %s67_s11  ;;  %v33_v6 = vld [vmem:[#allocation0] sm:$0xf]  }
   0xf   :  { %28 = vrot.lane.b32.xlu1 %v27_v4, %s68_s12  ;;  %v39_v7 = vld [vmem:[#allocation0] sm:$0xf]  }
  0x10   :  { %v45_v8 = vld [vmem:[#allocation0] sm:$0xf]  }
  0x12   :  { %34 = vrot.lane.b32.xlu0 %v33_v6, %s69_s13 }
  0x13   :  { %40 = vrot.lane.b32.xlu1 %v39_v7, %s70_s14 }
  0x16   :  { %46 = vrot.lane.b32.xlu0 %v45_v8, %s71_s15 }
  0x7c   :  { %v11_v9 = vpop.permute.xlu0 %10  }
  0x7d   :  { %v23_v10 = vpop.permute.xlu1 %22   ;;  %51 = vst.msk [vmem:[%s118_s1 + $0x1] ss:$8 sm:$0xf] %vm7_vm0, %v11_v9  }
  0x7e   :  { %53 = vst.msk [vmem:[%s118_s1 + $0x3] ss:$8 sm:$0xf] %vm7_vm0, %v23_v10  }
  0x80   :  { %v17_v11 = vpop.permute.xlu0 %16  }
  0x81   :  { %v29_v12 = vpop.permute.xlu1 %28   ;;  %52 = vst.msk [vmem:[%s118_s1 + $0x2] ss:$8 sm:$0xf] %vm7_vm0, %v17_v11  }
  0x82   :  { %54 = vst.msk [vmem:[%s118_s1 + $0x4] ss:$8 sm:$0xf] %vm7_vm0, %v29_v12  }
  0x84   :  { %v35_v13 = vpop.permute.xlu0 %34  }
  0x85   :  { %v41_v14 = vpop.permute.xlu1 %40   ;;  %55 = vst.msk [vmem:[%s118_s1 + $0x5] ss:$8 sm:$0xf] %vm7_vm0, %v35_v13  }
  0x86   :  { %56 = vst.msk [vmem:[%s118_s1 + $0x6] ss:$8 sm:$0xf] %vm7_vm0, %v41_v14  }
  0x88   :  { %v47_v15 = vpop.permute.xlu0 %46  }
  0x89   :  { %57 = vst.msk [vmem:[%s118_s1 + $0x7] ss:$8 sm:$0xf] %vm7_vm0, %v47_v15  }

// kernel: nsf_hifigan_forward.16
= control target key start
LH: loop header
LB: loop body
LE: loop exit
PB: predicated region body
PF: predicated region fallthrough
CT: control target
= control target key end

     0   :  { %s641_s15 = smov 0   ;;  %s643_s16 = smov 0   ;;  %s700_s0 = inlined_call_operand.vmem [shape: bf16[2,8,256], index: 0, kind: input, shape index: {}, may-alias: {0,1}]   ;;  %s701_s1 = inlined_call_operand.vmem [shape: bf16[2,8,256], index: 1, kind: input, shape index: {}, may-alias: {0,1}]   ;;  %s702_s2 = inlined_call_operand.vmem [shape: bf16[16,56], index: 2, kind: input, shape index: {}]   ;;  %s703_s3 = inlined_call_operand.vmem [shape: f32[16,1], index: 3, kind: input, shape index: {}]   ;;  %s704_s4 = inlined_call_operand.vmem [shape: bf16[2,16,128], index: 4, kind: output, shape index: {}]  }
   0x1   :  { %s645_s17 = smov 0  }
   0x2 LB: > { %s26_s18 = sadd.s32 1, %s601_s16  ;;  %p505_p0 = scmp.ge.s32.totalorder %s605_s17, 1  ;;  %s605_s17 = sphi %s645_s17, %s14_s17   ;;  %s601_s16 = sphi %s643_s16, %s706_s16   ;;  %s597_s15 = sphi %s641_s15, %s705_s15  }
   0x3   : > { %p28_p1 = scmp.ge.s32.totalorder %s26_s18, 2  ;;  %p200_p2 = scmp.lt.s32.totalorder %s605_s17, 3 }
   0x5   : > { %s708_s18 = smov (%p28_p1, %s26_s18), 0  ;;  %p201_p3 = pnand %p505_p0, %p200_p2 }
   0x6   : > { %p241_p4 = scmp.lt.s32.totalorder (!%p201_p3), %s597_s15, 1  ;;  %v607_v0 = vmov (!%p201_p3), 0.0   ;;  %s608_s27 = smov (!%p201_p3), 126   ;;  %vm612_vm0 = vmmov (!%p201_p3), 0   ;;  %v613_v5 = vmov (!%p201_p3), 0   ;;  %v326_v6 = vld [vmem:[%s703_s3 + $0x8] sm:$0xff] (!%p201_p3) }
   0x7   : > { %204 = sbr.rel (%p201_p3) target bundleno = 379 (0x17b), region = 36  ;;  %535 = vmatprep.subr.bf16.mxu0 (!%p201_p3), %v607_v0  ;;  %s609_s28 = smov (!%p201_p3), 127   ;;  %543 = vmatprep.mubr.msk.bf16.mxu0 (!%p201_p3), %vm612_vm0, %v607_v0  ;;  %v325_v7 = vld [vmem:[%s703_s3] sm:$0xff] (!%p201_p3)  ;;  %vm278_vm1 = vcmask (!%p201_p3), 1039360   ;;  %vm290_vm2 = vcmask (!%p201_p3), 1022976   ;;  %vm310_vm3 = vcmask (!%p201_p3), 1043456  }
   0x8   : > { %s610_s29 = smov (!%p201_p3), 125   ;;  %s611_s30 = smov (!%p201_p3), 124   ;;  %580 = vset.pattern.permute.xlu0 (!%p201_p3), %v613_v5  ;;  %581 = vset.pattern.permute.xlu1 (!%p201_p3), %v613_v5  ;;  %vm284_vm4 = vcmask (!%p201_p3), 1031168   ;;  %vm296_vm5 = vcmask (!%p201_p3), 1014784   ;;  %vm302_vm6 = vcmask (!%p201_p3), 1006592   ;;  %vm308_vm7 = vcmask (!%p201_p3), 998400  }
   0x9   : > { %s614_s5 = smov (!%p201_p3), 123   ;;  %s615_s6 = smov (!%p201_p3), 122   ;;  %v582_v30 = vld [vmem:[%s702_s2] sm:$0xff] (!%p201_p3)   ;;  %vm342_vm8 = vcmask (!%p201_p3), 457728  }
   0xe   : > { %s710_s15 = smov (!%p241_p4, %s597_s15), 1 }
   0xf   : > { %s659_s19 = sshll.u32 %s710_s15, 3 }
  0x10   : > { %s248_s22 = scalar_lea.vmem %s700_s0, %s659_s19  ;;  %s520_s23 = sadd.s32 4, %s659_s19 }
  0x11   : > { %v268_v1 = vld [vmem:[%s248_s22] sm:$0xf]  ;;  %s257_s26 = scalar_lea.vmem %s701_s1, %s520_s23  ;;  %s266_s15 = scalar_lea.vmem %s704_s4, %s659_s19 }
  0x12   : > { %280 = vrot.lane.b32.xlu1 %v268_v1, %s608_s27  ;;  %v272_v2 = vrot.slane %v268_v1, 4  ;;  %v269_v3 = vld [vmem:[%s257_s26] sm:$0xf] }
  0x13   : > { %v273_v4 = vrot.slane %v269_v3, 4 }
  0x14   : > { %274 = vrot.lane.b32.xlu0 %v272_v2, %s609_s28 }
  0x16   : > { %282 = vrot.lane.b32.xlu1 %v269_v3, %s608_s27 }
  0x18   : > { %286 = vrot.lane.b32.xlu0 %v272_v2, %s610_s29 }
  0x1a   : > { %288 = vrot.lane.b32.xlu1 %v273_v4, %s610_s29 }
  0x1c   : > { %276 = vrot.lane.b32.xlu0 %v273_v4, %s609_s28 }
  0x1e   : > { %294 = vrot.lane.b32.xlu1 %v269_v3, %s611_s30 }
  0x20   : > { %292 = vrot.lane.b32.xlu0 %v268_v1, %s611_s30 }
  0x22   : > { %300 = vrot.lane.b32.xlu1 %v273_v4, %s614_s5 }
  0x24   : > { %298 = vrot.lane.b32.xlu0 %v272_v2, %s614_s5 }
  0x26   : > { %306 = vrot.lane.b32.xlu1 %v269_v3, %s615_s6 }
  0x28   : > { %304 = vrot.lane.b32.xlu0 %v268_v1, %s615_s6 }
  0x2a   : > { %334 = vperm.xlu1 %581, %v326_v6  }
  0x2c   : > { %329 = vperm.xlu0 %580, %v325_v7  }
  0x84   : > { %v281_v8 = vpop.permute.xlu1 %280 }
  0x86   : > { %v275_v9 = vpop.permute.xlu0 %274 }
  0x88   : > { %v283_v10 = vpop.permute.xlu1 %282 }
  0x89   : > { %v285_v19 = vsel %vm284_vm4, %v281_v8, %v283_v10 }
  0x8a   : > { %v287_v11 = vpop.permute.xlu0 %286 }
  0x8c   : > { %v289_v12 = vpop.permute.xlu1 %288 }
  0x8d   : > { %v291_v17 = vsel %vm290_vm2, %v287_v11, %v289_v12 }
  0x8e   : > { %v277_v13 = vpop.permute.xlu0 %276  ;;  %v317_v20 = vsel %vm310_vm3, %v285_v19, %v291_v17 }
  0x8f   : > { %v279_v14 = vsel %vm278_vm1, %v275_v9, %v277_v13 }
  0x90   : > { %v313_v15 = vsel %vm310_vm3, %v268_v1, %v279_v14  ;;  %v295_v16 = vpop.permute.xlu1 %294 }
  0x91   : > { %536 = vmatpush3.bf16.msra.mxu0 %v313_v15 }
  0x92   : > { %v293_v18 = vpop.permute.xlu0 %292  ;;  %537 = vmatprep.subr.bf16.mxu0 %v607_v0 }
  0x93   : > { %v297_v23 = vsel %vm296_vm5, %v293_v18, %v295_v16 }
  0x94   : > { %v301_v21 = vpop.permute.xlu1 %300 }
  0x95   : > { %538 = vmatpush3.bf16.msra.mxu0 %v317_v20 }
  0x96   : > { %v299_v22 = vpop.permute.xlu0 %298  ;;  %539 = vmatprep.subr.bf16.mxu0 %v607_v0 }
  0x97   : > { %v303_v24 = vsel %vm302_vm6, %v299_v22, %v301_v21 }
  0x98   : > { %v321_v25 = vsel %vm310_vm3, %v297_v23, %v303_v24  ;;  %v307_v26 = vpop.permute.xlu1 %306 }
  0x99   : > { %540 = vmatpush3.bf16.msra.mxu0 %v321_v25 }
  0x9a   : > { %v305_v27 = vpop.permute.xlu0 %304  ;;  %541 = vmatprep.subr.bf16.mxu0 %v607_v0 }
  0x9b   : > { %v309_v28 = vsel %vm308_vm7, %v305_v27, %v307_v26 }
  0x9c   : > { %v347_v29 = vsel %vm310_vm3, %v309_v28, 0 }
  0x9d   : > { %542 = vmatpush3.bf16.msra.mxu0 %v347_v29 }
  0xa0   : > { %544 = vmatmul.mubr.msk.bf16.vlgmr.msra.gmra.mrb[0].mxu0 %vm342_vm8, %v582_v30 }
  0xa9   : > { %v335_v33 = vpop.permute.xlu1 %334 }
  0xab   : > { %v330_v31 = vpop.permute.xlu0 %329 }
 0x173   : > { %v383_v32 = vpop.f32.mrb[0].mxu0 }
 0x174   : > { %v545_v34 = vpop.f32.mrb[1].mxu0  ;;  %v384_v36 = vadd.f32 %v383_v32, %v330_v31 }
 0x175   : > { %v386_v35 = vpop.f32.mrb[2].mxu0 }
 0x176   : > { %v387_v37 = vadd.f32 %v386_v35, %v335_v33  ;;  %v546_v38 = vpop.f32.mrb[3].mxu0 }
 0x178   : > { %v527_v39 = vpack.c.bf16 %v387_v37, %v384_v36 }
 0x17a   : > { %528 = vst [vmem:[%s266_s15] sm:$0xff] %v527_v39  }
 0x17b PF: > { %s14_s17 = sadd.s32 1, %s605_s17   ;;  %s705_s15 = smov %s601_s16 }
 0x17c   : > { %p11_p5 = scmp.ge.s32.totalorder %s14_s17, 4   ;;  %s706_s16 = smov %s708_s18 }
 0x17e   :  { %13 = sbr.rel (!%p11_p5) target bundleno = 2 (0x2), region = 69 }

// kernel: nsf_hifigan_forward.17
= control target key start
LH: loop header
LB: loop body
LE: loop exit
PB: predicated region body
PF: predicated region fallthrough
CT: control target
= control target key end

     0   :  { %s767_s15 = smov 0   ;;  %s769_s16 = smov 0   ;;  %s866_s0 = inlined_call_operand.vmem [shape: bf16[2,16,256], index: 0, kind: input, shape index: {}, may-alias: {0,1}]   ;;  %s867_s1 = inlined_call_operand.vmem [shape: bf16[2,16,256], index: 1, kind: input, shape index: {}, may-alias: {0,1}]   ;;  %s868_s2 = inlined_call_operand.vmem [shape: bf16[32,32], index: 2, kind: input, shape index: {}]   ;;  %s869_s3 = inlined_call_operand.vmem [shape: f32[32,1], index: 3, kind: input, shape index: {}]   ;;  %s870_s4 = inlined_call_operand.vmem [shape: bf16[2,32,128], index: 4, kind: output, shape index: {}]  }
   0x1   :  { %s771_s17 = smov 0   ;;  %s773_s18 = smov 0  }
   0x2   :  { %s775_s19 = smov 0  }
   0x3 LB: > { %s26_s20 = sadd.s32 1, %s734_s18  ;;  %p42_p1 = scmp.ne.s32.totalorder %s726_s16, %s722_s15  ;;  %s738_s19 = sphi %s775_s19, %s14_s19   ;;  %s734_s18 = sphi %s773_s18, %s875_s18   ;;  %s730_s17 = sphi %s771_s17, %s874_s17   ;;  %s726_s16 = sphi %s769_s16, %s873_s16   ;;  %s722_s15 = sphi %s767_s15, %s872_s15  }
   0x4   : > { %p28_p0 = scmp.ge.s32.totalorder %s26_s20, 2  ;;  %p43_p2 = scmp.eq.s32.totalorder %s738_s19, 0 }
   0x5   : > { %s35_s23 = sadd.s32 1, %s726_s16  ;;  %p596_p5 = scmp.ge.s32.totalorder %s738_s19, 2 }
   0x6   : > { %s877_s20 = smov (%p28_p0, %s26_s20), 0  ;;  %p798_p3 = por %p43_p2, %p42_p1 }
   0x7   : > { %s30_s22 = ssub.s32 %s734_s18, %s877_s20  ;;  %174 = sbr.rel (%p596_p5) target bundleno = 28 (0x1c), region = 24 }
   0x8   : > { %p33_p4 = scmp.eq.s32.totalorder %s30_s22, 0 }
   0xa   : > { %s806_s24 = scalar_select %p33_p4, %s726_s16, %s35_s23  }
   0xe   : > { %177 = sbr.rel (!%p798_p3) target bundleno = 21 (0x15), region = 28  ;;  %s179_s25 = sand.u32 (%p798_p3), 1, %s726_s16  }
   0xf   : > { %s622_s26 = sshll.u32 (%p798_p3), %s734_s18, 4  ;;  %s597_s27 = sshll.u32 (%p798_p3), %s179_s25, 3 }
  0x10   : > { %s185_s30 = scalar_lea.vmem (%p798_p3), %s866_s0, %s622_s26  ;;  %s181_s5 = scalar_lea.vmem (%p798_p3), [#allocation2], %s597_s27 }
  0x11   : > { %v201_v0 = vld [vmem:[%s185_s30] sm:$0xf] (%p798_p3)  ;;  %v203_v1 = vld [vmem:[%s185_s30 + $0x8] sm:$0xf] (%p798_p3) }
  0x12   : > { %202 = vst [vmem:[%s181_s5] sm:$0xf] (%p798_p3), %v201_v0  ;;  %204 = vst [vmem:[%s181_s5 + $0x4] sm:$0xf] (%p798_p3), %v203_v1 }
  0x15 PF: > { %231 = sbr.rel (!%p798_p3) target bundleno = 28 (0x1c), region = 69  ;;  %s233_s6 = sand.u32 (%p798_p3), 1, %s726_s16  }
  0x16   : > { %s623_s7 = sshll.u32 (%p798_p3), %s734_s18, 4  ;;  %s600_s8 = sshll.u32 (%p798_p3), %s233_s6, 3 }
  0x17   : > { %s525_s11 = scalar_lea.vmem (%p798_p3), %s867_s1, %s623_s7  ;;  %s235_s12 = scalar_lea.vmem (%p798_p3), [#allocation3], %s600_s8 }
  0x18   : > { %v603_v2 = vld [vmem:[%s525_s11 + $0x4] sm:$0xf] (%p798_p3)  ;;  %v604_v3 = vld [vmem:[%s525_s11 + $0xc] sm:$0xf] (%p798_p3) }
  0x19   : > { %257 = vst [vmem:[%s235_s12] sm:$0xf] (%p798_p3), %v603_v2  ;;  %259 = vst [vmem:[%s235_s12 + $0x4] sm:$0xf] (%p798_p3), %v604_v3 }
  0x1c PF: > { %p605_p6 = scmp.ge.s32.totalorder %s738_s19, 1  ;;  %p285_p7 = scmp.lt.s32.totalorder %s738_s19, 3 }
  0x1e   : > { %p286_p8 = pnand %p605_p6, %p285_p7 }
  0x1f   : > { %s292_s13 = sand.u32 (!%p286_p8), 1, %s722_s15   ;;  %v698_v4 = vld [vmem:[%s868_s2] sm:$0xff] (!%p286_p8)   ;;  %vm411_vm0 = vcmask (!%p286_p8), 261120   ;;  %v740_v8 = vmov (!%p286_p8), 0   ;;  %v378_v12 = vld [vmem:[%s869_s3 + $0x8] sm:$0xff] (!%p286_p8)  ;;  %s741_s29 = smov (!%p286_p8), 127  }
  0x20   : > { %289 = sbr.rel (%p286_p8) target bundleno = 382 (0x17e), region = 110  ;;  %s606_s14 = sshll.u32 (!%p286_p8), %s292_s13, 3  ;;  %648 = vmatprep.mubr.msk.bf16.mxu0 (!%p286_p8), %vm411_vm0, %v698_v4  ;;  %694 = vset.pattern.permute.xlu1 (!%p286_p8), %v740_v8  ;;  %v377_v9 = vld [vmem:[%s869_s3] sm:$0xff] (!%p286_p8)  ;;  %v380_v14 = vld [vmem:[%s869_s3 + $0x18] sm:$0xff] (!%p286_p8)  ;;  %v379_v15 = vld [vmem:[%s869_s3 + $0x10] sm:$0xff] (!%p286_p8)  ;;  %vm370_vm3 = vcmask (!%p286_p8), 1039360  }
  0x21   : > { %s294_s23 = scalar_lea.vmem (!%p286_p8), [#allocation2], %s606_s14  ;;  %s301_s25 = scalar_lea.vmem (!%p286_p8), [#allocation3], %s606_s14  ;;  %695 = vset.pattern.permute.xlu0 (!%p286_p8), %v740_v8  ;;  %383 = vperm.xlu1 (!%p286_p8), %694, %v377_v9   ;;  %v699_v19 = vld [vmem:[%s868_s2 + $0x8] sm:$0xff] (!%p286_p8)  }
  0x22   : > { %v696_v5 = vld [vmem:[%s294_s23] sm:$0xff] (!%p286_p8)   ;;  %v697_v6 = vld [vmem:[%s301_s25] sm:$0xff] (!%p286_p8)   ;;  %p332_p9 = scmp.lt.s32.totalorder (!%p286_p8), %s730_s17, 1 }
  0x23   : > { %vm358_vm1 = vcmp.ge.bf16.partialorder (!%p286_p8), %v696_v5, 0  ;;  %v360_v7 = vmul.bf16 (!%p286_p8), 1036860877, %v696_v5  ;;  %vm359_vm2 = vcmp.ge.bf16.partialorder (!%p286_p8), %v697_v6, 0  ;;  %v361_v10 = vmul.bf16 (!%p286_p8), 1036860877, %v697_v6 }
  0x25   : > { %v362_v11 = vsel (!%p286_p8), %vm358_vm1, %v696_v5, %v360_v7  ;;  %v363_v13 = vsel (!%p286_p8), %vm359_vm2, %v697_v6, %v361_v10  ;;  %388 = vperm.xlu1 (!%p286_p8), %694, %v378_v12  }
  0x26   : > { %366 = vrot.lane.b32.xlu0 (!%p286_p8), %v362_v11, %s741_s29  ;;  %644 = vmatprep.subr.bf16.mxu0 (!%p286_p8), %v362_v11 }
  0x27   : > { %645 = vmatpush3.bf16.msra.mxu0 %v362_v11  ;;  %s879_s17 = smov (!%p332_p9, %s730_s17), 1 }
  0x28   : > { %s624_s10 = sshll.u32 %s879_s17, 4 }
  0x29   : > { %398 = vperm.xlu1 %694, %v380_v14   ;;  %s339_s13 = scalar_lea.vmem %s870_s4, %s624_s10 }
  0x2a   : > { %368 = vrot.lane.b32.xlu0 %v363_v13, %s741_s29 }
  0x2e   : > { %393 = vperm.xlu0 %695, %v379_v15  }
  0x98   : > { %v367_v16 = vpop.permute.xlu0 %366 }
  0x9c   : > { %v369_v17 = vpop.permute.xlu0 %368 }
  0x9d   : > { %v371_v18 = vsel %vm370_vm3, %v367_v16, %v369_v17 }
  0x9e   : > { %646 = vmatprep.subr.bf16.mxu0 %v371_v18 }
  0x9f   : > { %647 = vmatpush3.bf16.msra.mxu0 %v371_v18 }
  0xa0   : > { %v384_v20 = vpop.permute.xlu1 %383 }
  0xa2   : > { %649 = vmatmul.mubr.msk.bf16.vlgmr.msra.gmra.mrb[0].mxu0 %vm411_vm0, %v699_v19 }
  0xa4   : > { %v389_v21 = vpop.permute.xlu1 %388 }
  0xa8   : > { %v399_v25 = vpop.permute.xlu1 %398 }
  0xad   : > { %v394_v22 = vpop.permute.xlu0 %393 }
 0x175   : > { %v650_v23 = vpop.f32.mrb[0].mxu0 }
 0x176   : > { %v452_v24 = vpop.f32.mrb[1].mxu0  ;;  %v461_v27 = vadd.f32 %v650_v23, %v394_v22 }
 0x177   : > { %v651_v26 = vpop.f32.mrb[2].mxu0  ;;  %v453_v30 = vadd.f32 %v452_v24, %v384_v20 }
 0x178   : > { %v464_v28 = vadd.f32 %v651_v26, %v399_v25  ;;  %v455_v29 = vpop.f32.mrb[3].mxu0 }
 0x179   : > { %v456_v31 = vadd.f32 %v455_v29, %v389_v21 }
 0x17a   : > { %v637_v32 = vpack.c.bf16 %v464_v28, %v461_v27 }
 0x17b   : > { %v632_v33 = vpack.c.bf16 %v456_v31, %v453_v30 }
 0x17c   : > { %639 = vst [vmem:[%s339_s13 + $0x8] sm:$0xff] %v637_v32  }
 0x17d   : > { %633 = vst [vmem:[%s339_s13] sm:$0xff] %v632_v33  }
 0x17e PF: > { %s14_s19 = sadd.s32 1, %s738_s19   ;;  %s872_s15 = smov %s726_s16 }
 0x17f   : > { %p11_p10 = scmp.ge.s32.totalorder %s14_s19, 4   ;;  %s873_s16 = smov %s806_s24 }
 0x180   : > { %s874_s17 = smov %s734_s18  ;;  %s875_s18 = smov %s877_s20 }
 0x181   :  { %13 = sbr.rel (!%p11_p10) target bundleno = 3 (0x3), region = 161 }

// kernel: nsf_hifigan_forward.18
= control target key start
LH: loop header
LB: loop body
LE: loop exit
PB: predicated region body
PF: predicated region fallthrough
CT: control target
= control target key end

     0   :  { %s632_s18 = smov 0   ;;  %s634_s19 = smov 0   ;;  %s683_s0 = inlined_call_operand.vmem [shape: bf16[2,4,256], index: 0, kind: input, shape index: {}, may-alias: {0,1}]   ;;  %s684_s1 = inlined_call_operand.vmem [shape: bf16[2,4,256], index: 1, kind: input, shape index: {}, may-alias: {0,1}]   ;;  %s685_s2 = inlined_call_operand.vmem [shape: bf16[2,8,128], index: 2, kind: input, shape index: {}]   ;;  %s686_s3 = inlined_call_operand.vmem [shape: bf16[8,12], index: 3, kind: input, shape index: {}]   ;;  %s687_s4 = inlined_call_operand.vmem [shape: f32[8,1], index: 4, kind: input, shape index: {}]   ;;  %s688_s5 = inlined_call_operand.vmem [shape: bf16[2,8,128], index: 5, kind: output, shape index: {}]  }
   0x1   :  { %s636_s20 = smov 0  }
   0x2 LB: > { %s27_s21 = sadd.s32 1, %s591_s19  ;;  %p521_p0 = scmp.ge.s32.totalorder %s595_s20, 1  ;;  %s595_s20 = sphi %s636_s20, %s15_s20   ;;  %s591_s19 = sphi %s634_s19, %s690_s19   ;;  %s587_s18 = sphi %s632_s18, %s689_s18  }
   0x3   : > { %p29_p1 = scmp.ge.s32.totalorder %s27_s21, 2  ;;  %p239_p2 = scmp.lt.s32.totalorder %s595_s20, 3 }
   0x5   : > { %s692_s21 = smov (%p29_p1, %s27_s21), 0  ;;  %p240_p3 = pnand %p521_p0, %p239_p2 }
   0x6   : > { %p288_p4 = scmp.lt.s32.totalorder (!%p240_p3), %s587_s18, 1  ;;  %v597_v0 = vmov (!%p240_p3), 0.0   ;;  %vm598_vm0 = vmmov (!%p240_p3), 0   ;;  %v599_v5 = vmov (!%p240_p3), 0   ;;  %s600_s30 = smov (!%p240_p3), 126   ;;  %v349_v8 = vld [vmem:[%s687_s4] sm:$0xff] (!%p240_p3) }
   0x7   : > { %243 = sbr.rel (%p240_p3) target bundleno = 365 (0x16d), region = 40  ;;  %537 = vmatprep.subr.bf16.mxu0 (!%p240_p3), %v597_v0  ;;  %539 = vmatprep.mubr.msk.bf16.mxu0 (!%p240_p3), %vm598_vm0, %v597_v0  ;;  %s601_s6 = smov (!%p240_p3), 127   ;;  %vm339_vm1 = vcmask (!%p240_p3), 1031168   ;;  %vm331_vm2 = vcmask (!%p240_p3), 1039360   ;;  %vm341_vm3 = vcmask (!%p240_p3), 1041408   ;;  %vm345_vm4 = vcmask (!%p240_p3), 1043456  }
   0x8   : > { %572 = vset.pattern.permute.xlu0 (!%p240_p3), %v599_v5  ;;  %vm359_vm5 = vcmask (!%p240_p3), 1045504   ;;  %v348_v18 = vld [vmem:[%s686_s3] sm:$0xf] (!%p240_p3)  ;;  %vm355_vm6 = vcmask (!%p240_p3), 97280  }
   0xe   : > { %s694_s18 = smov (!%p288_p4, %s587_s18), 1 }
   0xf   : > { %s650_s22 = sshll.u32 %s694_s18, 2 }
  0x10   : > { %s295_s25 = scalar_lea.vmem %s683_s0, %s650_s22  ;;  %s533_s26 = sadd.s32 2, %s650_s22 }
  0x11   : > { %v321_v1 = vld [vmem:[%s295_s25] sm:$0x3]  ;;  %s304_s29 = scalar_lea.vmem %s684_s1, %s533_s26  ;;  %s312_s13 = scalar_lea.vmem %s685_s2, %s650_s22 }
  0x12   : > { %v333_v2 = vrot.slane %v321_v1, 4  ;;  %v325_v3 = vrot.slane %v321_v1, 6  ;;  %v322_v4 = vld [vmem:[%s304_s29] sm:$0x3]  ;;  %s319_s16 = scalar_lea.vmem %s688_s5, %s650_s22 }
  0x13   : > { %v334_v6 = vrot.slane %v322_v4, 4  ;;  %v326_v7 = vrot.slane %v322_v4, 6  ;;  %v402_v19 = vld [vmem:[%s312_s13] sm:$0xf] }
  0x14   : > { %335 = vrot.lane.b32.xlu1 %v333_v2, %s600_s30  ;;  %327 = vrot.lane.b32.xlu0 %v325_v3, %s601_s6  ;;  %v403_v21 = vunpack.c.l.bf16 %v402_v19 }
  0x18   : > { %337 = vrot.lane.b32.xlu1 %v334_v6, %s600_s30  ;;  %329 = vrot.lane.b32.xlu0 %v326_v7, %s601_s6 }
  0x1c   : > { %352 = vperm.xlu0 %572, %v349_v8  }
  0x86   : > { %v336_v9 = vpop.permute.xlu1 %335  ;;  %v328_v10 = vpop.permute.xlu0 %327 }
  0x8a   : > { %v338_v11 = vpop.permute.xlu1 %337  ;;  %v330_v12 = vpop.permute.xlu0 %329 }
  0x8b   : > { %v340_v13 = vsel %vm339_vm1, %v336_v9, %v338_v11  ;;  %v332_v14 = vsel %vm331_vm2, %v328_v10, %v330_v12 }
  0x8c   : > { %v344_v15 = vsel %vm341_vm3, %v321_v1, %v332_v14 }
  0x8d   : > { %v347_v16 = vsel %vm345_vm4, %v344_v15, %v340_v13 }
  0x8e   : > { %v360_v17 = vsel %vm359_vm5, %v347_v16, 0 }
  0x8f   : > { %538 = vmatpush3.bf16.msra.mxu0 %v360_v17 }
  0x92   : > { %540 = vmatmul.mubr.msk.bf16.vlgmr.msra.gmra.mrb[0].mxu0 %vm355_vm6, %v348_v18 }
  0x9b   : > { %v353_v20 = vpop.permute.xlu0 %352 }
 0x165   : > { %v396_v22 = vpop.f32.mrb[0].mxu0 }
 0x166   : > { %v397_v23 = vadd.f32 %v396_v22, %v353_v20  ;;  %v541_v24 = vpop.f32.mrb[1].mxu0 }
 0x167   : > { %v399_v25 = vpop.f32.mrb[2].mxu0 }
 0x168   : > { %v404_v26 = vadd.f32 %v403_v21, %v397_v23  ;;  %v542_v27 = vpop.f32.mrb[3].mxu0 }
 0x16a   : > { %v405_v28 = vpack.c.bf16 %v404_v26, %v404_v26 }
 0x16c   : > { %406 = vst [vmem:[%s319_s16] sm:$0xf] %v405_v28 }
 0x16d PF: > { %s15_s20 = sadd.s32 1, %s595_s20   ;;  %s689_s18 = smov %s591_s19 }
 0x16e   : > { %p12_p5 = scmp.ge.s32.totalorder %s15_s20, 4   ;;  %s690_s19 = smov %s692_s21 }
 0x170   :  { %14 = sbr.rel (!%p12_p5) target bundleno = 2 (0x2), region = 76 }

// kernel: nsf_hifigan_forward.20
= control target key start
LH: loop header
LB: loop body
LE: loop exit
PB: predicated region body
PF: predicated region fallthrough
CT: control target
= control target key end

     0   :  { %s756_s21 = smov 0   ;;  %s758_s22 = smov 0   ;;  %s839_s0 = inlined_call_operand.vmem [shape: bf16[2,8,256], index: 0, kind: input, shape index: {}, may-alias: {0,1}]   ;;  %s840_s1 = inlined_call_operand.vmem [shape: bf16[2,8,256], index: 1, kind: input, shape index: {}, may-alias: {0,1}]   ;;  %s841_s2 = inlined_call_operand.vmem [shape: bf16[8,24], index: 2, kind: input, shape index: {}]   ;;  %s842_s3 = inlined_call_operand.vmem [shape: f32[8,1], index: 3, kind: input, shape index: {}]   ;;  %s843_s4 = inlined_call_operand.vmem [shape: bf16[8,24], index: 4, kind: input, shape index: {}]   ;;  %s844_s5 = inlined_call_operand.vmem [shape: f32[8,1], index: 5, kind: input, shape index: {}]   ;;  %s845_s6 = inlined_call_operand.vmem [shape: bf16[2,8,128], index: 6, kind: output, shape index: {}]  }
   0x1   :  { %s760_s23 = smov 0  }
   0x2 LB: > { %s28_s24 = sadd.s32 1, %s710_s22  ;;  %p621_p0 = scmp.ge.s32.totalorder %s714_s23, 1  ;;  %s714_s23 = sphi %s760_s23, %s16_s23   ;;  %s710_s22 = sphi %s758_s22, %s847_s22   ;;  %s706_s21 = sphi %s756_s21, %s846_s21  }
   0x3   : > { %p30_p1 = scmp.ge.s32.totalorder %s28_s24, 2  ;;  %p250_p2 = scmp.lt.s32.totalorder %s714_s23, 3 }
   0x5   : > { %s849_s24 = smov (%p30_p1, %s28_s24), 0  ;;  %p251_p3 = pnand %p621_p0, %p250_p2 }
   0x6   : > { %p294_p4 = scmp.lt.s32.totalorder (!%p251_p3), %s706_s21, 1  ;;  %s716_s9 = smov (!%p251_p3), 126   ;;  %v717_v7 = vmov (!%p251_p3), 0   ;;  %v357_v9 = vld [vmem:[%s842_s3] sm:$0xff] (!%p251_p3)  ;;  %vm339_vm2 = vcmask (!%p251_p3), 1039360   ;;  %vm347_vm3 = vcmask (!%p251_p3), 1043456   ;;  %v416_v22 = vlaneseq (!%p251_p3) }
   0x7   : > { %254 = sbr.rel (%p251_p3) target bundleno = 718 (0x2ce), region = 44  ;;  %405 = vmatprep.mubr.bf16.mxu0 (!%p251_p3), %v717_v7  ;;  %676 = vset.pattern.permute.xlu0 (!%p251_p3), %v717_v7  ;;  %s718_s10 = smov (!%p251_p3), 127   ;;  %v459_v10 = vld [vmem:[%s844_s5] sm:$0xff] (!%p251_p3)  ;;  %vm345_vm4 = vcmask (!%p251_p3), 1031168   ;;  %vm363_vm5 = vcmask (!%p251_p3), 195584   ;;  %v719_v21 = vmov (!%p251_p3), 0.0  }
   0x8   : > { %v356_v20 = vld [vmem:[%s841_s2] sm:$0xf] (!%p251_p3)  ;;  %639 = vmatprep.subr.bf16.mxu1 (!%p251_p3), %v719_v21  ;;  %v417_v23 = vand.u32 (!%p251_p3), 127, %v416_v22  ;;  %vm720_vm10 = vmmov (!%p251_p3), 0  }
   0x9   : > { %643 = vmatprep.mubr.msk.bf16.mxu1 (!%p251_p3), %vm720_vm10, %v719_v21  ;;  %v456_v49 = vld [vmem:[%s843_s4] sm:$0xf] (!%p251_p3) }
   0xa   : > { %v420_v24 = vadd.s32 (!%p251_p3), 4294967295, %v417_v23 }
   0xc   : > { %vm422_vm6 = vcmp.ge.s32.totalorder (!%p251_p3), %v420_v24, 0  ;;  %vm424_vm7 = vcmp.lt.s32.totalorder (!%p251_p3), %v420_v24, 32 }
   0xd   : > { %vm426_vm8 = vmand (!%p251_p3), %vm422_vm6, %vm424_vm7 }
   0xe   : > { %s851_s21 = smov (!%p294_p4, %s706_s21), 1 }
   0xf   : > { %s632_s25 = sshll.u32 %s851_s21, 3  ;;  %s626_s19 = sshll.u32 %s851_s21, 2 }
  0x10   : > { %s301_s28 = scalar_lea.vmem %s839_s0, %s632_s25  ;;  %s634_s29 = sadd.s32 4, %s632_s25 }
  0x11   : > { %v780_v0 = vld [vmem:[%s301_s28] sm:$0xf]  ;;  %s310_s8 = scalar_lea.vmem %s840_s1, %s634_s29  ;;  %s318_s26 = scalar_lea.vmem %s845_s6, %s626_s19 }
  0x12   : > { %vm325_vm0 = vcmp.ge.bf16.partialorder %v780_v0, 0  ;;  %v327_v1 = vmul.bf16 1036860877, %v780_v0  ;;  %v787_v2 = vld [vmem:[%s310_s8] sm:$0xf]  ;;  %v323_v35 = vunpack.c.l.bf16 %v780_v0 }
  0x13   : > { %vm326_vm1 = vcmp.ge.bf16.partialorder %v787_v2, 0  ;;  %v328_v3 = vmul.bf16 1036860877, %v787_v2  ;;  %v324_v36 = vunpack.c.l.bf16 %v787_v2 }
  0x14   : > { %v329_v4 = vsel %vm325_vm0, %v780_v0, %v327_v1 }
  0x15   : > { %341 = vrot.lane.b32.xlu1 %v329_v4, %s716_s9  ;;  %v333_v5 = vrot.slane %v329_v4, 4  ;;  %v330_v6 = vsel %vm326_vm1, %v787_v2, %v328_v3  ;;  %v687_v37 = vpack.i.bf16 %v324_v36, %v323_v35 }
  0x16   : > { %v334_v8 = vrot.slane %v330_v6, 4 }
  0x17   : > { %335 = vrot.lane.b32.xlu0 %v333_v5, %s718_s10 }
  0x19   : > { %343 = vrot.lane.b32.xlu1 %v330_v6, %s716_s9 }
  0x1b   : > { %337 = vrot.lane.b32.xlu0 %v334_v8, %s718_s10 }
  0x1f   : > { %360 = vperm.xlu0 %676, %v357_v9  }
  0x23   : > { %462 = vperm.xlu0 %676, %v459_v10  }
  0x87   : > { %v342_v11 = vpop.permute.xlu1 %341 }
  0x89   : > { %v336_v12 = vpop.permute.xlu0 %335 }
  0x8b   : > { %v344_v13 = vpop.permute.xlu1 %343 }
  0x8c   : > { %v346_v18 = vsel %vm345_vm4, %v342_v11, %v344_v13 }
  0x8d   : > { %v338_v14 = vpop.permute.xlu0 %337  ;;  %v368_v19 = vsel %vm347_vm3, %v346_v18, 0 }
  0x8e   : > { %v340_v15 = vsel %vm339_vm2, %v336_v12, %v338_v14  ;;  %v354_v16 = vsel %vm347_vm3, %v330_v6, %v338_v14 }
  0x8f   : > { %373 = vmatprep.subr.bf16.mxu0 %v354_v16  ;;  %v350_v17 = vsel %vm347_vm3, %v329_v4, %v340_v15 }
  0x90   : > { %374 = vmatpush1.bf16.msra.mxu0 %v350_v17 }
  0x91   : > { %627 = vmatprep.subr.msk.bf16.mxu0 %vm347_vm3, %v344_v13 }
  0x94   : > { %376 = vmatpush1.bf16.msra.mxu0 %v368_v19 }
  0x97   : > { %628 = vmatmul.mubr.msk.bf16.vlgmr.msra.gmra.mrb[0].mxu0 %vm363_vm5, %v356_v20 }
  0x9e   : > { %v361_v25 = vpop.permute.xlu0 %360 }
  0xa2   : > { %v463_v53 = vpop.permute.xlu0 %462 }
 0x16a   : > { %v407_v26 = vpop.f32.mrb[0].mxu0 }
 0x16b   : > { %v408_v27 = vadd.f32 %v407_v26, %v361_v25  ;;  %v409_v28 = vpop.f32.mrb[1].mxu0 }
 0x16c   : > { %v411_v29 = vpop.f32.mrb[2].mxu0 }
 0x16d   : > { %v432_v30 = vsel %vm426_vm8, %v408_v27, 0.0  ;;  %v412_v31 = vpop.f32.mrb[3].mxu0 }
 0x16e   : > { %vm434_vm9 = vcmp.ge.f32.partialorder %v432_v30, 0.0  ;;  %v436_v32 = vmul.f32 0.1, %v432_v30 }
 0x170   : > { %v438_v33 = vsel %vm434_vm9, %v432_v30, %v436_v32 }
 0x171   : > { %v677_v34 = vpack.i.bf16 %v719_v21, %v438_v33 }
 0x173   : > { %678 = vrot.lane.b32.xlu1 %v677_v34, %s718_s10 }
 0x177   : > { %683 = vrot.lane.b32.xlu1 %v677_v34, %s716_s9 }
 0x17b   : > { %688 = vrot.lane.b32.xlu1 %v687_v37, %s716_s9 }
 0x1e5   : > { %v679_v38 = vpop.permute.xlu1 %678 }
 0x1e6   : > { %v681_v39 = vunpack.i.h.bf16 %v679_v38  ;;  %v680_v40 = vunpack.i.l.bf16 %v679_v38 }
 0x1e8   : > { %v447_v41 = vsel %vm339_vm2, %v680_v40, %v681_v39 }
 0x1e9   : > { %v684_v42 = vpop.permute.xlu1 %683  ;;  %v457_v43 = vpack.c.bf16 %v447_v41, %v438_v33 }
 0x1ea   : > { %v686_v44 = vunpack.i.h.bf16 %v684_v42  ;;  %v685_v45 = vunpack.i.l.bf16 %v684_v42 }
 0x1eb   : > { %640 = vmatpush3.bf16.msra.mxu1 %v457_v43 }
 0x1ec   : > { %641 = vmatprep.subr.bf16.mxu1 %v719_v21  ;;  %v454_v46 = vsel %vm345_vm4, %v685_v45, %v686_v44 }
 0x1ed   : > { %v458_v47 = vpack.c.bf16 %v454_v46, %v454_v46  ;;  %v689_v50 = vpop.permute.xlu1 %688 }
 0x1ee   : > { %v691_v51 = vunpack.i.h.bf16 %v689_v50  ;;  %v690_v52 = vunpack.i.l.bf16 %v689_v50 }
 0x1ef   : > { %v469_v48 = vsel %vm347_vm3, %v458_v47, 0 }
 0x1f0   : > { %642 = vmatpush3.bf16.msra.mxu1 %v469_v48  ;;  %v517_v55 = vsel %vm345_vm4, %v690_v52, %v691_v51 }
 0x1f3   : > { %644 = vmatmul.mubr.msk.bf16.vlgmr.msra.gmra.mrb[0].mxu1 %vm363_vm5, %v456_v49 }
 0x2c6   : > { %v505_v54 = vpop.f32.mrb[0].mxu1 }
 0x2c7   : > { %v506_v56 = vadd.f32 %v505_v54, %v463_v53  ;;  %v645_v57 = vpop.f32.mrb[1].mxu1 }
 0x2c8   : > { %v508_v58 = vpop.f32.mrb[2].mxu1 }
 0x2c9   : > { %v519_v59 = vadd.f32 %v517_v55, %v506_v56  ;;  %v646_v60 = vpop.f32.mrb[3].mxu1 }
 0x2cb   : > { %v520_v61 = vpack.c.bf16 %v519_v59, %v519_v59 }
 0x2cd   : > { %521 = vst [vmem:[%s318_s26] sm:$0xf] %v520_v61 }
 0x2ce PF: > { %s16_s23 = sadd.s32 1, %s714_s23   ;;  %s846_s21 = smov %s710_s22 }
 0x2cf   : > { %p13_p5 = scmp.ge.s32.totalorder %s16_s23, 4   ;;  %s847_s22 = smov %s849_s24 }
 0x2d1   :  { %15 = sbr.rel (!%p13_p5) target bundleno = 2 (0x2), region = 77 }

// kernel: nsf_hifigan_forward.21
= control target key start
LH: loop header
LB: loop body
LE: loop exit
PB: predicated region body
PF: predicated region fallthrough
CT: control target
= control target key end

     0   :  { %s763_s21 = smov 0   ;;  %s765_s22 = smov 0   ;;  %s834_s0 = inlined_call_operand.vmem [shape: bf16[2,8,256], index: 0, kind: input, shape index: {}, may-alias: {0,1}]   ;;  %s835_s1 = inlined_call_operand.vmem [shape: bf16[2,8,256], index: 1, kind: input, shape index: {}, may-alias: {0,1}]   ;;  %s836_s2 = inlined_call_operand.vmem [shape: bf16[8,24], index: 2, kind: input, shape index: {}]   ;;  %s837_s3 = inlined_call_operand.vmem [shape: f32[8,1], index: 3, kind: input, shape index: {}]   ;;  %s838_s4 = inlined_call_operand.vmem [shape: bf16[8,24], index: 4, kind: input, shape index: {}]   ;;  %s839_s5 = inlined_call_operand.vmem [shape: f32[8,1], index: 5, kind: input, shape index: {}]   ;;  %s840_s6 = inlined_call_operand.vmem [shape: bf16[2,8,128], index: 6, kind: output, shape index: {}]  }
   0x1   :  { %s767_s23 = smov 0  }
   0x2 LB: > { %s28_s24 = sadd.s32 1, %s714_s22  ;;  %p622_p0 = scmp.ge.s32.totalorder %s718_s23, 1  ;;  %s718_s23 = sphi %s767_s23, %s16_s23   ;;  %s714_s22 = sphi %s765_s22, %s842_s22   ;;  %s710_s21 = sphi %s763_s21, %s841_s21  }
   0x3   : > { %p30_p1 = scmp.ge.s32.totalorder %s28_s24, 2  ;;  %p250_p2 = scmp.lt.s32.totalorder %s718_s23, 3 }
   0x5   : > { %s844_s24 = smov (%p30_p1, %s28_s24), 0  ;;  %p251_p3 = pnand %p622_p0, %p250_p2 }
   0x6   : > { %p294_p4 = scmp.lt.s32.totalorder (!%p251_p3), %s710_s21, 1  ;;  %s720_s9 = smov (!%p251_p3), 122   ;;  %v721_v7 = vmov (!%p251_p3), 0   ;;  %v357_v9 = vld [vmem:[%s837_s3] sm:$0xff] (!%p251_p3)  ;;  %vm339_vm2 = vcmask (!%p251_p3), 1022976   ;;  %vm347_vm3 = vcmask (!%p251_p3), 1043456   ;;  %v416_v22 = vlaneseq (!%p251_p3) }
   0x7   : > { %254 = sbr.rel (%p251_p3) target bundleno = 718 (0x2ce), region = 44  ;;  %405 = vmatprep.mubr.bf16.mxu0 (!%p251_p3), %v721_v7  ;;  %680 = vset.pattern.permute.xlu0 (!%p251_p3), %v721_v7  ;;  %s722_s10 = smov (!%p251_p3), 125   ;;  %v459_v10 = vld [vmem:[%s839_s5] sm:$0xff] (!%p251_p3)  ;;  %vm345_vm4 = vcmask (!%p251_p3), 998400   ;;  %vm363_vm5 = vcmask (!%p251_p3), 195584   ;;  %v723_v21 = vmov (!%p251_p3), 0.0  }
   0x8   : > { %v356_v20 = vld [vmem:[%s836_s2] sm:$0xf] (!%p251_p3)  ;;  %640 = vmatprep.subr.bf16.mxu1 (!%p251_p3), %v723_v21  ;;  %v417_v23 = vand.u32 (!%p251_p3), 127, %v416_v22  ;;  %vm724_vm10 = vmmov (!%p251_p3), 0   ;;  %s725_s17 = smov (!%p251_p3), 127   ;;  %s726_s18 = smov (!%p251_p3), 126  }
   0x9   : > { %644 = vmatprep.mubr.msk.bf16.mxu1 (!%p251_p3), %vm724_vm10, %v723_v21  ;;  %s727_s19 = smov (!%p251_p3), 124   ;;  %vm446_vm11 = vcmask (!%p251_p3), 1039360   ;;  %vm453_vm12 = vcmask (!%p251_p3), 1031168   ;;  %v456_v49 = vld [vmem:[%s838_s4] sm:$0xf] (!%p251_p3)  ;;  %vm517_vm13 = vcmask (!%p251_p3), 1014784  }
   0xa   : > { %v420_v24 = vadd.s32 (!%p251_p3), 4294967295, %v417_v23 }
   0xc   : > { %vm422_vm6 = vcmp.ge.s32.totalorder (!%p251_p3), %v420_v24, 0  ;;  %vm424_vm7 = vcmp.lt.s32.totalorder (!%p251_p3), %v420_v24, 32 }
   0xd   : > { %vm426_vm8 = vmand (!%p251_p3), %vm422_vm6, %vm424_vm7 }
   0xe   : > { %s846_s21 = smov (!%p294_p4, %s710_s21), 1 }
   0xf   : > { %s633_s25 = sshll.u32 %s846_s21, 3  ;;  %s627_s26 = sshll.u32 %s846_s21, 2 }
  0x10   : > { %s301_s28 = scalar_lea.vmem %s834_s0, %s633_s25  ;;  %s635_s29 = sadd.s32 4, %s633_s25 }
  0x11   : > { %v787_v0 = vld [vmem:[%s301_s28] sm:$0xf]  ;;  %s310_s8 = scalar_lea.vmem %s835_s1, %s635_s29  ;;  %s318_s29 = scalar_lea.vmem %s840_s6, %s627_s26 }
  0x12   : > { %vm325_vm0 = vcmp.ge.bf16.partialorder %v787_v0, 0  ;;  %v327_v1 = vmul.bf16 1036860877, %v787_v0  ;;  %v794_v2 = vld [vmem:[%s310_s8] sm:$0xf]  ;;  %v323_v35 = vunpack.c.l.bf16 %v787_v0 }
  0x13   : > { %vm326_vm1 = vcmp.ge.bf16.partialorder %v794_v2, 0  ;;  %v328_v3 = vmul.bf16 1036860877, %v794_v2  ;;  %v324_v36 = vunpack.c.l.bf16 %v794_v2 }
  0x14   : > { %v329_v4 = vsel %vm325_vm0, %v787_v0, %v327_v1 }
  0x15   : > { %341 = vrot.lane.b32.xlu1 %v329_v4, %s720_s9  ;;  %v333_v5 = vrot.slane %v329_v4, 4  ;;  %v330_v6 = vsel %vm326_vm1, %v794_v2, %v328_v3  ;;  %v691_v37 = vpack.i.bf16 %v324_v36, %v323_v35 }
  0x16   : > { %v334_v8 = vrot.slane %v330_v6, 4 }
  0x17   : > { %335 = vrot.lane.b32.xlu0 %v333_v5, %s722_s10 }
  0x19   : > { %343 = vrot.lane.b32.xlu1 %v330_v6, %s720_s9 }
  0x1b   : > { %337 = vrot.lane.b32.xlu0 %v334_v8, %s722_s10 }
  0x1f   : > { %360 = vperm.xlu0 %680, %v357_v9  }
  0x23   : > { %462 = vperm.xlu0 %680, %v459_v10  }
  0x87   : > { %v342_v11 = vpop.permute.xlu1 %341 }
  0x89   : > { %v336_v12 = vpop.permute.xlu0 %335 }
  0x8b   : > { %v344_v13 = vpop.permute.xlu1 %343 }
  0x8c   : > { %v346_v18 = vsel %vm345_vm4, %v342_v11, %v344_v13 }
  0x8d   : > { %v338_v14 = vpop.permute.xlu0 %337  ;;  %v368_v19 = vsel %vm347_vm3, %v346_v18, 0 }
  0x8e   : > { %v340_v15 = vsel %vm339_vm2, %v336_v12, %v338_v14  ;;  %v354_v16 = vsel %vm347_vm3, %v330_v6, %v338_v14 }
  0x8f   : > { %373 = vmatprep.subr.bf16.mxu0 %v354_v16  ;;  %v350_v17 = vsel %vm347_vm3, %v329_v4, %v340_v15 }
  0x90   : > { %374 = vmatpush1.bf16.msra.mxu0 %v350_v17 }
  0x91   : > { %628 = vmatprep.subr.msk.bf16.mxu0 %vm347_vm3, %v344_v13 }
  0x94   : > { %376 = vmatpush1.bf16.msra.mxu0 %v368_v19 }
  0x97   : > { %629 = vmatmul.mubr.msk.bf16.vlgmr.msra.gmra.mrb[0].mxu0 %vm363_vm5, %v356_v20 }
  0x9e   : > { %v361_v25 = vpop.permute.xlu0 %360 }
  0xa2   : > { %v463_v53 = vpop.permute.xlu0 %462 }
 0x16a   : > { %v407_v26 = vpop.f32.mrb[0].mxu0 }
 0x16b   : > { %v408_v27 = vadd.f32 %v407_v26, %v361_v25  ;;  %v409_v28 = vpop.f32.mrb[1].mxu0 }
 0x16c   : > { %v411_v29 = vpop.f32.mrb[2].mxu0 }
 0x16d   : > { %v432_v30 = vsel %vm426_vm8, %v408_v27, 0.0  ;;  %v412_v31 = vpop.f32.mrb[3].mxu0 }
 0x16e   : > { %vm434_vm9 = vcmp.ge.f32.partialorder %v432_v30, 0.0  ;;  %v436_v32 = vmul.f32 0.1, %v432_v30 }
 0x170   : > { %v438_v33 = vsel %vm434_vm9, %v432_v30, %v436_v32 }
 0x171   : > { %v681_v34 = vpack.i.bf16 %v723_v21, %v438_v33 }
 0x173   : > { %682 = vrot.lane.b32.xlu1 %v681_v34, %s725_s17 }
 0x177   : > { %687 = vrot.lane.b32.xlu1 %v681_v34, %s726_s18 }
 0x17b   : > { %692 = vrot.lane.b32.xlu1 %v691_v37, %s727_s19 }
 0x1e5   : > { %v683_v38 = vpop.permute.xlu1 %682 }
 0x1e6   : > { %v685_v39 = vunpack.i.h.bf16 %v683_v38  ;;  %v684_v40 = vunpack.i.l.bf16 %v683_v38 }
 0x1e8   : > { %v447_v41 = vsel %vm446_vm11, %v684_v40, %v685_v39 }
 0x1e9   : > { %v688_v42 = vpop.permute.xlu1 %687  ;;  %v457_v43 = vpack.c.bf16 %v447_v41, %v438_v33 }
 0x1ea   : > { %v690_v44 = vunpack.i.h.bf16 %v688_v42  ;;  %v689_v45 = vunpack.i.l.bf16 %v688_v42 }
 0x1eb   : > { %641 = vmatpush3.bf16.msra.mxu1 %v457_v43 }
 0x1ec   : > { %642 = vmatprep.subr.bf16.mxu1 %v723_v21  ;;  %v454_v46 = vsel %vm453_vm12, %v689_v45, %v690_v44 }
 0x1ed   : > { %v458_v47 = vpack.c.bf16 %v454_v46, %v454_v46  ;;  %v693_v50 = vpop.permute.xlu1 %692 }
 0x1ee   : > { %v695_v51 = vunpack.i.h.bf16 %v693_v50  ;;  %v694_v52 = vunpack.i.l.bf16 %v693_v50 }
 0x1ef   : > { %v469_v48 = vsel %vm347_vm3, %v458_v47, 0 }
 0x1f0   : > { %643 = vmatpush3.bf16.msra.mxu1 %v469_v48  ;;  %v518_v55 = vsel %vm517_vm13, %v694_v52, %v695_v51 }
 0x1f3   : > { %645 = vmatmul.mubr.msk.bf16.vlgmr.msra.gmra.mrb[0].mxu1 %vm363_vm5, %v456_v49 }
 0x2c6   : > { %v505_v54 = vpop.f32.mrb[0].mxu1 }
 0x2c7   : > { %v506_v56 = vadd.f32 %v505_v54, %v463_v53  ;;  %v646_v57 = vpop.f32.mrb[1].mxu1 }
 0x2c8   : > { %v508_v58 = vpop.f32.mrb[2].mxu1 }
 0x2c9   : > { %v520_v59 = vadd.f32 %v518_v55, %v506_v56  ;;  %v647_v60 = vpop.f32.mrb[3].mxu1 }
 0x2cb   : > { %v521_v61 = vpack.c.bf16 %v520_v59, %v520_v59 }
 0x2cd   : > { %522 = vst [vmem:[%s318_s29] sm:$0xf] %v521_v61 }
 0x2ce PF: > { %s16_s23 = sadd.s32 1, %s718_s23   ;;  %s841_s21 = smov %s714_s22 }
 0x2cf   : > { %p13_p5 = scmp.ge.s32.totalorder %s16_s23, 4   ;;  %s842_s22 = smov %s844_s24 }
 0x2d1   :  { %15 = sbr.rel (!%p13_p5) target bundleno = 2 (0x2), region = 77 }

// kernel: nsf_hifigan_forward.19
= control target key start
LH: loop header
LB: loop body
LE: loop exit
PB: predicated region body
PF: predicated region fallthrough
CT: control target
= control target key end

     0   :  { %s808_s21 = smov 0   ;;  %s810_s22 = smov 0   ;;  %s903_s0 = inlined_call_operand.vmem [shape: bf16[2,8,256], index: 0, kind: input, shape index: {}, may-alias: {0,1}]   ;;  %s904_s1 = inlined_call_operand.vmem [shape: bf16[2,8,256], index: 1, kind: input, shape index: {}, may-alias: {0,1}]   ;;  %s905_s2 = inlined_call_operand.vmem [shape: bf16[8,40], index: 2, kind: input, shape index: {}]   ;;  %s906_s3 = inlined_call_operand.vmem [shape: f32[8,1], index: 3, kind: input, shape index: {}]   ;;  %s907_s4 = inlined_call_operand.vmem [shape: bf16[8,40], index: 4, kind: input, shape index: {}]   ;;  %s908_s5 = inlined_call_operand.vmem [shape: f32[8,1], index: 5, kind: input, shape index: {}]   ;;  %s909_s6 = inlined_call_operand.vmem [shape: bf16[2,8,128], index: 6, kind: output, shape index: {}]  }
   0x1   :  { %s812_s23 = smov 0  }
   0x2 LB: > { %s28_s24 = sadd.s32 1, %s760_s22  ;;  %p656_p0 = scmp.ge.s32.totalorder %s764_s23, 1  ;;  %s764_s23 = sphi %s812_s23, %s16_s23   ;;  %s760_s22 = sphi %s810_s22, %s911_s22   ;;  %s756_s21 = sphi %s808_s21, %s910_s21  }
   0x3   : > { %p30_p1 = scmp.ge.s32.totalorder %s28_s24, 2  ;;  %p250_p2 = scmp.lt.s32.totalorder %s764_s23, 3 }
   0x5   : > { %s913_s24 = smov (%p30_p1, %s28_s24), 0  ;;  %p251_p3 = pnand %p656_p0, %p250_p2 }
   0x6   : > { %p294_p4 = scmp.lt.s32.totalorder (!%p251_p3), %s756_s21, 1  ;;  %s766_s9 = smov (!%p251_p3), 126   ;;  %v768_v8 = vmov (!%p251_p3), 0   ;;  %v377_v9 = vld [vmem:[%s906_s3] sm:$0xff] (!%p251_p3)  ;;  %vm339_vm2 = vcmask (!%p251_p3), 1039360   ;;  %vm359_vm3 = vcmask (!%p251_p3), 1043456   ;;  %v436_v29 = vlaneseq (!%p251_p3) }
   0x7   : > { %254 = sbr.rel (%p251_p3) target bundleno = 726 (0x2d6), region = 44  ;;  %s767_s10 = smov (!%p251_p3), 127   ;;  %425 = vmatprep.mubr.bf16.mxu0 (!%p251_p3), %v768_v8  ;;  %716 = vset.pattern.permute.xlu0 (!%p251_p3), %v768_v8  ;;  %vm345_vm4 = vcmask (!%p251_p3), 1031168   ;;  %vm351_vm5 = vcmask (!%p251_p3), 1022976   ;;  %vm357_vm6 = vcmask (!%p251_p3), 1014784   ;;  %vm383_vm7 = vcmask (!%p251_p3), 326656  }
   0x8   : > { %s769_s11 = smov (!%p251_p3), 125   ;;  %s770_s12 = smov (!%p251_p3), 124   ;;  %v376_v27 = vld [vmem:[%s905_s2] sm:$0xf] (!%p251_p3)  ;;  %v771_v28 = vmov (!%p251_p3), 0.0   ;;  %v437_v30 = vand.u32 (!%p251_p3), 127, %v436_v29 }
   0x9   : > { %675 = vmatprep.subr.bf16.mxu1 (!%p251_p3), %v771_v28  ;;  %v494_v42 = vld [vmem:[%s908_s5] sm:$0xff] (!%p251_p3)  ;;  %vm772_vm12 = vmmov (!%p251_p3), 0  }
   0xa   : > { %v440_v31 = vadd.s32 (!%p251_p3), 4294967294, %v437_v30  ;;  %681 = vmatprep.mubr.msk.bf16.mxu1 (!%p251_p3), %vm772_vm12, %v771_v28 }
   0xc   : > { %vm442_vm8 = vcmp.ge.s32.totalorder (!%p251_p3), %v440_v31, 0  ;;  %vm444_vm9 = vcmp.lt.s32.totalorder (!%p251_p3), %v440_v31, 32 }
   0xd   : > { %vm446_vm10 = vmand (!%p251_p3), %vm442_vm8, %vm444_vm9 }
   0xe   : > { %s915_s21 = smov (!%p294_p4, %s756_s21), 1 }
   0xf   : > { %s667_s25 = sshll.u32 %s915_s21, 3 }
  0x10   : > { %s301_s28 = scalar_lea.vmem %s903_s0, %s667_s25  ;;  %s669_s29 = sadd.s32 4, %s667_s25 }
  0x11   : > { %v832_v0 = vld [vmem:[%s301_s28] sm:$0xf]  ;;  %s310_s8 = scalar_lea.vmem %s904_s1, %s669_s29  ;;  %s661_s25 = sshll.u32 %s915_s21, 2 }
  0x12   : > { %vm325_vm0 = vcmp.ge.bf16.partialorder %v832_v0, 0  ;;  %v327_v1 = vmul.bf16 1036860877, %v832_v0  ;;  %v839_v2 = vld [vmem:[%s310_s8] sm:$0xf]  ;;  %v323_v43 = vunpack.c.l.bf16 %v832_v0  ;;  %s318_s28 = scalar_lea.vmem %s909_s6, %s661_s25 }
  0x13   : > { %vm326_vm1 = vcmp.ge.bf16.partialorder %v839_v2, 0  ;;  %v328_v3 = vmul.bf16 1036860877, %v839_v2  ;;  %v324_v44 = vunpack.c.l.bf16 %v839_v2 }
  0x14   : > { %v329_v4 = vsel %vm325_vm0, %v832_v0, %v327_v1 }
  0x15   : > { %341 = vrot.lane.b32.xlu1 %v329_v4, %s766_s9  ;;  %v333_v5 = vrot.slane %v329_v4, 4  ;;  %v330_v6 = vsel %vm326_vm1, %v839_v2, %v328_v3  ;;  %v737_v45 = vpack.i.bf16 %v324_v44, %v323_v43  ;;  %v490_v2 = vld [vmem:[%s907_s4] sm:$0xf] }
  0x16   : > { %v334_v7 = vrot.slane %v330_v6, 4 }
  0x17   : > { %335 = vrot.lane.b32.xlu0 %v333_v5, %s767_s10 }
  0x19   : > { %343 = vrot.lane.b32.xlu1 %v330_v6, %s766_s9 }
  0x1b   : > { %337 = vrot.lane.b32.xlu0 %v334_v7, %s767_s10 }
  0x1d   : > { %349 = vrot.lane.b32.xlu1 %v334_v7, %s769_s11 }
  0x1f   : > { %347 = vrot.lane.b32.xlu0 %v333_v5, %s769_s11 }
  0x21   : > { %355 = vrot.lane.b32.xlu1 %v330_v6, %s770_s12 }
  0x23   : > { %353 = vrot.lane.b32.xlu0 %v329_v4, %s770_s12 }
  0x27   : > { %380 = vperm.xlu0 %716, %v377_v9  }
  0x87   : > { %v342_v10 = vpop.permute.xlu1 %341 }
  0x89   : > { %v336_v11 = vpop.permute.xlu0 %335 }
  0x8b   : > { %v344_v12 = vpop.permute.xlu1 %343 }
  0x8c   : > { %v346_v20 = vsel %vm345_vm4, %v342_v10, %v344_v12 }
  0x8d   : > { %v338_v13 = vpop.permute.xlu0 %337 }
  0x8e   : > { %v340_v14 = vsel %vm339_vm2, %v336_v11, %v338_v13  ;;  %v366_v15 = vsel %vm359_vm3, %v330_v6, %v338_v13 }
  0x8f   : > { %v350_v16 = vpop.permute.xlu1 %349  ;;  %393 = vmatprep.subr.bf16.mxu0 %v366_v15  ;;  %v362_v17 = vsel %vm359_vm3, %v329_v4, %v340_v14 }
  0x90   : > { %394 = vmatpush1.bf16.msra.mxu0 %v362_v17  ;;  %v374_v18 = vsel %vm359_vm3, %v344_v12, %v350_v16 }
  0x91   : > { %395 = vmatprep.subr.bf16.mxu0 %v374_v18  ;;  %v348_v19 = vpop.permute.xlu0 %347 }
  0x92   : > { %v352_v21 = vsel %vm351_vm5, %v348_v19, %v350_v16 }
  0x93   : > { %v370_v22 = vsel %vm359_vm3, %v346_v20, %v352_v21  ;;  %v356_v23 = vpop.permute.xlu1 %355 }
  0x94   : > { %396 = vmatpush1.bf16.msra.mxu0 %v370_v22 }
  0x95   : > { %v354_v24 = vpop.permute.xlu0 %353  ;;  %662 = vmatprep.subr.msk.bf16.mxu0 %vm359_vm3, %v356_v23 }
  0x96   : > { %v358_v25 = vsel %vm357_vm6, %v354_v24, %v356_v23 }
  0x97   : > { %v388_v26 = vsel %vm359_vm3, %v358_v25, 0 }
  0x98   : > { %398 = vmatpush1.bf16.msra.mxu0 %v388_v26 }
  0x9b   : > { %663 = vmatmul.mubr.msk.bf16.vlgmr.msra.gmra.mrb[0].mxu0 %vm383_vm7, %v376_v27 }
  0xa6   : > { %v381_v32 = vpop.permute.xlu0 %380 }
 0x16e   : > { %v427_v33 = vpop.f32.mrb[0].mxu0 }
 0x16f   : > { %v428_v34 = vadd.f32 %v427_v33, %v381_v32  ;;  %v429_v35 = vpop.f32.mrb[1].mxu0 }
 0x170   : > { %v431_v36 = vpop.f32.mrb[2].mxu0 }
 0x171   : > { %v452_v37 = vsel %vm446_vm10, %v428_v34, 0.0  ;;  %v432_v38 = vpop.f32.mrb[3].mxu0 }
 0x172   : > { %vm454_vm11 = vcmp.ge.f32.partialorder %v452_v37, 0.0  ;;  %v456_v39 = vmul.f32 0.1, %v452_v37 }
 0x174   : > { %v458_v40 = vsel %vm454_vm11, %v452_v37, %v456_v39 }
 0x175   : > { %v727_v41 = vpack.i.bf16 %v771_v28, %v458_v40 }
 0x177   : > { %728 = vrot.lane.b32.xlu0 %v727_v41, %s769_s11  ;;  %718 = vrot.lane.b32.xlu1 %v727_v41, %s767_s10 }
 0x17b   : > { %497 = vperm.xlu0 %716, %v494_v42   ;;  %723 = vrot.lane.b32.xlu1 %v727_v41, %s766_s9 }
 0x17f   : > { %733 = vrot.lane.b32.xlu1 %v727_v41, %s770_s12 }
 0x183   : > { %738 = vrot.lane.b32.xlu1 %v737_v45, %s770_s12 }
 0x1e9   : > { %v729_v46 = vpop.permute.xlu0 %728  ;;  %v719_v47 = vpop.permute.xlu1 %718 }
 0x1ea   : > { %v721_v48 = vunpack.i.h.bf16 %v719_v47  ;;  %v720_v49 = vunpack.i.l.bf16 %v719_v47  ;;  %v731_v50 = vunpack.i.h.bf16 %v729_v46  ;;  %v730_v51 = vunpack.i.l.bf16 %v729_v46 }
 0x1ec   : > { %v467_v52 = vsel %vm339_vm2, %v720_v49, %v721_v48  ;;  %v481_v58 = vsel %vm351_vm5, %v730_v51, %v731_v50 }
 0x1ed   : > { %v724_v53 = vpop.permute.xlu1 %723  ;;  %v491_v54 = vpack.c.bf16 %v467_v52, %v458_v40 }
 0x1ee   : > { %v726_v55 = vunpack.i.h.bf16 %v724_v53  ;;  %v725_v56 = vunpack.i.l.bf16 %v724_v53 }
 0x1ef   : > { %676 = vmatpush3.bf16.msra.mxu1 %v491_v54 }
 0x1f0   : > { %677 = vmatprep.subr.bf16.mxu1 %v771_v28  ;;  %v474_v57 = vsel %vm345_vm4, %v725_v56, %v726_v55 }
 0x1f1   : > { %v734_v59 = vpop.permute.xlu1 %733  ;;  %v492_v60 = vpack.c.bf16 %v481_v58, %v474_v57 }
 0x1f2   : > { %v736_v61 = vunpack.i.h.bf16 %v734_v59  ;;  %v735_v62 = vunpack.i.l.bf16 %v734_v59 }
 0x1f3   : > { %678 = vmatpush3.bf16.msra.mxu1 %v492_v60 }
 0x1f4   : > { %679 = vmatprep.subr.bf16.mxu1 %v771_v28  ;;  %v488_v63 = vsel %vm357_vm6, %v735_v62, %v736_v61 }
 0x1f5   : > { %v493_v0 = vpack.c.bf16 %v488_v63, %v488_v63  ;;  %v739_v3 = vpop.permute.xlu1 %738 }
 0x1f6   : > { %v741_v4 = vunpack.i.h.bf16 %v739_v3  ;;  %v740_v5 = vunpack.i.l.bf16 %v739_v3 }
 0x1f7   : > { %v504_v1 = vsel %vm359_vm3, %v493_v0, 0 }
 0x1f8   : > { %680 = vmatpush3.bf16.msra.mxu1 %v504_v1  ;;  %v552_v8 = vsel %vm357_vm6, %v740_v5, %v741_v4 }
 0x1fa   : > { %v498_v6 = vpop.permute.xlu0 %497 }
 0x1fb   : > { %682 = vmatmul.mubr.msk.bf16.vlgmr.msra.gmra.mrb[0].mxu1 %vm383_vm7, %v490_v2 }
 0x2ce   : > { %v540_v7 = vpop.f32.mrb[0].mxu1 }
 0x2cf   : > { %v541_v9 = vadd.f32 %v540_v7, %v498_v6  ;;  %v683_v10 = vpop.f32.mrb[1].mxu1 }
 0x2d0   : > { %v543_v11 = vpop.f32.mrb[2].mxu1 }
 0x2d1   : > { %v554_v12 = vadd.f32 %v552_v8, %v541_v9  ;;  %v684_v13 = vpop.f32.mrb[3].mxu1 }
 0x2d3   : > { %v555_v14 = vpack.c.bf16 %v554_v12, %v554_v12 }
 0x2d5   : > { %556 = vst [vmem:[%s318_s28] sm:$0xf] %v555_v14 }
 0x2d6 PF: > { %s16_s23 = sadd.s32 1, %s764_s23   ;;  %s910_s21 = smov %s760_s22 }
 0x2d7   : > { %p13_p5 = scmp.ge.s32.totalorder %s16_s23, 4   ;;  %s911_s22 = smov %s913_s24 }
 0x2d9   :  { %15 = sbr.rel (!%p13_p5) target bundleno = 2 (0x2), region = 77 }

// kernel: tile.18
= control target key start
LH: loop header
LB: loop body
LE: loop exit
PB: predicated region body
PF: predicated region fallthrough
CT: control target
= control target key end

     0   :  { %s22_s0 = inlined_call_operand.vmem [shape: f32[4], index: 0, kind: input, shape index: {}]   ;;  %s23_s1 = inlined_call_operand.vmem [shape: f32[4,4], index: 1, kind: output, shape index: {}]  }
   0x1   :  { %v4_v0 = vld [vmem:[%s22_s0] ss:$0 sm:$0xff] }
   0x2   :  { %5 = vst [vmem:[%s23_s1] sm:$0xf] %v4_v0 }

// kernel: tile.1
= control target key start
LH: loop header
LB: loop body
LE: loop exit
PB: predicated region body
PF: predicated region fallthrough
CT: control target
= control target key end

     0   :  { %s34_s8 = smov 125   ;;  %vm7_vm0 = vcmask 7168   ;;  %s35_s11 = smov 126   ;;  %s61_s0 = inlined_call_operand.vmem [shape: f32[4,4], index: 0, kind: input, shape index: {}]   ;;  %s62_s1 = inlined_call_operand.vmem [shape: f32[16,1], index: 1, kind: output, shape index: {}]  }
   0x1   :  { %v4_v0 = vld [vmem:[%s61_s0] sm:$0xf]  ;;  %s33_s0 = smov 127  }
   0x2   :  { %5 = vst [vmem:[#allocation0] sm:$0xf] %v4_v0 }
   0x9   :  { %v9_v1 = vld [vmem:[#allocation0] sm:$0xf]  }
   0xa   :  { %v21_v2 = vld [vmem:[#allocation0] sm:$0xf]   ;;  %10 = vrot.lane.b32.xlu0 %v9_v1, %s33_s0 }
   0xb   :  { %22 = vrot.lane.b32.xlu1 %v21_v2, %s34_s8  ;;  %v6_v3 = vld [vmem:[#allocation0] sm:$0xf]  }
   0xc   :  { %v15_v4 = vld [vmem:[#allocation0] sm:$0xf]   ;;  %8 = vst.msk [vmem:[%s62_s1] ss:$4 sm:$0xf] %vm7_vm0, %v6_v3  }
   0xe   :  { %16 = vrot.lane.b32.xlu0 %v15_v4, %s35_s11 }
  0x7c   :  { %v11_v5 = vpop.permute.xlu0 %10  }
  0x7d   :  { %v23_v6 = vpop.permute.xlu1 %22   ;;  %27 = vst.msk [vmem:[%s62_s1 + $0x1] ss:$4 sm:$0xf] %vm7_vm0, %v11_v5  }
  0x7e   :  { %29 = vst.msk [vmem:[%s62_s1 + $0x3] ss:$4 sm:$0xf] %vm7_vm0, %v23_v6  }
  0x80   :  { %v17_v7 = vpop.permute.xlu0 %16  }
  0x81   :  { %28 = vst.msk [vmem:[%s62_s1 + $0x2] ss:$4 sm:$0xf] %vm7_vm0, %v17_v7  }

// kernel: nsf_hifigan_forward.22
= control target key start
LH: loop header
LB: loop body
LE: loop exit
PB: predicated region body
PF: predicated region fallthrough
CT: control target
= control target key end

     0   :  { %s897_s24 = smov 0   ;;  %s899_s25 = smov 0   ;;  %s978_s0 = inlined_call_operand.vmem [shape: bf16[2,8,256], index: 0, kind: input, shape index: {}, may-alias: {0,1}]   ;;  %s979_s1 = inlined_call_operand.vmem [shape: bf16[2,8,256], index: 1, kind: input, shape index: {}, may-alias: {0,1}]   ;;  %s980_s2 = inlined_call_operand.vmem [shape: bf16[2,8,128], index: 2, kind: input, shape index: {}]   ;;  %s981_s3 = inlined_call_operand.vmem [shape: bf16[8,40], index: 3, kind: input, shape index: {}]   ;;  %s982_s4 = inlined_call_operand.vmem [shape: f32[8,1], index: 4, kind: input, shape index: {}]   ;;  %s983_s5 = inlined_call_operand.vmem [shape: bf16[8,40], index: 5, kind: input, shape index: {}]   ;;  %s984_s6 = inlined_call_operand.vmem [shape: f32[8,1], index: 6, kind: input, shape index: {}]   ;;  %s985_s7 = inlined_call_operand.vmem [shape: bf16[2,8,128], index: 7, kind: output, shape index: {}]  }
   0x1   :  { %s901_s26 = smov 0  }
   0x2 LB: > { %s29_s27 = sadd.s32 1, %s840_s25  ;;  %p731_p0 = scmp.ge.s32.totalorder %s844_s26, 1  ;;  %s844_s26 = sphi %s901_s26, %s17_s26   ;;  %s840_s25 = sphi %s899_s25, %s987_s25   ;;  %s836_s24 = sphi %s897_s24, %s986_s24  }
   0x3   : > { %p31_p1 = scmp.ge.s32.totalorder %s29_s27, 2  ;;  %p289_p2 = scmp.lt.s32.totalorder %s844_s26, 3 }
   0x5   : > { %s989_s27 = smov (%p31_p1, %s29_s27), 0  ;;  %p290_p3 = pnand %p731_p0, %p289_p2 }
   0x6   : > { %p342_p4 = scmp.lt.s32.totalorder (!%p290_p3), %s836_s24, 1  ;;  %s846_s13 = smov (!%p290_p3), 122   ;;  %v848_v8 = vmov (!%p290_p3), 0   ;;  %v432_v9 = vld [vmem:[%s982_s4] sm:$0xff] (!%p290_p3)  ;;  %vm394_vm2 = vcmask (!%p290_p3), 1022976   ;;  %vm414_vm3 = vcmask (!%p290_p3), 1043456   ;;  %v491_v29 = vlaneseq (!%p290_p3) }
   0x7   : > { %293 = sbr.rel (%p290_p3) target bundleno = 730 (0x2da), region = 48  ;;  %s847_s14 = smov (!%p290_p3), 125   ;;  %480 = vmatprep.mubr.bf16.mxu0 (!%p290_p3), %v848_v8  ;;  %796 = vset.pattern.permute.xlu0 (!%p290_p3), %v848_v8  ;;  %vm400_vm4 = vcmask (!%p290_p3), 998400   ;;  %vm406_vm5 = vcmask (!%p290_p3), 973824   ;;  %vm412_vm6 = vcmask (!%p290_p3), 949248   ;;  %vm438_vm7 = vcmask (!%p290_p3), 326656  }
   0x8   : > { %s849_s15 = smov (!%p290_p3), 119   ;;  %s850_s16 = smov (!%p290_p3), 116   ;;  %v431_v27 = vld [vmem:[%s981_s3] sm:$0xf] (!%p290_p3)  ;;  %v851_v28 = vmov (!%p290_p3), 0.0   ;;  %v492_v30 = vand.u32 (!%p290_p3), 127, %v491_v29 }
   0x9   : > { %751 = vmatprep.subr.bf16.mxu1 (!%p290_p3), %v851_v28  ;;  %s852_s21 = smov (!%p290_p3), 127   ;;  %v549_v42 = vld [vmem:[%s984_s6] sm:$0xff] (!%p290_p3)  ;;  %vm853_vm12 = vmmov (!%p290_p3), 0   ;;  %s855_s29 = smov (!%p290_p3), 124   ;;  %vm521_vm13 = vcmask (!%p290_p3), 1039360   ;;  %vm528_vm14 = vcmask (!%p290_p3), 1031168  }
   0xa   : > { %v495_v31 = vadd.s32 (!%p290_p3), 4294967294, %v492_v30  ;;  %757 = vmatprep.mubr.msk.bf16.mxu1 (!%p290_p3), %vm853_vm12, %v851_v28  ;;  %s856_s30 = smov (!%p290_p3), 120   ;;  %vm542_vm15 = vcmask (!%p290_p3), 1014784  }
   0xc   : > { %vm497_vm8 = vcmp.ge.s32.totalorder (!%p290_p3), %v495_v31, 0  ;;  %vm499_vm9 = vcmp.lt.s32.totalorder (!%p290_p3), %v495_v31, 32 }
   0xd   : > { %vm501_vm10 = vmand (!%p290_p3), %vm497_vm8, %vm499_vm9 }
   0xe   : > { %s991_s24 = smov (!%p342_p4, %s836_s24), 1 }
   0xf   : > { %s743_s28 = sshll.u32 %s991_s24, 3  ;;  %s736_s10 = sshll.u32 %s991_s24, 2 }
  0x10   : > { %s349_s8 = scalar_lea.vmem %s978_s0, %s743_s28  ;;  %s745_s9 = sadd.s32 4, %s743_s28 }
  0x11   : > { %v921_v0 = vld [vmem:[%s349_s8] sm:$0xf]  ;;  %s358_s12 = scalar_lea.vmem %s979_s1, %s745_s9  ;;  %s854_s28 = smov 126  }
  0x12   : > { %vm380_vm0 = vcmp.ge.bf16.partialorder %v921_v0, 0  ;;  %v382_v1 = vmul.bf16 1036860877, %v921_v0  ;;  %v928_v2 = vld [vmem:[%s358_s12] sm:$0xf]  ;;  %v378_v43 = vunpack.c.l.bf16 %v921_v0 }
  0x13   : > { %vm381_vm1 = vcmp.ge.bf16.partialorder %v928_v2, 0  ;;  %v383_v3 = vmul.bf16 1036860877, %v928_v2  ;;  %v379_v44 = vunpack.c.l.bf16 %v928_v2 }
  0x14   : > { %v384_v4 = vsel %vm380_vm0, %v921_v0, %v382_v1  ;;  %vm607_vm0 = vcmask 982016  }
  0x15   : > { %396 = vrot.lane.b32.xlu1 %v384_v4, %s846_s13  ;;  %v388_v5 = vrot.slane %v384_v4, 4  ;;  %v385_v6 = vsel %vm381_vm1, %v928_v2, %v383_v3  ;;  %v817_v45 = vpack.i.bf16 %v379_v44, %v378_v43  ;;  %v545_v2 = vld [vmem:[%s983_s5] sm:$0xf] }
  0x16   : > { %v389_v7 = vrot.slane %v385_v6, 4 }
  0x17   : > { %390 = vrot.lane.b32.xlu0 %v388_v5, %s847_s14 }
  0x19   : > { %398 = vrot.lane.b32.xlu1 %v385_v6, %s846_s13  ;;  %s366_s13 = scalar_lea.vmem %s980_s2, %s736_s10 }
  0x1b   : > { %392 = vrot.lane.b32.xlu0 %v389_v7, %s847_s14 }
  0x1d   : > { %404 = vrot.lane.b32.xlu1 %v389_v7, %s849_s15 }
  0x1f   : > { %402 = vrot.lane.b32.xlu0 %v388_v5, %s849_s15  ;;  %s373_s15 = scalar_lea.vmem %s985_s7, %s736_s10 }
  0x21   : > { %410 = vrot.lane.b32.xlu1 %v385_v6, %s850_s16 }
  0x23   : > { %408 = vrot.lane.b32.xlu0 %v384_v4, %s850_s16 }
  0x27   : > { %435 = vperm.xlu0 %796, %v432_v9  }
  0x87   : > { %v397_v10 = vpop.permute.xlu1 %396 }
  0x89   : > { %v391_v11 = vpop.permute.xlu0 %390 }
  0x8b   : > { %v399_v12 = vpop.permute.xlu1 %398 }
  0x8c   : > { %v401_v20 = vsel %vm400_vm4, %v397_v10, %v399_v12 }
  0x8d   : > { %v393_v13 = vpop.permute.xlu0 %392 }
  0x8e   : > { %v395_v14 = vsel %vm394_vm2, %v391_v11, %v393_v13  ;;  %v421_v15 = vsel %vm414_vm3, %v385_v6, %v393_v13  ;;  %v611_v6 = vld [vmem:[%s366_s13] sm:$0xf] }
  0x8f   : > { %v405_v16 = vpop.permute.xlu1 %404  ;;  %448 = vmatprep.subr.bf16.mxu0 %v421_v15  ;;  %v417_v17 = vsel %vm414_vm3, %v384_v4, %v395_v14  ;;  %v612_v11 = vunpack.c.l.bf16 %v611_v6 }
  0x90   : > { %449 = vmatpush1.bf16.msra.mxu0 %v417_v17  ;;  %v429_v18 = vsel %vm414_vm3, %v399_v12, %v405_v16 }
  0x91   : > { %450 = vmatprep.subr.bf16.mxu0 %v429_v18  ;;  %v403_v19 = vpop.permute.xlu0 %402 }
  0x92   : > { %v407_v21 = vsel %vm406_vm5, %v403_v19, %v405_v16 }
  0x93   : > { %v425_v22 = vsel %vm414_vm3, %v401_v20, %v407_v21  ;;  %v411_v23 = vpop.permute.xlu1 %410 }
  0x94   : > { %451 = vmatpush1.bf16.msra.mxu0 %v425_v22 }
  0x95   : > { %v409_v24 = vpop.permute.xlu0 %408  ;;  %738 = vmatprep.subr.msk.bf16.mxu0 %vm414_vm3, %v411_v23 }
  0x96   : > { %v413_v25 = vsel %vm412_vm6, %v409_v24, %v411_v23 }
  0x97   : > { %v443_v26 = vsel %vm414_vm3, %v413_v25, 0 }
  0x98   : > { %453 = vmatpush1.bf16.msra.mxu0 %v443_v26 }
  0x9b   : > { %739 = vmatmul.mubr.msk.bf16.vlgmr.msra.gmra.mrb[0].mxu0 %vm438_vm7, %v431_v27 }
  0xa6   : > { %v436_v32 = vpop.permute.xlu0 %435 }
 0x16e   : > { %v482_v33 = vpop.f32.mrb[0].mxu0 }
 0x16f   : > { %v483_v34 = vadd.f32 %v482_v33, %v436_v32  ;;  %v484_v35 = vpop.f32.mrb[1].mxu0 }
 0x170   : > { %v486_v36 = vpop.f32.mrb[2].mxu0 }
 0x171   : > { %v507_v37 = vsel %vm501_vm10, %v483_v34, 0.0  ;;  %v487_v38 = vpop.f32.mrb[3].mxu0 }
 0x172   : > { %vm509_vm11 = vcmp.ge.f32.partialorder %v507_v37, 0.0  ;;  %v511_v39 = vmul.f32 0.1, %v507_v37 }
 0x174   : > { %v513_v40 = vsel %vm509_vm11, %v507_v37, %v511_v39 }
 0x175   : > { %v807_v41 = vpack.i.bf16 %v851_v28, %v513_v40 }
 0x177   : > { %808 = vrot.lane.b32.xlu0 %v807_v41, %s847_s14  ;;  %798 = vrot.lane.b32.xlu1 %v807_v41, %s852_s21 }
 0x17b   : > { %552 = vperm.xlu0 %796, %v549_v42   ;;  %803 = vrot.lane.b32.xlu1 %v807_v41, %s854_s28 }
 0x17f   : > { %813 = vrot.lane.b32.xlu1 %v807_v41, %s855_s29 }
 0x183   : > { %818 = vrot.lane.b32.xlu1 %v817_v45, %s856_s30 }
 0x1e9   : > { %v809_v46 = vpop.permute.xlu0 %808  ;;  %v799_v47 = vpop.permute.xlu1 %798 }
 0x1ea   : > { %v801_v48 = vunpack.i.h.bf16 %v799_v47  ;;  %v800_v49 = vunpack.i.l.bf16 %v799_v47  ;;  %v811_v50 = vunpack.i.h.bf16 %v809_v46  ;;  %v810_v51 = vunpack.i.l.bf16 %v809_v46 }
 0x1ec   : > { %v522_v52 = vsel %vm521_vm13, %v800_v49, %v801_v48  ;;  %v536_v58 = vsel %vm394_vm2, %v810_v51, %v811_v50 }
 0x1ed   : > { %v804_v53 = vpop.permute.xlu1 %803  ;;  %v546_v54 = vpack.c.bf16 %v522_v52, %v513_v40 }
 0x1ee   : > { %v806_v55 = vunpack.i.h.bf16 %v804_v53  ;;  %v805_v56 = vunpack.i.l.bf16 %v804_v53 }
 0x1ef   : > { %752 = vmatpush3.bf16.msra.mxu1 %v546_v54 }
 0x1f0   : > { %753 = vmatprep.subr.bf16.mxu1 %v851_v28  ;;  %v529_v57 = vsel %vm528_vm14, %v805_v56, %v806_v55 }
 0x1f1   : > { %v814_v59 = vpop.permute.xlu1 %813  ;;  %v547_v60 = vpack.c.bf16 %v536_v58, %v529_v57 }
 0x1f2   : > { %v816_v61 = vunpack.i.h.bf16 %v814_v59  ;;  %v815_v62 = vunpack.i.l.bf16 %v814_v59 }
 0x1f3   : > { %754 = vmatpush3.bf16.msra.mxu1 %v547_v60 }
 0x1f4   : > { %755 = vmatprep.subr.bf16.mxu1 %v851_v28  ;;  %v543_v63 = vsel %vm542_vm15, %v815_v62, %v816_v61 }
 0x1f5   : > { %v548_v0 = vpack.c.bf16 %v543_v63, %v543_v63  ;;  %v819_v3 = vpop.permute.xlu1 %818 }
 0x1f6   : > { %v821_v4 = vunpack.i.h.bf16 %v819_v3  ;;  %v820_v5 = vunpack.i.l.bf16 %v819_v3 }
 0x1f7   : > { %v559_v1 = vsel %vm414_vm3, %v548_v0, 0 }
 0x1f8   : > { %756 = vmatpush3.bf16.msra.mxu1 %v559_v1  ;;  %v608_v9 = vsel %vm607_vm0, %v820_v5, %v821_v4 }
 0x1fa   : > { %v553_v7 = vpop.permute.xlu0 %552 }
 0x1fb   : > { %758 = vmatmul.mubr.msk.bf16.vlgmr.msra.gmra.mrb[0].mxu1 %vm438_vm7, %v545_v2 }
 0x2ce   : > { %v595_v8 = vpop.f32.mrb[0].mxu1 }
 0x2cf   : > { %v596_v10 = vadd.f32 %v595_v8, %v553_v7  ;;  %v759_v12 = vpop.f32.mrb[1].mxu1 }
 0x2d0   : > { %v598_v13 = vpop.f32.mrb[2].mxu1 }
 0x2d1   : > { %v610_v14 = vadd.f32 %v608_v9, %v596_v10  ;;  %v760_v15 = vpop.f32.mrb[3].mxu1 }
 0x2d3   : > { %v613_v16 = vadd.f32 %v612_v11, %v610_v14 }
 0x2d5   : > { %v614_v17 = vmul.f32 0.5, %v613_v16 }
 0x2d7   : > { %v615_v18 = vpack.c.bf16 %v614_v17, %v614_v17 }
 0x2d9   : > { %616 = vst [vmem:[%s373_s15] sm:$0xf] %v615_v18 }
 0x2da PF: > { %s17_s26 = sadd.s32 1, %s844_s26   ;;  %s986_s24 = smov %s840_s25 }
 0x2db   : > { %p14_p5 = scmp.ge.s32.totalorder %s17_s26, 4   ;;  %s987_s25 = smov %s989_s27 }
 0x2dd   :  { %16 = sbr.rel (!%p14_p5) target bundleno = 2 (0x2), region = 84 }

// kernel: nsf_hifigan_forward.23
= control target key start
LH: loop header
LB: loop body
LE: loop exit
PB: predicated region body
PF: predicated region fallthrough
CT: control target
= control target key end

     0   :  { %s588_s15 = smov 0   ;;  %s590_s16 = smov 0   ;;  %s638_s0 = inlined_call_operand.vmem [shape: bf16[2,8,256], index: 0, kind: input, shape index: {}, may-alias: {0,1}]   ;;  %s639_s1 = inlined_call_operand.vmem [shape: bf16[2,8,256], index: 1, kind: input, shape index: {}, may-alias: {0,1}]   ;;  %s640_s2 = inlined_call_operand.vmem [shape: bf16[16,16], index: 2, kind: input, shape index: {}]   ;;  %s641_s3 = inlined_call_operand.vmem [shape: f32[16,1], index: 3, kind: input, shape index: {}]   ;;  %s642_s4 = inlined_call_operand.vmem [shape: bf16[2,16,128], index: 4, kind: output, shape index: {}]  }
   0x1   :  { %s592_s17 = smov 0  }
   0x2 LB: > { %s26_s18 = sadd.s32 1, %s553_s16  ;;  %p471_p0 = scmp.ge.s32.totalorder %s557_s17, 1  ;;  %s557_s17 = sphi %s592_s17, %s14_s17   ;;  %s553_s16 = sphi %s590_s16, %s644_s16   ;;  %s549_s15 = sphi %s588_s15, %s643_s15  }
   0x3   : > { %p28_p1 = scmp.ge.s32.totalorder %s26_s18, 2  ;;  %p200_p2 = scmp.lt.s32.totalorder %s557_s17, 3 }
   0x5   : > { %s646_s18 = smov (%p28_p1, %s26_s18), 0  ;;  %p201_p3 = pnand %p471_p0, %p200_p2 }
   0x6   : > { %p241_p4 = scmp.lt.s32.totalorder (!%p201_p3), %s549_s15, 1  ;;  %v559_v0 = vmov (!%p201_p3), 0.0   ;;  %vm560_vm0 = vmmov (!%p201_p3), 0   ;;  %v294_v5 = vld [vmem:[%s641_s3] sm:$0xff] (!%p201_p3)  ;;  %v561_v7 = vmov (!%p201_p3), 0   ;;  %v295_v10 = vld [vmem:[%s641_s3 + $0x8] sm:$0xff] (!%p201_p3) }
   0x7   : > { %204 = sbr.rel (%p201_p3) target bundleno = 366 (0x16e), region = 36  ;;  %498 = vmatprep.subr.bf16.mxu0 (!%p201_p3), %v559_v0  ;;  %500 = vmatprep.mubr.msk.bf16.mxu0 (!%p201_p3), %vm560_vm0, %v559_v0  ;;  %s562_s5 = smov (!%p201_p3), 127   ;;  %vm285_vm3 = vcmask (!%p201_p3), 1039360   ;;  %vm287_vm4 = vcmask (!%p201_p3), 1043456   ;;  %v534_v16 = vld [vmem:[%s640_s2] sm:$0xff] (!%p201_p3)   ;;  %vm311_vm5 = vcmask (!%p201_p3), 130048  }
   0x8   : > { %532 = vset.pattern.permute.xlu1 (!%p201_p3), %v561_v7  ;;  %533 = vset.pattern.permute.xlu0 (!%p201_p3), %v561_v7 }
   0x9   : > { %298 = vperm.xlu1 (!%p201_p3), %532, %v294_v5  }
   0xd   : > { %303 = vperm.xlu1 (!%p201_p3), %532, %v295_v10  }
   0xe   : > { %s648_s15 = smov (!%p241_p4, %s549_s15), 1 }
   0xf   : > { %s606_s19 = sshll.u32 %s648_s15, 3 }
  0x10   : > { %s248_s22 = scalar_lea.vmem %s638_s0, %s606_s19  ;;  %s486_s23 = sadd.s32 4, %s606_s19 }
  0x11   : > { %v269_v1 = vld [vmem:[%s248_s22] sm:$0xf]  ;;  %s257_s26 = scalar_lea.vmem %s639_s1, %s486_s23  ;;  %s266_s10 = scalar_lea.vmem %s642_s4, %s606_s19 }
  0x12   : > { %vm271_vm1 = vcmp.ge.bf16.partialorder %v269_v1, 0  ;;  %v273_v2 = vmul.bf16 1036860877, %v269_v1  ;;  %v270_v3 = vld [vmem:[%s257_s26] sm:$0xf] }
  0x13   : > { %vm272_vm2 = vcmp.ge.bf16.partialorder %v270_v3, 0  ;;  %v274_v4 = vmul.bf16 1036860877, %v270_v3 }
  0x14   : > { %v275_v6 = vsel %vm271_vm1, %v269_v1, %v273_v2 }
  0x15   : > { %v279_v8 = vrot.slane %v275_v6, 4  ;;  %v276_v9 = vsel %vm272_vm2, %v270_v3, %v274_v4 }
  0x16   : > { %v280_v11 = vrot.slane %v276_v9, 4 }
  0x17   : > { %281 = vrot.lane.b32.xlu0 %v279_v8, %s562_s5 }
  0x1b   : > { %283 = vrot.lane.b32.xlu0 %v280_v11, %s562_s5 }
  0x88   : > { %v299_v17 = vpop.permute.xlu1 %298 }
  0x89   : > { %v282_v12 = vpop.permute.xlu0 %281 }
  0x8c   : > { %v304_v20 = vpop.permute.xlu1 %303 }
  0x8d   : > { %v284_v13 = vpop.permute.xlu0 %283 }
  0x8e   : > { %v286_v14 = vsel %vm285_vm3, %v282_v12, %v284_v13 }
  0x8f   : > { %v290_v15 = vsel %vm287_vm4, %v275_v6, %v286_v14 }
  0x90   : > { %499 = vmatpush3.bf16.msra.mxu0 %v290_v15 }
  0x93   : > { %501 = vmatmul.mubr.msk.bf16.vlgmr.msra.gmra.mrb[0].mxu0 %vm311_vm5, %v534_v16 }
 0x166   : > { %v349_v18 = vpop.f32.mrb[0].mxu0 }
 0x167   : > { %v502_v19 = vpop.f32.mrb[1].mxu0  ;;  %v350_v22 = vadd.f32 %v349_v18, %v299_v17 }
 0x168   : > { %v352_v21 = vpop.f32.mrb[2].mxu0 }
 0x169   : > { %v353_v23 = vadd.f32 %v352_v21, %v304_v20  ;;  %v503_v24 = vpop.f32.mrb[3].mxu0 }
 0x16b   : > { %v493_v25 = vpack.c.bf16 %v353_v23, %v350_v22 }
 0x16d   : > { %494 = vst [vmem:[%s266_s10] sm:$0xff] %v493_v25  }
 0x16e PF: > { %s14_s17 = sadd.s32 1, %s557_s17   ;;  %s643_s15 = smov %s553_s16 }
 0x16f   : > { %p11_p5 = scmp.ge.s32.totalorder %s14_s17, 4   ;;  %s644_s16 = smov %s646_s18 }
 0x171   :  { %13 = sbr.rel (!%p11_p5) target bundleno = 2 (0x2), region = 69 }

// kernel: nsf_hifigan_forward.24
= control target key start
LH: loop header
LB: loop body
LE: loop exit
PB: predicated region body
PF: predicated region fallthrough
CT: control target
= control target key end

     0   :  { %s497_s15 = smov 0   ;;  %s499_s16 = smov 0   ;;  %s539_s0 = inlined_call_operand.vmem [shape: bf16[2,1,128], index: 0, kind: input, shape index: {}]   ;;  %s540_s1 = inlined_call_operand.vmem [shape: bf16[2,4,128], index: 1, kind: input, shape index: {}]   ;;  %s541_s2 = inlined_call_operand.vmem [shape: bf16[4,1], index: 2, kind: input, shape index: {}]   ;;  %s542_s3 = inlined_call_operand.vmem [shape: f32[4,1], index: 3, kind: input, shape index: {}]   ;;  %s543_s4 = inlined_call_operand.vmem [shape: bf16[2,4,128], index: 4, kind: output, shape index: {}]  }
   0x1   :  { %s501_s17 = smov 0  }
   0x2 LB: > { %s26_s18 = sadd.s32 1, %s463_s16  ;;  %p403_p0 = scmp.ge.s32.totalorder %s467_s17, 1  ;;  %s467_s17 = sphi %s501_s17, %s14_s17   ;;  %s463_s16 = sphi %s499_s16, %s545_s16   ;;  %s459_s15 = sphi %s497_s15, %s544_s15  }
   0x3   : > { %p28_p1 = scmp.ge.s32.totalorder %s26_s18, 2  ;;  %p193_p2 = scmp.lt.s32.totalorder %s467_s17, 3 }
   0x5   : > { %s547_s18 = smov (%p28_p1, %s26_s18), 0  ;;  %p194_p3 = pnand %p403_p0, %p193_p2 }
   0x6   : > { %p229_p4 = scmp.lt.s32.totalorder (!%p194_p3), %s459_s15, 1  ;;  %vm262_vm0 = vcmask (!%p194_p3), 1040384   ;;  %v469_v0 = vmov (!%p194_p3), 0.0   ;;  %vm470_vm1 = vmmov (!%p194_p3), 0   ;;  %v252_v1 = vld [vmem:[%s542_s3] sm:$0xf] (!%p194_p3) }
   0x7   : > { %197 = sbr.rel (%p194_p3) target bundleno = 241 (0xf1), region = 36  ;;  %411 = vmatprep.subr.bf16.mxu0 (!%p194_p3), %v469_v0  ;;  %413 = vmatprep.mubr.msk.bf16.mxu0 (!%p194_p3), %vm470_vm1, %v469_v0  ;;  %v471_v2 = vmov (!%p194_p3), 0   ;;  %v251_v6 = vld [vmem:[%s541_s2] sm:$0x3] (!%p194_p3)  ;;  %vm258_vm2 = vcmask (!%p194_p3), 7168  }
   0x8   : > { %444 = vset.pattern.permute.xlu0 (!%p194_p3), %v471_v2  ;;  %v264_v3 = vsel (!%p194_p3), %vm262_vm0, 65535, %v471_v2 }
   0x9   : > { %255 = vperm.xlu0 (!%p194_p3), %444, %v252_v1  }
   0xe   : > { %s549_s15 = smov (!%p229_p4, %s459_s15), 1 }
   0xf   : > { %s234_s23 = scalar_lea.vmem %s539_s0, %s549_s15  ;;  %s404_s26 = sshll.u32 %s549_s15, 1 }
  0x10   : > { %v250_v4 = vld [vmem:[%s234_s23] sm:$0x1]  ;;  %s241_s29 = scalar_lea.vmem %s540_s1, %s404_s26  ;;  %s248_s6 = scalar_lea.vmem %s543_s4, %s404_s26 }
  0x11   : > { %v266_v5 = vand.u32 %v264_v3, %v250_v4  ;;  %v308_v7 = vld [vmem:[%s241_s29] sm:$0x3] }
  0x12   : > { %v309_v9 = vunpack.c.l.bf16 %v308_v7 }
  0x13   : > { %412 = vmatpush3.bf16.msra.mxu0 %v266_v5 }
  0x16   : > { %414 = vmatmul.mubr.msk.bf16.vlgmr.msra.gmra.mrb[0].mxu0 %vm258_vm2, %v251_v6 }
  0x88   : > { %v256_v8 = vpop.permute.xlu0 %255 }
  0xe9   : > { %v302_v10 = vpop.f32.mrb[0].mxu0 }
  0xea   : > { %v303_v11 = vadd.f32 %v302_v10, %v256_v8  ;;  %v415_v12 = vpop.f32.mrb[1].mxu0 }
  0xeb   : > { %v305_v13 = vpop.f32.mrb[2].mxu0 }
  0xec   : > { %v310_v14 = vadd.f32 %v309_v9, %v303_v11  ;;  %v416_v15 = vpop.f32.mrb[3].mxu0 }
  0xee   : > { %v311_v16 = vpack.c.bf16 %v310_v14, %v310_v14 }
  0xf0   : > { %312 = vst [vmem:[%s248_s6] sm:$0x3] %v311_v16 }
  0xf1 PF: > { %s14_s17 = sadd.s32 1, %s467_s17   ;;  %s544_s15 = smov %s463_s16 }
  0xf2   : > { %p11_p5 = scmp.ge.s32.totalorder %s14_s17, 4   ;;  %s545_s16 = smov %s547_s18 }
  0xf4   :  { %13 = sbr.rel (!%p11_p5) target bundleno = 2 (0x2), region = 69 }

// kernel: nsf_hifigan_forward.27
= control target key start
LH: loop header
LB: loop body
LE: loop exit
PB: predicated region body
PF: predicated region fallthrough
CT: control target
= control target key end

     0   :  { %s766_s21 = smov 0   ;;  %s768_s22 = smov 0   ;;  %s838_s0 = inlined_call_operand.vmem [shape: bf16[2,4,256], index: 0, kind: input, shape index: {}, may-alias: {0,1}]   ;;  %s839_s1 = inlined_call_operand.vmem [shape: bf16[2,4,256], index: 1, kind: input, shape index: {}, may-alias: {0,1}]   ;;  %s840_s2 = inlined_call_operand.vmem [shape: bf16[4,12], index: 2, kind: input, shape index: {}]   ;;  %s841_s3 = inlined_call_operand.vmem [shape: f32[4,1], index: 3, kind: input, shape index: {}]   ;;  %s842_s4 = inlined_call_operand.vmem [shape: bf16[4,12], index: 4, kind: input, shape index: {}]   ;;  %s843_s5 = inlined_call_operand.vmem [shape: f32[4,1], index: 5, kind: input, shape index: {}]   ;;  %s844_s6 = inlined_call_operand.vmem [shape: bf16[2,4,128], index: 6, kind: output, shape index: {}]  }
   0x1   :  { %s770_s23 = smov 0  }
   0x2 LB: > { %s28_s24 = sadd.s32 1, %s717_s22  ;;  %p628_p0 = scmp.ge.s32.totalorder %s721_s23, 1  ;;  %s721_s23 = sphi %s770_s23, %s16_s23   ;;  %s717_s22 = sphi %s768_s22, %s846_s22   ;;  %s713_s21 = sphi %s766_s21, %s845_s21  }
   0x3   : > { %p30_p1 = scmp.ge.s32.totalorder %s28_s24, 2  ;;  %p250_p2 = scmp.lt.s32.totalorder %s721_s23, 3 }
   0x5   : > { %s848_s24 = smov (%p30_p1, %s28_s24), 0  ;;  %p251_p3 = pnand %p628_p0, %p250_p2 }
   0x6   : > { %p294_p4 = scmp.lt.s32.totalorder (!%p251_p3), %s713_s21, 1  ;;  %v723_v4 = vmov (!%p251_p3), 0   ;;  %s724_s9 = smov (!%p251_p3), 122   ;;  %v362_v11 = vld [vmem:[%s841_s3] sm:$0xf] (!%p251_p3)  ;;  %vm347_vm2 = vcmask (!%p251_p3), 998400   ;;  %v420_v25 = vlaneseq (!%p251_p3) }
   0x7   : > { %254 = sbr.rel (%p251_p3) target bundleno = 719 (0x2cf), region = 44  ;;  %409 = vmatprep.mubr.bf16.mxu0 (!%p251_p3), %v723_v4  ;;  %683 = vset.pattern.permute.xlu0 (!%p251_p3), %v723_v4  ;;  %s725_s10 = smov (!%p251_p3), 125   ;;  %v465_v12 = vld [vmem:[%s843_s5] sm:$0xf] (!%p251_p3)  ;;  %vm339_vm3 = vcmask (!%p251_p3), 1022976   ;;  %vm349_vm4 = vcmask (!%p251_p3), 1041408  }
   0x8   : > { %vm356_vm5 = vcmask (!%p251_p3), 1043456   ;;  %vm372_vm6 = vcmask (!%p251_p3), 1045504   ;;  %v361_v24 = vld [vmem:[%s840_s2] sm:$0x3] (!%p251_p3)  ;;  %vm368_vm7 = vcmask (!%p251_p3), 97280   ;;  %v421_v26 = vand.u32 (!%p251_p3), 127, %v420_v25 }
   0x9   : > { %v726_v40 = vmov (!%p251_p3), 0.0   ;;  %vm727_vm12 = vmmov (!%p251_p3), 0   ;;  %s728_s17 = smov (!%p251_p3), 127   ;;  %s729_s18 = smov (!%p251_p3), 126   ;;  %vm452_vm13 = vcmask (!%p251_p3), 1039360   ;;  %vm459_vm14 = vcmask (!%p251_p3), 1031168  }
   0xa   : > { %v422_v27 = vadd.s32 (!%p251_p3), 128, %v421_v26  ;;  %v424_v28 = vadd.s32 (!%p251_p3), 4294967295, %v421_v26  ;;  %645 = vmatprep.subr.bf16.mxu1 (!%p251_p3), %v726_v40  ;;  %647 = vmatprep.mubr.msk.bf16.mxu1 (!%p251_p3), %vm727_vm12, %v726_v40  ;;  %s730_s19 = smov (!%p251_p3), 124   ;;  %v463_v62 = vld [vmem:[%s842_s4] sm:$0x3] (!%p251_p3)  ;;  %vm523_vm15 = vcmask (!%p251_p3), 1014784  }
   0xc   : > { %v425_v29 = vadd.s32 (!%p251_p3), 4294967295, %v422_v27  ;;  %vm426_vm8 = vcmp.ge.s32.totalorder (!%p251_p3), %v424_v28, 0 }
   0xe   : > { %s850_s21 = smov (!%p294_p4, %s713_s21), 1  ;;  %vm429_vm9 = vcmp.lt.s32.totalorder %v425_v29, 128 }
   0xf   : > { %s639_s25 = sshll.u32 %s850_s21, 2  ;;  %s633_s26 = sshll.u32 %s850_s21, 1 }
  0x10   : > { %s301_s28 = scalar_lea.vmem %s838_s0, %s639_s25  ;;  %s641_s29 = sadd.s32 2, %s639_s25 }
  0x11   : > { %s310_s8 = scalar_lea.vmem %s839_s1, %s641_s29  ;;  %v793_v0 = vld [vmem:[%s301_s28] sm:$0x3]  ;;  %s318_s29 = scalar_lea.vmem %s844_s6, %s633_s26 }
  0x12   : > { %vm325_vm0 = vcmp.ge.bf16.partialorder %v793_v0, 0  ;;  %v327_v1 = vmul.bf16 1036860877, %v793_v0  ;;  %v797_v2 = vld [vmem:[%s310_s8] sm:$0x3]  ;;  %v323_v47 = vunpack.c.l.bf16 %v793_v0 }
  0x13   : > { %vm326_vm1 = vcmp.ge.bf16.partialorder %v797_v2, 0  ;;  %v328_v3 = vmul.bf16 1036860877, %v797_v2  ;;  %v324_v48 = vunpack.c.l.bf16 %v797_v2 }
  0x14   : > { %v329_v5 = vsel %vm325_vm0, %v793_v0, %v327_v1 }
  0x15   : > { %v341_v6 = vrot.slane %v329_v5, 4  ;;  %v333_v7 = vrot.slane %v329_v5, 6  ;;  %v330_v8 = vsel %vm326_vm1, %v797_v2, %v328_v3  ;;  %v694_v50 = vpack.i.bf16 %v324_v48, %v323_v47 }
  0x16   : > { %v342_v9 = vrot.slane %v330_v8, 4  ;;  %v334_v10 = vrot.slane %v330_v8, 6 }
  0x17   : > { %343 = vrot.lane.b32.xlu1 %v341_v6, %s724_s9  ;;  %335 = vrot.lane.b32.xlu0 %v333_v7, %s725_s10 }
  0x1b   : > { %345 = vrot.lane.b32.xlu1 %v342_v9, %s724_s9  ;;  %337 = vrot.lane.b32.xlu0 %v334_v10, %s725_s10 }
  0x1f   : > { %365 = vperm.xlu0 %683, %v362_v11  }
  0x23   : > { %468 = vperm.xlu0 %683, %v465_v12  }
  0x89   : > { %v344_v13 = vpop.permute.xlu1 %343  ;;  %v336_v14 = vpop.permute.xlu0 %335 }
  0x8d   : > { %v346_v15 = vpop.permute.xlu1 %345  ;;  %v338_v16 = vpop.permute.xlu0 %337 }
  0x8e   : > { %v348_v17 = vsel %vm347_vm2, %v344_v13, %v346_v15  ;;  %v340_v18 = vsel %vm339_vm3, %v336_v14, %v338_v16  ;;  %v355_v19 = vsel %vm349_vm4, %v330_v8, %v338_v16 }
  0x8f   : > { %v360_v20 = vsel %vm356_vm5, %v355_v19, %v346_v15  ;;  %v352_v21 = vsel %vm349_vm4, %v329_v5, %v340_v18 }
  0x90   : > { %634 = vmatprep.subr.msk.bf16.mxu0 %vm372_vm6, %v360_v20  ;;  %v358_v22 = vsel %vm356_vm5, %v352_v21, %v348_v17 }
  0x91   : > { %v373_v23 = vsel %vm372_vm6, %v358_v22, 0 }
  0x92   : > { %378 = vmatpush1.bf16.msra.mxu0 %v373_v23 }
  0x95   : > { %635 = vmatmul.mubr.msk.bf16.vlgmr.msra.gmra.mrb[0].mxu0 %vm368_vm7, %v361_v24 }
  0x9e   : > { %v366_v30 = vpop.permute.xlu0 %365 }
  0xa2   : > { %v469_v2 = vpop.permute.xlu0 %468 }
 0x168   : > { %v411_v31 = vpop.f32.mrb[0].mxu0 }
 0x169   : > { %v412_v32 = vadd.f32 %v411_v31, %v366_v30  ;;  %v413_v33 = vpop.f32.mrb[1].mxu0 }
 0x16a   : > { %v414_v34 = vadd.f32 %v413_v33, %v366_v30  ;;  %v415_v35 = vpop.f32.mrb[2].mxu0 }
 0x16b   : > { %v436_v36 = vsel %vm426_vm8, %v412_v32, 0.0  ;;  %v416_v37 = vpop.f32.mrb[3].mxu0 }
 0x16c   : > { %vm438_vm10 = vcmp.ge.f32.partialorder %v436_v36, 0.0  ;;  %v440_v38 = vmul.f32 0.1, %v436_v36  ;;  %v437_v39 = vsel %vm429_vm9, %v414_v34, 0.0 }
 0x16d   : > { %vm439_vm11 = vcmp.ge.f32.partialorder %v437_v39, 0.0  ;;  %v441_v41 = vmul.f32 0.1, %v437_v39 }
 0x16e   : > { %v442_v42 = vsel %vm438_vm10, %v436_v36, %v440_v38 }
 0x16f   : > { %v443_v43 = vsel %vm439_vm11, %v437_v39, %v441_v41  ;;  %v446_v44 = vrot.slane %v442_v42, 4 }
 0x170   : > { %v447_v45 = vrot.slane %v443_v43, 4  ;;  %v689_v49 = vpack.i.bf16 %v443_v43, %v442_v42 }
 0x172   : > { %v684_v46 = vpack.i.bf16 %v447_v45, %v446_v44 }
 0x174   : > { %685 = vrot.lane.b32.xlu1 %v684_v46, %s728_s17 }
 0x178   : > { %690 = vrot.lane.b32.xlu1 %v689_v49, %s729_s18 }
 0x17c   : > { %695 = vrot.lane.b32.xlu1 %v694_v50, %s730_s19 }
 0x1e6   : > { %v686_v51 = vpop.permute.xlu1 %685 }
 0x1e7   : > { %v688_v52 = vunpack.i.h.bf16 %v686_v51  ;;  %v687_v53 = vunpack.i.l.bf16 %v686_v51 }
 0x1e9   : > { %v453_v55 = vsel %vm452_vm13, %v687_v53, %v688_v52 }
 0x1ea   : > { %v691_v54 = vpop.permute.xlu1 %690  ;;  %v462_v59 = vsel %vm356_vm5, %v442_v42, %v453_v55 }
 0x1eb   : > { %v693_v56 = vunpack.i.h.bf16 %v691_v54  ;;  %v692_v57 = vunpack.i.l.bf16 %v691_v54 }
 0x1ed   : > { %v460_v58 = vsel %vm459_vm14, %v692_v57, %v693_v56 }
 0x1ee   : > { %v464_v60 = vpack.c.bf16 %v460_v58, %v462_v59  ;;  %v696_v63 = vpop.permute.xlu1 %695 }
 0x1ef   : > { %v698_v0 = vunpack.i.h.bf16 %v696_v63  ;;  %v697_v1 = vunpack.i.l.bf16 %v696_v63 }
 0x1f0   : > { %v475_v61 = vsel %vm372_vm6, %v464_v60, 0 }
 0x1f1   : > { %646 = vmatpush3.bf16.msra.mxu1 %v475_v61  ;;  %v524_v4 = vsel %vm523_vm15, %v697_v1, %v698_v0 }
 0x1f4   : > { %648 = vmatmul.mubr.msk.bf16.vlgmr.msra.gmra.mrb[0].mxu1 %vm368_vm7, %v463_v62 }
 0x2c7   : > { %v511_v3 = vpop.f32.mrb[0].mxu1 }
 0x2c8   : > { %v512_v5 = vadd.f32 %v511_v3, %v469_v2  ;;  %v649_v6 = vpop.f32.mrb[1].mxu1 }
 0x2c9   : > { %v514_v7 = vpop.f32.mrb[2].mxu1 }
 0x2ca   : > { %v526_v8 = vadd.f32 %v524_v4, %v512_v5  ;;  %v650_v9 = vpop.f32.mrb[3].mxu1 }
 0x2cc   : > { %v527_v10 = vpack.c.bf16 %v526_v8, %v526_v8 }
 0x2ce   : > { %528 = vst [vmem:[%s318_s29] sm:$0x3] %v527_v10 }
 0x2cf PF: > { %s16_s23 = sadd.s32 1, %s721_s23   ;;  %s845_s21 = smov %s717_s22 }
 0x2d0   : > { %p13_p5 = scmp.ge.s32.totalorder %s16_s23, 4   ;;  %s846_s22 = smov %s848_s24 }
 0x2d2   :  { %15 = sbr.rel (!%p13_p5) target bundleno = 2 (0x2), region = 77 }

// kernel: nsf_hifigan_forward.26
= control target key start
LH: loop header
LB: loop body
LE: loop exit
PB: predicated region body
PF: predicated region fallthrough
CT: control target
= control target key end

     0   :  { %s759_s21 = smov 0   ;;  %s761_s22 = smov 0   ;;  %s843_s0 = inlined_call_operand.vmem [shape: bf16[2,4,256], index: 0, kind: input, shape index: {}, may-alias: {0,1}]   ;;  %s844_s1 = inlined_call_operand.vmem [shape: bf16[2,4,256], index: 1, kind: input, shape index: {}, may-alias: {0,1}]   ;;  %s845_s2 = inlined_call_operand.vmem [shape: bf16[4,12], index: 2, kind: input, shape index: {}]   ;;  %s846_s3 = inlined_call_operand.vmem [shape: f32[4,1], index: 3, kind: input, shape index: {}]   ;;  %s847_s4 = inlined_call_operand.vmem [shape: bf16[4,12], index: 4, kind: input, shape index: {}]   ;;  %s848_s5 = inlined_call_operand.vmem [shape: f32[4,1], index: 5, kind: input, shape index: {}]   ;;  %s849_s6 = inlined_call_operand.vmem [shape: bf16[2,4,128], index: 6, kind: output, shape index: {}]  }
   0x1   :  { %s763_s23 = smov 0  }
   0x2 LB: > { %s28_s24 = sadd.s32 1, %s713_s22  ;;  %p627_p0 = scmp.ge.s32.totalorder %s717_s23, 1  ;;  %s717_s23 = sphi %s763_s23, %s16_s23   ;;  %s713_s22 = sphi %s761_s22, %s851_s22   ;;  %s709_s21 = sphi %s759_s21, %s850_s21  }
   0x3   : > { %p30_p1 = scmp.ge.s32.totalorder %s28_s24, 2  ;;  %p250_p2 = scmp.lt.s32.totalorder %s717_s23, 3 }
   0x5   : > { %s853_s24 = smov (%p30_p1, %s28_s24), 0  ;;  %p251_p3 = pnand %p627_p0, %p250_p2 }
   0x6   : > { %p294_p4 = scmp.lt.s32.totalorder (!%p251_p3), %s709_s21, 1  ;;  %v719_v4 = vmov (!%p251_p3), 0   ;;  %s720_s9 = smov (!%p251_p3), 126   ;;  %v362_v11 = vld [vmem:[%s846_s3] sm:$0xf] (!%p251_p3)  ;;  %vm347_vm2 = vcmask (!%p251_p3), 1031168   ;;  %v420_v25 = vlaneseq (!%p251_p3) }
   0x7   : > { %254 = sbr.rel (%p251_p3) target bundleno = 719 (0x2cf), region = 44  ;;  %409 = vmatprep.mubr.bf16.mxu0 (!%p251_p3), %v719_v4  ;;  %679 = vset.pattern.permute.xlu0 (!%p251_p3), %v719_v4  ;;  %s721_s10 = smov (!%p251_p3), 127   ;;  %v465_v12 = vld [vmem:[%s848_s5] sm:$0xf] (!%p251_p3)  ;;  %vm339_vm3 = vcmask (!%p251_p3), 1039360   ;;  %vm349_vm4 = vcmask (!%p251_p3), 1041408  }
   0x8   : > { %vm356_vm5 = vcmask (!%p251_p3), 1043456   ;;  %vm372_vm6 = vcmask (!%p251_p3), 1045504   ;;  %v361_v24 = vld [vmem:[%s845_s2] sm:$0x3] (!%p251_p3)  ;;  %vm368_vm7 = vcmask (!%p251_p3), 97280   ;;  %v421_v26 = vand.u32 (!%p251_p3), 127, %v420_v25 }
   0x9   : > { %v722_v40 = vmov (!%p251_p3), 0.0   ;;  %vm723_vm12 = vmmov (!%p251_p3), 0   ;;  %v463_v62 = vld [vmem:[%s847_s4] sm:$0x3] (!%p251_p3) }
   0xa   : > { %v422_v27 = vadd.s32 (!%p251_p3), 128, %v421_v26  ;;  %v424_v28 = vadd.s32 (!%p251_p3), 4294967295, %v421_v26  ;;  %644 = vmatprep.subr.bf16.mxu1 (!%p251_p3), %v722_v40  ;;  %646 = vmatprep.mubr.msk.bf16.mxu1 (!%p251_p3), %vm723_vm12, %v722_v40 }
   0xc   : > { %v425_v29 = vadd.s32 (!%p251_p3), 4294967295, %v422_v27  ;;  %vm426_vm8 = vcmp.ge.s32.totalorder (!%p251_p3), %v424_v28, 0 }
   0xe   : > { %s855_s21 = smov (!%p294_p4, %s709_s21), 1  ;;  %vm429_vm9 = vcmp.lt.s32.totalorder %v425_v29, 128 }
   0xf   : > { %s638_s25 = sshll.u32 %s855_s21, 2  ;;  %s632_s19 = sshll.u32 %s855_s21, 1 }
  0x10   : > { %s301_s28 = scalar_lea.vmem %s843_s0, %s638_s25  ;;  %s640_s29 = sadd.s32 2, %s638_s25 }
  0x11   : > { %s310_s8 = scalar_lea.vmem %s844_s1, %s640_s29  ;;  %v786_v0 = vld [vmem:[%s301_s28] sm:$0x3]  ;;  %s318_s26 = scalar_lea.vmem %s849_s6, %s632_s19 }
  0x12   : > { %vm325_vm0 = vcmp.ge.bf16.partialorder %v786_v0, 0  ;;  %v327_v1 = vmul.bf16 1036860877, %v786_v0  ;;  %v790_v2 = vld [vmem:[%s310_s8] sm:$0x3]  ;;  %v323_v47 = vunpack.c.l.bf16 %v786_v0 }
  0x13   : > { %vm326_vm1 = vcmp.ge.bf16.partialorder %v790_v2, 0  ;;  %v328_v3 = vmul.bf16 1036860877, %v790_v2  ;;  %v324_v48 = vunpack.c.l.bf16 %v790_v2 }
  0x14   : > { %v329_v5 = vsel %vm325_vm0, %v786_v0, %v327_v1 }
  0x15   : > { %v341_v6 = vrot.slane %v329_v5, 4  ;;  %v333_v7 = vrot.slane %v329_v5, 6  ;;  %v330_v8 = vsel %vm326_vm1, %v790_v2, %v328_v3  ;;  %v690_v50 = vpack.i.bf16 %v324_v48, %v323_v47 }
  0x16   : > { %v342_v9 = vrot.slane %v330_v8, 4  ;;  %v334_v10 = vrot.slane %v330_v8, 6 }
  0x17   : > { %343 = vrot.lane.b32.xlu1 %v341_v6, %s720_s9  ;;  %335 = vrot.lane.b32.xlu0 %v333_v7, %s721_s10 }
  0x1b   : > { %345 = vrot.lane.b32.xlu1 %v342_v9, %s720_s9  ;;  %337 = vrot.lane.b32.xlu0 %v334_v10, %s721_s10 }
  0x1f   : > { %365 = vperm.xlu0 %679, %v362_v11  }
  0x23   : > { %468 = vperm.xlu0 %679, %v465_v12  }
  0x89   : > { %v344_v13 = vpop.permute.xlu1 %343  ;;  %v336_v14 = vpop.permute.xlu0 %335 }
  0x8d   : > { %v346_v15 = vpop.permute.xlu1 %345  ;;  %v338_v16 = vpop.permute.xlu0 %337 }
  0x8e   : > { %v348_v17 = vsel %vm347_vm2, %v344_v13, %v346_v15  ;;  %v340_v18 = vsel %vm339_vm3, %v336_v14, %v338_v16  ;;  %v355_v19 = vsel %vm349_vm4, %v330_v8, %v338_v16 }
  0x8f   : > { %v360_v20 = vsel %vm356_vm5, %v355_v19, %v346_v15  ;;  %v352_v21 = vsel %vm349_vm4, %v329_v5, %v340_v18 }
  0x90   : > { %633 = vmatprep.subr.msk.bf16.mxu0 %vm372_vm6, %v360_v20  ;;  %v358_v22 = vsel %vm356_vm5, %v352_v21, %v348_v17 }
  0x91   : > { %v373_v23 = vsel %vm372_vm6, %v358_v22, 0 }
  0x92   : > { %378 = vmatpush1.bf16.msra.mxu0 %v373_v23 }
  0x95   : > { %634 = vmatmul.mubr.msk.bf16.vlgmr.msra.gmra.mrb[0].mxu0 %vm368_vm7, %v361_v24 }
  0x9e   : > { %v366_v30 = vpop.permute.xlu0 %365 }
  0xa2   : > { %v469_v2 = vpop.permute.xlu0 %468 }
 0x168   : > { %v411_v31 = vpop.f32.mrb[0].mxu0 }
 0x169   : > { %v412_v32 = vadd.f32 %v411_v31, %v366_v30  ;;  %v413_v33 = vpop.f32.mrb[1].mxu0 }
 0x16a   : > { %v414_v34 = vadd.f32 %v413_v33, %v366_v30  ;;  %v415_v35 = vpop.f32.mrb[2].mxu0 }
 0x16b   : > { %v436_v36 = vsel %vm426_vm8, %v412_v32, 0.0  ;;  %v416_v37 = vpop.f32.mrb[3].mxu0 }
 0x16c   : > { %vm438_vm10 = vcmp.ge.f32.partialorder %v436_v36, 0.0  ;;  %v440_v38 = vmul.f32 0.1, %v436_v36  ;;  %v437_v39 = vsel %vm429_vm9, %v414_v34, 0.0 }
 0x16d   : > { %vm439_vm11 = vcmp.ge.f32.partialorder %v437_v39, 0.0  ;;  %v441_v41 = vmul.f32 0.1, %v437_v39 }
 0x16e   : > { %v442_v42 = vsel %vm438_vm10, %v436_v36, %v440_v38 }
 0x16f   : > { %v443_v43 = vsel %vm439_vm11, %v437_v39, %v441_v41  ;;  %v446_v44 = vrot.slane %v442_v42, 4 }
 0x170   : > { %v447_v45 = vrot.slane %v443_v43, 4  ;;  %v685_v49 = vpack.i.bf16 %v443_v43, %v442_v42 }
 0x172   : > { %v680_v46 = vpack.i.bf16 %v447_v45, %v446_v44 }
 0x174   : > { %681 = vrot.lane.b32.xlu1 %v680_v46, %s721_s10 }
 0x178   : > { %686 = vrot.lane.b32.xlu1 %v685_v49, %s720_s9 }
 0x17c   : > { %691 = vrot.lane.b32.xlu1 %v690_v50, %s720_s9 }
 0x1e6   : > { %v682_v51 = vpop.permute.xlu1 %681 }
 0x1e7   : > { %v684_v52 = vunpack.i.h.bf16 %v682_v51  ;;  %v683_v53 = vunpack.i.l.bf16 %v682_v51 }
 0x1e9   : > { %v453_v55 = vsel %vm339_vm3, %v683_v53, %v684_v52 }
 0x1ea   : > { %v687_v54 = vpop.permute.xlu1 %686  ;;  %v462_v59 = vsel %vm356_vm5, %v442_v42, %v453_v55 }
 0x1eb   : > { %v689_v56 = vunpack.i.h.bf16 %v687_v54  ;;  %v688_v57 = vunpack.i.l.bf16 %v687_v54 }
 0x1ed   : > { %v460_v58 = vsel %vm347_vm2, %v688_v57, %v689_v56 }
 0x1ee   : > { %v464_v60 = vpack.c.bf16 %v460_v58, %v462_v59  ;;  %v692_v63 = vpop.permute.xlu1 %691 }
 0x1ef   : > { %v694_v0 = vunpack.i.h.bf16 %v692_v63  ;;  %v693_v1 = vunpack.i.l.bf16 %v692_v63 }
 0x1f0   : > { %v475_v61 = vsel %vm372_vm6, %v464_v60, 0 }
 0x1f1   : > { %645 = vmatpush3.bf16.msra.mxu1 %v475_v61  ;;  %v523_v4 = vsel %vm347_vm2, %v693_v1, %v694_v0 }
 0x1f4   : > { %647 = vmatmul.mubr.msk.bf16.vlgmr.msra.gmra.mrb[0].mxu1 %vm368_vm7, %v463_v62 }
 0x2c7   : > { %v511_v3 = vpop.f32.mrb[0].mxu1 }
 0x2c8   : > { %v512_v5 = vadd.f32 %v511_v3, %v469_v2  ;;  %v648_v6 = vpop.f32.mrb[1].mxu1 }
 0x2c9   : > { %v514_v7 = vpop.f32.mrb[2].mxu1 }
 0x2ca   : > { %v525_v8 = vadd.f32 %v523_v4, %v512_v5  ;;  %v649_v9 = vpop.f32.mrb[3].mxu1 }
 0x2cc   : > { %v526_v10 = vpack.c.bf16 %v525_v8, %v525_v8 }
 0x2ce   : > { %527 = vst [vmem:[%s318_s26] sm:$0x3] %v526_v10 }
 0x2cf PF: > { %s16_s23 = sadd.s32 1, %s717_s23   ;;  %s850_s21 = smov %s713_s22 }
 0x2d0   : > { %p13_p5 = scmp.ge.s32.totalorder %s16_s23, 4   ;;  %s851_s22 = smov %s853_s24 }
 0x2d2   :  { %15 = sbr.rel (!%p13_p5) target bundleno = 2 (0x2), region = 77 }

// kernel: nsf_hifigan_forward.28
= control target key start
LH: loop header
LB: loop body
LE: loop exit
PB: predicated region body
PF: predicated region fallthrough
CT: control target
= control target key end

     0   :  { %s903_s24 = smov 0   ;;  %s905_s25 = smov 0   ;;  %s986_s0 = inlined_call_operand.vmem [shape: bf16[2,4,256], index: 0, kind: input, shape index: {}, may-alias: {0,1}]   ;;  %s987_s1 = inlined_call_operand.vmem [shape: bf16[2,4,256], index: 1, kind: input, shape index: {}, may-alias: {0,1}]   ;;  %s988_s2 = inlined_call_operand.vmem [shape: bf16[2,4,128], index: 2, kind: input, shape index: {}]   ;;  %s989_s3 = inlined_call_operand.vmem [shape: bf16[4,20], index: 3, kind: input, shape index: {}]   ;;  %s990_s4 = inlined_call_operand.vmem [shape: f32[4,1], index: 4, kind: input, shape index: {}]   ;;  %s991_s5 = inlined_call_operand.vmem [shape: bf16[4,20], index: 5, kind: input, shape index: {}]   ;;  %s992_s6 = inlined_call_operand.vmem [shape: f32[4,1], index: 6, kind: input, shape index: {}]   ;;  %s993_s7 = inlined_call_operand.vmem [shape: bf16[2,4,128], index: 7, kind: output, shape index: {}]  }
   0x1   :  { %s907_s26 = smov 0  }
   0x2 LB: > { %s29_s27 = sadd.s32 1, %s846_s25  ;;  %p740_p0 = scmp.ge.s32.totalorder %s850_s26, 1  ;;  %s850_s26 = sphi %s907_s26, %s17_s26   ;;  %s846_s25 = sphi %s905_s25, %s995_s25   ;;  %s842_s24 = sphi %s903_s24, %s994_s24  }
   0x3   : > { %p31_p1 = scmp.ge.s32.totalorder %s29_s27, 2  ;;  %p289_p2 = scmp.lt.s32.totalorder %s850_s26, 3 }
   0x5   : > { %s997_s27 = smov (%p31_p1, %s29_s27), 0  ;;  %p290_p3 = pnand %p740_p0, %p289_p2 }
   0x6   : > { %p342_p4 = scmp.lt.s32.totalorder (!%p290_p3), %s842_s24, 1  ;;  %s852_s13 = smov (!%p290_p3), 122   ;;  %v854_v10 = vmov (!%p290_p3), 0   ;;  %v438_v13 = vld [vmem:[%s990_s4] sm:$0xf] (!%p290_p3)  ;;  %vm394_vm2 = vcmask (!%p290_p3), 1022976   ;;  %v497_v34 = vlaneseq (!%p290_p3) }
   0x7   : > { %293 = sbr.rel (%p290_p3) target bundleno = 731 (0x2db), region = 48  ;;  %s853_s14 = smov (!%p290_p3), 125   ;;  %486 = vmatprep.mubr.bf16.mxu0 (!%p290_p3), %v854_v10  ;;  %802 = vset.pattern.permute.xlu0 (!%p290_p3), %v854_v10  ;;  %vm418_vm3 = vcmask (!%p290_p3), 1041408   ;;  %vm402_vm4 = vcmask (!%p290_p3), 998400   ;;  %vm425_vm5 = vcmask (!%p290_p3), 1043456   ;;  %vm410_vm6 = vcmask (!%p290_p3), 973824  }
   0x8   : > { %s855_s15 = smov (!%p290_p3), 119   ;;  %s856_s16 = smov (!%p290_p3), 116   ;;  %vm430_vm7 = vcmask (!%p290_p3), 1045504   ;;  %vm416_vm8 = vcmask (!%p290_p3), 949248   ;;  %v437_v33 = vld [vmem:[%s989_s3] sm:$0x3] (!%p290_p3) }
   0x9   : > { %vm444_vm9 = vcmask (!%p290_p3), 162816   ;;  %v498_v35 = vand.u32 (!%p290_p3), 127, %v497_v34  ;;  %v857_v51 = vmov (!%p290_p3), 0.0   ;;  %s858_s21 = smov (!%p290_p3), 126   ;;  %vm859_vm14 = vmmov (!%p290_p3), 0   ;;  %s861_s29 = smov (!%p290_p3), 124  }
   0xa   : > { %759 = vmatprep.subr.bf16.mxu1 (!%p290_p3), %v857_v51  ;;  %763 = vmatprep.mubr.msk.bf16.mxu1 (!%p290_p3), %vm859_vm14, %v857_v51  ;;  %v558_v57 = vld [vmem:[%s992_s6] sm:$0xf] (!%p290_p3)  ;;  %s862_s30 = smov (!%p290_p3), 120   ;;  %vm529_vm15 = vcmask (!%p290_p3), 1039360  }
   0xb   : > { %v499_v36 = vadd.s32 (!%p290_p3), 128, %v498_v35  ;;  %v501_v37 = vadd.s32 (!%p290_p3), 4294967294, %v498_v35 }
   0xd   : > { %v502_v38 = vadd.s32 (!%p290_p3), 4294967294, %v499_v36  ;;  %vm503_vm10 = vcmp.ge.s32.totalorder (!%p290_p3), %v501_v37, 0 }
   0xe   : > { %s999_s24 = smov (!%p342_p4, %s842_s24), 1 }
   0xf   : > { %s752_s28 = sshll.u32 %s999_s24, 2  ;;  %vm506_vm11 = vcmp.lt.s32.totalorder %v502_v38, 128  ;;  %s745_s10 = sshll.u32 %s999_s24, 1 }
  0x10   : > { %s349_s8 = scalar_lea.vmem %s986_s0, %s752_s28  ;;  %s754_s9 = sadd.s32 2, %s752_s28 }
  0x11   : > { %s358_s12 = scalar_lea.vmem %s987_s1, %s754_s9  ;;  %v930_v0 = vld [vmem:[%s349_s8] sm:$0x3]  ;;  %s860_s28 = smov 127  }
  0x12   : > { %vm380_vm0 = vcmp.ge.bf16.partialorder %v930_v0, 0  ;;  %v382_v1 = vmul.bf16 1036860877, %v930_v0  ;;  %v934_v2 = vld [vmem:[%s358_s12] sm:$0x3]  ;;  %v378_v58 = vunpack.c.l.bf16 %v930_v0 }
  0x13   : > { %vm381_vm1 = vcmp.ge.bf16.partialorder %v934_v2, 0  ;;  %v383_v3 = vmul.bf16 1036860877, %v934_v2  ;;  %v379_v59 = vunpack.c.l.bf16 %v934_v2 }
  0x14   : > { %v384_v4 = vsel %vm380_vm0, %v930_v0, %v382_v1  ;;  %vm536_vm0 = vcmask 1031168  }
  0x15   : > { %v396_v5 = vrot.slane %v384_v4, 4  ;;  %v388_v6 = vrot.slane %v384_v4, 6  ;;  %v385_v7 = vsel %vm381_vm1, %v934_v2, %v383_v3  ;;  %v404_v12 = vrot.slane %v384_v4, 2 }
  0x16   : > { %v397_v8 = vrot.slane %v385_v7, 4  ;;  %v389_v9 = vrot.slane %v385_v7, 6  ;;  %v405_v11 = vrot.slane %v385_v7, 2  ;;  %v823_v60 = vpack.i.bf16 %v379_v59, %v378_v58 }
  0x17   : > { %398 = vrot.lane.b32.xlu1 %v396_v5, %s852_s13  ;;  %390 = vrot.lane.b32.xlu0 %v388_v6, %s853_s14  ;;  %vm550_vm1 = vcmask 1014784  }
  0x1b   : > { %400 = vrot.lane.b32.xlu1 %v397_v8, %s852_s13  ;;  %392 = vrot.lane.b32.xlu0 %v389_v9, %s853_s14  ;;  %s366_s13 = scalar_lea.vmem %s988_s2, %s745_s10 }
  0x1f   : > { %408 = vrot.lane.b32.xlu1 %v405_v11, %s855_s15  ;;  %406 = vrot.lane.b32.xlu0 %v404_v12, %s855_s15  ;;  %s373_s15 = scalar_lea.vmem %s993_s7, %s745_s10 }
  0x23   : > { %414 = vrot.lane.b32.xlu1 %v385_v7, %s856_s16  ;;  %412 = vrot.lane.b32.xlu0 %v384_v4, %s856_s16 }
  0x27   : > { %441 = vperm.xlu0 %802, %v438_v13  }
  0x89   : > { %v399_v14 = vpop.permute.xlu1 %398  ;;  %v391_v15 = vpop.permute.xlu0 %390 }
  0x8d   : > { %v401_v16 = vpop.permute.xlu1 %400  ;;  %v393_v17 = vpop.permute.xlu0 %392 }
  0x8e   : > { %v395_v18 = vsel %vm394_vm2, %v391_v15, %v393_v17  ;;  %v424_v19 = vsel %vm418_vm3, %v385_v7, %v393_v17  ;;  %v403_v20 = vsel %vm402_vm4, %v399_v14, %v401_v16 }
  0x8f   : > { %v421_v21 = vsel %vm418_vm3, %v384_v4, %v395_v18  ;;  %v429_v24 = vsel %vm425_vm5, %v424_v19, %v401_v16  ;;  %v555_v18 = vld [vmem:[%s991_s5] sm:$0x3] }
  0x90   : > { %v427_v27 = vsel %vm425_vm5, %v421_v21, %v403_v20 }
  0x91   : > { %v409_v22 = vpop.permute.xlu1 %408  ;;  %v407_v23 = vpop.permute.xlu0 %406 }
  0x92   : > { %v411_v25 = vsel %vm410_vm6, %v407_v23, %v409_v22  ;;  %v435_v26 = vsel %vm430_vm7, %v429_v24, %v409_v22  ;;  %v620_v22 = vld [vmem:[%s366_s13] sm:$0x3] }
  0x93   : > { %454 = vmatprep.subr.bf16.mxu0 %v435_v26  ;;  %v432_v28 = vsel %vm430_vm7, %v427_v27, %v411_v25  ;;  %v621_v27 = vunpack.c.l.bf16 %v620_v22 }
  0x94   : > { %455 = vmatpush1.bf16.msra.mxu0 %v432_v28 }
  0x95   : > { %v415_v29 = vpop.permute.xlu1 %414  ;;  %v413_v30 = vpop.permute.xlu0 %412 }
  0x96   : > { %v417_v31 = vsel %vm416_vm8, %v413_v30, %v415_v29  ;;  %747 = vmatprep.subr.msk.bf16.mxu0 %vm418_vm3, %v415_v29 }
  0x97   : > { %v449_v32 = vsel %vm418_vm3, %v417_v31, 0 }
  0x98   : > { %457 = vmatpush1.bf16.msra.mxu0 %v449_v32 }
  0x9b   : > { %748 = vmatmul.mubr.msk.bf16.vlgmr.msra.gmra.mrb[0].mxu0 %vm444_vm9, %v437_v33 }
  0xa6   : > { %v442_v39 = vpop.permute.xlu0 %441 }
 0x16e   : > { %v488_v40 = vpop.f32.mrb[0].mxu0 }
 0x16f   : > { %v489_v41 = vadd.f32 %v488_v40, %v442_v39  ;;  %v490_v42 = vpop.f32.mrb[1].mxu0 }
 0x170   : > { %v491_v43 = vadd.f32 %v490_v42, %v442_v39  ;;  %v492_v44 = vpop.f32.mrb[2].mxu0 }
 0x171   : > { %v513_v45 = vsel %vm503_vm10, %v489_v41, 0.0  ;;  %v493_v46 = vpop.f32.mrb[3].mxu0 }
 0x172   : > { %vm515_vm12 = vcmp.ge.f32.partialorder %v513_v45, 0.0  ;;  %v517_v47 = vmul.f32 0.1, %v513_v45  ;;  %v514_v48 = vsel %vm506_vm11, %v491_v43, 0.0 }
 0x173   : > { %vm516_vm13 = vcmp.ge.f32.partialorder %v514_v48, 0.0  ;;  %v518_v49 = vmul.f32 0.1, %v514_v48 }
 0x174   : > { %v519_v50 = vsel %vm515_vm12, %v513_v45, %v517_v47 }
 0x175   : > { %v520_v52 = vsel %vm516_vm13, %v514_v48, %v518_v49  ;;  %v523_v53 = vrot.slane %v519_v50, 4 }
 0x176   : > { %v803_v54 = vpack.i.bf16 %v520_v52, %v519_v50  ;;  %v524_v55 = vrot.slane %v520_v52, 4 }
 0x178   : > { %804 = vrot.lane.b32.xlu1 %v803_v54, %s858_s21  ;;  %v813_v56 = vpack.i.bf16 %v524_v55, %v523_v53 }
 0x17a   : > { %814 = vrot.lane.b32.xlu0 %v813_v56, %s853_s14 }
 0x17c   : > { %809 = vrot.lane.b32.xlu1 %v813_v56, %s860_s28 }
 0x17e   : > { %561 = vperm.xlu0 %802, %v558_v57  }
 0x180   : > { %819 = vrot.lane.b32.xlu1 %v803_v54, %s861_s29 }
 0x184   : > { %824 = vrot.lane.b32.xlu1 %v823_v60, %s862_s30 }
 0x1ea   : > { %v805_v61 = vpop.permute.xlu1 %804 }
 0x1eb   : > { %v807_v63 = vunpack.i.h.bf16 %v805_v61  ;;  %v806_v1 = vunpack.i.l.bf16 %v805_v61 }
 0x1ec   : > { %v815_v62 = vpop.permute.xlu0 %814 }
 0x1ed   : > { %v817_v3 = vunpack.i.h.bf16 %v815_v62  ;;  %v816_v4 = vunpack.i.l.bf16 %v815_v62  ;;  %v537_v8 = vsel %vm536_vm0, %v806_v1, %v807_v63 }
 0x1ee   : > { %v810_v5 = vpop.permute.xlu1 %809 }
 0x1ef   : > { %v812_v6 = vunpack.i.h.bf16 %v810_v5  ;;  %v811_v7 = vunpack.i.l.bf16 %v810_v5  ;;  %v544_v0 = vsel %vm394_vm2, %v816_v4, %v817_v3  ;;  %vm616_vm2 = vcmask 982016  }
 0x1f0   : > { %v554_v11 = vsel %vm425_vm5, %v537_v8, %v544_v0 }
 0x1f1   : > { %v530_v2 = vsel %vm529_vm15, %v811_v7, %v812_v6 }
 0x1f2   : > { %v820_v9 = vpop.permute.xlu1 %819  ;;  %v553_v10 = vsel %vm425_vm5, %v519_v50, %v530_v2 }
 0x1f3   : > { %v822_v12 = vunpack.i.h.bf16 %v820_v9  ;;  %v821_v13 = vunpack.i.l.bf16 %v820_v9  ;;  %v556_v14 = vpack.c.bf16 %v554_v11, %v553_v10 }
 0x1f5   : > { %760 = vmatpush3.bf16.msra.mxu1 %v556_v14  ;;  %v551_v15 = vsel %vm550_vm1, %v821_v13, %v822_v12 }
 0x1f6   : > { %761 = vmatprep.subr.bf16.mxu1 %v857_v51  ;;  %v557_v16 = vpack.c.bf16 %v551_v15, %v551_v15  ;;  %v825_v19 = vpop.permute.xlu1 %824 }
 0x1f7   : > { %v827_v20 = vunpack.i.h.bf16 %v825_v19  ;;  %v826_v21 = vunpack.i.l.bf16 %v825_v19 }
 0x1f8   : > { %v568_v17 = vsel %vm418_vm3, %v557_v16, 0 }
 0x1f9   : > { %762 = vmatpush3.bf16.msra.mxu1 %v568_v17  ;;  %v617_v25 = vsel %vm616_vm2, %v826_v21, %v827_v20 }
 0x1fc   : > { %764 = vmatmul.mubr.msk.bf16.vlgmr.msra.gmra.mrb[0].mxu1 %vm444_vm9, %v555_v18 }
 0x1fd   : > { %v562_v23 = vpop.permute.xlu0 %561 }
 0x2cf   : > { %v604_v24 = vpop.f32.mrb[0].mxu1 }
 0x2d0   : > { %v605_v26 = vadd.f32 %v604_v24, %v562_v23  ;;  %v765_v28 = vpop.f32.mrb[1].mxu1 }
 0x2d1   : > { %v607_v29 = vpop.f32.mrb[2].mxu1 }
 0x2d2   : > { %v619_v30 = vadd.f32 %v617_v25, %v605_v26  ;;  %v766_v31 = vpop.f32.mrb[3].mxu1 }
 0x2d4   : > { %v622_v32 = vadd.f32 %v621_v27, %v619_v30 }
 0x2d6   : > { %v623_v33 = vmul.f32 0.5, %v622_v32 }
 0x2d8   : > { %v624_v34 = vpack.c.bf16 %v623_v33, %v623_v33 }
 0x2da   : > { %625 = vst [vmem:[%s373_s15] sm:$0x3] %v624_v34 }
 0x2db PF: > { %s17_s26 = sadd.s32 1, %s850_s26   ;;  %s994_s24 = smov %s846_s25 }
 0x2dc   : > { %p14_p5 = scmp.ge.s32.totalorder %s17_s26, 4   ;;  %s995_s25 = smov %s997_s27 }
 0x2de   :  { %16 = sbr.rel (!%p14_p5) target bundleno = 2 (0x2), region = 84 }

// kernel: nsf_hifigan_forward.25
= control target key start
LH: loop header
LB: loop body
LE: loop exit
PB: predicated region body
PF: predicated region fallthrough
CT: control target
= control target key end

     0   :  { %s814_s21 = smov 0   ;;  %s816_s22 = smov 0   ;;  %s911_s0 = inlined_call_operand.vmem [shape: bf16[2,4,256], index: 0, kind: input, shape index: {}, may-alias: {0,1}]   ;;  %s912_s1 = inlined_call_operand.vmem [shape: bf16[2,4,256], index: 1, kind: input, shape index: {}, may-alias: {0,1}]   ;;  %s913_s2 = inlined_call_operand.vmem [shape: bf16[4,20], index: 2, kind: input, shape index: {}]   ;;  %s914_s3 = inlined_call_operand.vmem [shape: f32[4,1], index: 3, kind: input, shape index: {}]   ;;  %s915_s4 = inlined_call_operand.vmem [shape: bf16[4,20], index: 4, kind: input, shape index: {}]   ;;  %s916_s5 = inlined_call_operand.vmem [shape: f32[4,1], index: 5, kind: input, shape index: {}]   ;;  %s917_s6 = inlined_call_operand.vmem [shape: bf16[2,4,128], index: 6, kind: output, shape index: {}]  }
   0x1   :  { %s818_s23 = smov 0  }
   0x2 LB: > { %s28_s24 = sadd.s32 1, %s766_s22  ;;  %p665_p0 = scmp.ge.s32.totalorder %s770_s23, 1  ;;  %s770_s23 = sphi %s818_s23, %s16_s23   ;;  %s766_s22 = sphi %s816_s22, %s919_s22   ;;  %s762_s21 = sphi %s814_s21, %s918_s21  }
   0x3   : > { %p30_p1 = scmp.ge.s32.totalorder %s28_s24, 2  ;;  %p250_p2 = scmp.lt.s32.totalorder %s770_s23, 3 }
   0x5   : > { %s921_s24 = smov (%p30_p1, %s28_s24), 0  ;;  %p251_p3 = pnand %p665_p0, %p250_p2 }
   0x6   : > { %p294_p4 = scmp.lt.s32.totalorder (!%p251_p3), %s762_s21, 1  ;;  %s772_s9 = smov (!%p251_p3), 126   ;;  %v774_v10 = vmov (!%p251_p3), 0   ;;  %v383_v13 = vld [vmem:[%s914_s3] sm:$0xf] (!%p251_p3)  ;;  %vm339_vm2 = vcmask (!%p251_p3), 1039360   ;;  %v442_v34 = vlaneseq (!%p251_p3) }
   0x7   : > { %254 = sbr.rel (%p251_p3) target bundleno = 727 (0x2d7), region = 44  ;;  %s773_s10 = smov (!%p251_p3), 127   ;;  %431 = vmatprep.mubr.bf16.mxu0 (!%p251_p3), %v774_v10  ;;  %722 = vset.pattern.permute.xlu0 (!%p251_p3), %v774_v10  ;;  %vm363_vm3 = vcmask (!%p251_p3), 1041408   ;;  %vm347_vm4 = vcmask (!%p251_p3), 1031168   ;;  %vm370_vm5 = vcmask (!%p251_p3), 1043456   ;;  %vm355_vm6 = vcmask (!%p251_p3), 1022976  }
   0x8   : > { %s775_s11 = smov (!%p251_p3), 125   ;;  %s776_s12 = smov (!%p251_p3), 124   ;;  %vm375_vm7 = vcmask (!%p251_p3), 1045504   ;;  %vm361_vm8 = vcmask (!%p251_p3), 1014784   ;;  %v382_v33 = vld [vmem:[%s913_s2] sm:$0x3] (!%p251_p3) }
   0x9   : > { %vm389_vm9 = vcmask (!%p251_p3), 162816   ;;  %v443_v35 = vand.u32 (!%p251_p3), 127, %v442_v34  ;;  %v777_v51 = vmov (!%p251_p3), 0.0   ;;  %vm778_vm14 = vmmov (!%p251_p3), 0   ;;  %v503_v57 = vld [vmem:[%s916_s5] sm:$0xf] (!%p251_p3) }
   0xa   : > { %683 = vmatprep.subr.bf16.mxu1 (!%p251_p3), %v777_v51  ;;  %687 = vmatprep.mubr.msk.bf16.mxu1 (!%p251_p3), %vm778_vm14, %v777_v51 }
   0xb   : > { %v444_v36 = vadd.s32 (!%p251_p3), 128, %v443_v35  ;;  %v446_v37 = vadd.s32 (!%p251_p3), 4294967294, %v443_v35 }
   0xd   : > { %v447_v38 = vadd.s32 (!%p251_p3), 4294967294, %v444_v36  ;;  %vm448_vm10 = vcmp.ge.s32.totalorder (!%p251_p3), %v446_v37, 0 }
   0xe   : > { %s923_s21 = smov (!%p294_p4, %s762_s21), 1 }
   0xf   : > { %s676_s25 = sshll.u32 %s923_s21, 2  ;;  %vm451_vm11 = vcmp.lt.s32.totalorder %v447_v38, 128 }
  0x10   : > { %s301_s28 = scalar_lea.vmem %s911_s0, %s676_s25  ;;  %s678_s29 = sadd.s32 2, %s676_s25 }
  0x11   : > { %s310_s8 = scalar_lea.vmem %s912_s1, %s678_s29  ;;  %v841_v0 = vld [vmem:[%s301_s28] sm:$0x3]  ;;  %s670_s25 = sshll.u32 %s923_s21, 1 }
  0x12   : > { %vm325_vm0 = vcmp.ge.bf16.partialorder %v841_v0, 0  ;;  %v327_v1 = vmul.bf16 1036860877, %v841_v0  ;;  %v845_v2 = vld [vmem:[%s310_s8] sm:$0x3]  ;;  %v323_v58 = vunpack.c.l.bf16 %v841_v0  ;;  %s318_s28 = scalar_lea.vmem %s917_s6, %s670_s25 }
  0x13   : > { %vm326_vm1 = vcmp.ge.bf16.partialorder %v845_v2, 0  ;;  %v328_v3 = vmul.bf16 1036860877, %v845_v2  ;;  %v324_v59 = vunpack.c.l.bf16 %v845_v2 }
  0x14   : > { %v329_v4 = vsel %vm325_vm0, %v841_v0, %v327_v1 }
  0x15   : > { %v341_v5 = vrot.slane %v329_v4, 4  ;;  %v333_v6 = vrot.slane %v329_v4, 6  ;;  %v330_v7 = vsel %vm326_vm1, %v845_v2, %v328_v3  ;;  %v349_v12 = vrot.slane %v329_v4, 2 }
  0x16   : > { %v342_v8 = vrot.slane %v330_v7, 4  ;;  %v334_v9 = vrot.slane %v330_v7, 6  ;;  %v350_v11 = vrot.slane %v330_v7, 2  ;;  %v743_v60 = vpack.i.bf16 %v324_v59, %v323_v58 }
  0x17   : > { %343 = vrot.lane.b32.xlu1 %v341_v5, %s772_s9  ;;  %335 = vrot.lane.b32.xlu0 %v333_v6, %s773_s10 }
  0x1b   : > { %345 = vrot.lane.b32.xlu1 %v342_v8, %s772_s9  ;;  %337 = vrot.lane.b32.xlu0 %v334_v9, %s773_s10 }
  0x1f   : > { %353 = vrot.lane.b32.xlu1 %v350_v11, %s775_s11  ;;  %351 = vrot.lane.b32.xlu0 %v349_v12, %s775_s11 }
  0x23   : > { %359 = vrot.lane.b32.xlu1 %v330_v7, %s776_s12  ;;  %357 = vrot.lane.b32.xlu0 %v329_v4, %s776_s12 }
  0x27   : > { %386 = vperm.xlu0 %722, %v383_v13  }
  0x89   : > { %v344_v14 = vpop.permute.xlu1 %343  ;;  %v336_v15 = vpop.permute.xlu0 %335 }
  0x8d   : > { %v346_v16 = vpop.permute.xlu1 %345  ;;  %v338_v17 = vpop.permute.xlu0 %337 }
  0x8e   : > { %v340_v18 = vsel %vm339_vm2, %v336_v15, %v338_v17  ;;  %v369_v19 = vsel %vm363_vm3, %v330_v7, %v338_v17  ;;  %v348_v20 = vsel %vm347_vm4, %v344_v14, %v346_v16 }
  0x8f   : > { %v366_v21 = vsel %vm363_vm3, %v329_v4, %v340_v18  ;;  %v374_v24 = vsel %vm370_vm5, %v369_v19, %v346_v16  ;;  %v500_v18 = vld [vmem:[%s915_s4] sm:$0x3] }
  0x90   : > { %v372_v27 = vsel %vm370_vm5, %v366_v21, %v348_v20 }
  0x91   : > { %v354_v22 = vpop.permute.xlu1 %353  ;;  %v352_v23 = vpop.permute.xlu0 %351 }
  0x92   : > { %v356_v25 = vsel %vm355_vm6, %v352_v23, %v354_v22  ;;  %v380_v26 = vsel %vm375_vm7, %v374_v24, %v354_v22 }
  0x93   : > { %399 = vmatprep.subr.bf16.mxu0 %v380_v26  ;;  %v377_v28 = vsel %vm375_vm7, %v372_v27, %v356_v25 }
  0x94   : > { %400 = vmatpush1.bf16.msra.mxu0 %v377_v28 }
  0x95   : > { %v360_v29 = vpop.permute.xlu1 %359  ;;  %v358_v30 = vpop.permute.xlu0 %357 }
  0x96   : > { %v362_v31 = vsel %vm361_vm8, %v358_v30, %v360_v29  ;;  %671 = vmatprep.subr.msk.bf16.mxu0 %vm363_vm3, %v360_v29 }
  0x97   : > { %v394_v32 = vsel %vm363_vm3, %v362_v31, 0 }
  0x98   : > { %402 = vmatpush1.bf16.msra.mxu0 %v394_v32 }
  0x9b   : > { %672 = vmatmul.mubr.msk.bf16.vlgmr.msra.gmra.mrb[0].mxu0 %vm389_vm9, %v382_v33 }
  0xa6   : > { %v387_v39 = vpop.permute.xlu0 %386 }
 0x16e   : > { %v433_v40 = vpop.f32.mrb[0].mxu0 }
 0x16f   : > { %v434_v41 = vadd.f32 %v433_v40, %v387_v39  ;;  %v435_v42 = vpop.f32.mrb[1].mxu0 }
 0x170   : > { %v436_v43 = vadd.f32 %v435_v42, %v387_v39  ;;  %v437_v44 = vpop.f32.mrb[2].mxu0 }
 0x171   : > { %v458_v45 = vsel %vm448_vm10, %v434_v41, 0.0  ;;  %v438_v46 = vpop.f32.mrb[3].mxu0 }
 0x172   : > { %vm460_vm12 = vcmp.ge.f32.partialorder %v458_v45, 0.0  ;;  %v462_v47 = vmul.f32 0.1, %v458_v45  ;;  %v459_v48 = vsel %vm451_vm11, %v436_v43, 0.0 }
 0x173   : > { %vm461_vm13 = vcmp.ge.f32.partialorder %v459_v48, 0.0  ;;  %v463_v49 = vmul.f32 0.1, %v459_v48 }
 0x174   : > { %v464_v50 = vsel %vm460_vm12, %v458_v45, %v462_v47 }
 0x175   : > { %v465_v52 = vsel %vm461_vm13, %v459_v48, %v463_v49  ;;  %v468_v53 = vrot.slane %v464_v50, 4 }
 0x176   : > { %v723_v54 = vpack.i.bf16 %v465_v52, %v464_v50  ;;  %v469_v55 = vrot.slane %v465_v52, 4 }
 0x178   : > { %724 = vrot.lane.b32.xlu1 %v723_v54, %s772_s9  ;;  %v733_v56 = vpack.i.bf16 %v469_v55, %v468_v53 }
 0x17a   : > { %734 = vrot.lane.b32.xlu0 %v733_v56, %s775_s11 }
 0x17c   : > { %729 = vrot.lane.b32.xlu1 %v733_v56, %s773_s10 }
 0x17e   : > { %506 = vperm.xlu0 %722, %v503_v57  }
 0x180   : > { %739 = vrot.lane.b32.xlu1 %v723_v54, %s776_s12 }
 0x184   : > { %744 = vrot.lane.b32.xlu1 %v743_v60, %s776_s12 }
 0x1ea   : > { %v725_v61 = vpop.permute.xlu1 %724 }
 0x1eb   : > { %v727_v63 = vunpack.i.h.bf16 %v725_v61  ;;  %v726_v1 = vunpack.i.l.bf16 %v725_v61 }
 0x1ec   : > { %v735_v62 = vpop.permute.xlu0 %734 }
 0x1ed   : > { %v737_v3 = vunpack.i.h.bf16 %v735_v62  ;;  %v736_v4 = vunpack.i.l.bf16 %v735_v62  ;;  %v482_v2 = vsel %vm347_vm4, %v726_v1, %v727_v63 }
 0x1ee   : > { %v730_v5 = vpop.permute.xlu1 %729 }
 0x1ef   : > { %v732_v6 = vunpack.i.h.bf16 %v730_v5  ;;  %v731_v7 = vunpack.i.l.bf16 %v730_v5  ;;  %v489_v8 = vsel %vm355_vm6, %v736_v4, %v737_v3 }
 0x1f0   : > { %v499_v11 = vsel %vm370_vm5, %v482_v2, %v489_v8 }
 0x1f1   : > { %v475_v0 = vsel %vm339_vm2, %v731_v7, %v732_v6 }
 0x1f2   : > { %v740_v9 = vpop.permute.xlu1 %739  ;;  %v498_v10 = vsel %vm370_vm5, %v464_v50, %v475_v0 }
 0x1f3   : > { %v742_v12 = vunpack.i.h.bf16 %v740_v9  ;;  %v741_v13 = vunpack.i.l.bf16 %v740_v9  ;;  %v501_v14 = vpack.c.bf16 %v499_v11, %v498_v10 }
 0x1f5   : > { %684 = vmatpush3.bf16.msra.mxu1 %v501_v14  ;;  %v496_v15 = vsel %vm361_vm8, %v741_v13, %v742_v12 }
 0x1f6   : > { %685 = vmatprep.subr.bf16.mxu1 %v777_v51  ;;  %v502_v16 = vpack.c.bf16 %v496_v15, %v496_v15  ;;  %v745_v19 = vpop.permute.xlu1 %744 }
 0x1f7   : > { %v747_v20 = vunpack.i.h.bf16 %v745_v19  ;;  %v746_v21 = vunpack.i.l.bf16 %v745_v19 }
 0x1f8   : > { %v513_v17 = vsel %vm363_vm3, %v502_v16, 0 }
 0x1f9   : > { %686 = vmatpush3.bf16.msra.mxu1 %v513_v17  ;;  %v561_v24 = vsel %vm361_vm8, %v746_v21, %v747_v20 }
 0x1fc   : > { %688 = vmatmul.mubr.msk.bf16.vlgmr.msra.gmra.mrb[0].mxu1 %vm389_vm9, %v500_v18 }
 0x1fd   : > { %v507_v22 = vpop.permute.xlu0 %506 }
 0x2cf   : > { %v549_v23 = vpop.f32.mrb[0].mxu1 }
 0x2d0   : > { %v550_v25 = vadd.f32 %v549_v23, %v507_v22  ;;  %v689_v26 = vpop.f32.mrb[1].mxu1 }
 0x2d1   : > { %v552_v27 = vpop.f32.mrb[2].mxu1 }
 0x2d2   : > { %v563_v28 = vadd.f32 %v561_v24, %v550_v25  ;;  %v690_v29 = vpop.f32.mrb[3].mxu1 }
 0x2d4   : > { %v564_v30 = vpack.c.bf16 %v563_v28, %v563_v28 }
 0x2d6   : > { %565 = vst [vmem:[%s318_s28] sm:$0x3] %v564_v30 }
 0x2d7 PF: > { %s16_s23 = sadd.s32 1, %s770_s23   ;;  %s918_s21 = smov %s766_s22 }
 0x2d8   : > { %p13_p5 = scmp.ge.s32.totalorder %s16_s23, 4   ;;  %s919_s22 = smov %s921_s24 }
 0x2da   :  { %15 = sbr.rel (!%p13_p5) target bundleno = 2 (0x2), region = 77 }

// kernel: nsf_hifigan_forward.29
= control target key start
LH: loop header
LB: loop body
LE: loop exit
PB: predicated region body
PF: predicated region fallthrough
CT: control target
= control target key end

     0   :  { %s828_s0 = inlined_call_operand.vmem [shape: bf16[2,4,256], index: 0, kind: input, shape index: {}, may-alias: {0,1}]   ;;  %s829_s1 = inlined_call_operand.vmem [shape: bf16[2,4,256], index: 1, kind: input, shape index: {}, may-alias: {0,1}]   ;;  %s830_s2 = inlined_call_operand.vmem [shape: bf16[1,28], index: 2, kind: input, shape index: {}]   ;;  %s831_s3 = inlined_call_operand.<no memory space> [shape: f32[1,1], index: 3, kind: input, shape index: {}]   ;;  %s832_s4 = inlined_call_operand.hbm [shape: f32[2,1,128], index: 4, kind: output, shape index: {}]  }
   0x1   :  { %v9_v0 = vstv %s831_s3 }
   0x2   :  { %10 = vst [vmem:[#allocation2] sm:$0x1] %v9_v0 }
   0x3   :  { %11 = vsyncpa [#allocation4], 0 }
   0x4   :  { %13 = vsyncpa [#allocation4 + $0x1], 0  ;;  %s704_s17 = smov 0   ;;  %s706_s18 = smov 0  }
   0x5   :  { %s708_s19 = smov 0   ;;  %s710_s20 = smov 0  }
   0x6   :  { %s712_s21 = smov 0   ;;  %s714_s22 = smov 0  }
   0x7 LB: > { %s491_s3 = sadd.s32 4294967295, %s664_s22   ;;  %s492_s23 = sadd.s32 4294967294, %s664_s22   ;;  %s664_s22 = sphi %s714_s22, %s19_s22   ;;  %s660_s21 = sphi %s712_s21, %s839_s21   ;;  %s656_s20 = sphi %s710_s20, %s838_s20   ;;  %s652_s19 = sphi %s708_s19, %s837_s19   ;;  %s648_s18 = sphi %s706_s18, %s836_s18   ;;  %s644_s17 = sphi %s704_s17, %s835_s17  }
   0x8   : > { %s31_s24 = sadd.s32 1, %s660_s21  ;;  %s140_s25 = sadd.s32 1, %s652_s19 }
   0x9   : > { %p33_p0 = scmp.ge.s32.totalorder %s31_s24, 2  ;;  %p150_p1 = scmp.ne.s32.totalorder %s652_s19, %s648_s18 }
   0xa   : > { %p151_p2 = scmp.eq.s32.totalorder %s491_s3, 1  ;;  %p156_p3 = scmp.ne.s32.totalorder %s648_s18, %s644_s17 }
   0xb   : > { %s841_s24 = smov (%p33_p0, %s31_s24), 0  ;;  %p157_p5 = scmp.eq.s32.totalorder %s492_s23, 1 }
   0xc   : > { %p744_p4 = por %p151_p2, %p150_p1  ;;  %s135_s27 = ssub.s32 %s660_s21, %s841_s24 }
   0xd   : > { %p495_p6 = scmp.ge.s32.totalorder %s664_s22, 1  ;;  %p138_p7 = scmp.eq.s32.totalorder %s135_s27, 0 }
   0xe   : > { %p751_p8 = por %p157_p5, %p156_p3  ;;  %p205_p9 = scmp.lt.s32.totalorder %s664_s22, 3 }
   0xf   : > { %s757_s29 = scalar_select %p138_p7, %s652_s19, %s140_s25  }
  0x10   : > { %p206_p10 = pnand %p495_p6, %p205_p9 }
  0x11   : > { %p242_p11 = scmp.lt.s32.totalorder (!%p206_p10), %s656_s20, 1  ;;  %s666_s13 = smov (!%p206_p10), 124   ;;  %v667_v9 = vmov (!%p206_p10), 0.0   ;;  %vm671_vm2 = vmmov (!%p206_p10), 0   ;;  %v672_v14 = vmov (!%p206_p10), 0   ;;  %vm278_vm3 = vcmask (!%p206_p10), 1039360  }
  0x12   : > { %209 = sbr.rel (%p206_p10) target bundleno = 414 (0x19e), region = 36  ;;  %511 = vmatprep.subr.bf16.mxu0 (!%p206_p10), %v667_v9  ;;  %s668_s14 = smov (!%p206_p10), 127   ;;  %515 = vmatprep.mubr.msk.bf16.mxu0 (!%p206_p10), %vm671_vm2, %v667_v9  ;;  %v331_v15 = vld [vmem:[#allocation2] sm:$0x1] (!%p206_p10)  ;;  %vm286_vm4 = vcmask (!%p206_p10), 1031168   ;;  %vm314_vm5 = vcmask (!%p206_p10), 1041408   ;;  %v337_v41 = vlaneseq (!%p206_p10) }
  0x13   : > { %s669_s15 = smov (!%p206_p10), 126   ;;  %s670_s16 = smov (!%p206_p10), 125   ;;  %583 = vset.pattern.permute.xlu0 (!%p206_p10), %v672_v14  ;;  %vm294_vm6 = vcmask (!%p206_p10), 1022976   ;;  %vm318_vm7 = vcmask (!%p206_p10), 1043456   ;;  %vm321_vm8 = vcmask (!%p206_p10), 1045504   ;;  %vm306_vm9 = vcmask (!%p206_p10), 1006592  }
  0x14   : > { %s673_s3 = smov (!%p206_p10), 123   ;;  %s674_s23 = smov (!%p206_p10), 122   ;;  %vm300_vm10 = vcmask (!%p206_p10), 1014784   ;;  %vm312_vm11 = vcmask (!%p206_p10), 998400   ;;  %v330_v40 = vld [vmem:[%s830_s2] sm:$0x1] (!%p206_p10) }
  0x15   : > { %vm341_vm12 = vcmask (!%p206_p10), 228352   ;;  %v338_v42 = vshrl.u32 (!%p206_p10), %v337_v41, 7 }
  0x17   : > { %v339_v43 = vsub.s32 (!%p206_p10), 0, %v338_v42 }
  0x19   : > { %s243_s30 = scalar_select %p242_p11, %s656_s20, 1 }
  0x1b   : > { %s504_s5 = sshll.u32 %s243_s30, 2  ;;  %s240_s30 = sand.u32 1, %s648_s18  }
  0x1c   : > { %s249_s8 = scalar_lea.vmem %s828_s0, %s504_s5  ;;  %s506_s9 = sadd.s32 2, %s504_s5 }
  0x1d   : > { %v262_v1 = vld [vmem:[%s249_s8] sm:$0x3]  ;;  %s258_s12 = scalar_lea.vmem %s829_s1, %s506_s9  ;;  %s501_s5 = sshll.u32 %s656_s20, 4 }
  0x1e   : > { %vm264_vm0 = vcmp.ge.bf16.partialorder %v262_v1, 0  ;;  %v266_v2 = vmul.bf16 1009007652, %v262_v1  ;;  %v263_v3 = vld [vmem:[%s258_s12] sm:$0x3]  ;;  %s241_s6 = scalar_lea.vmem [#allocation3], %s240_s30  ;;  %s781_s10 = scalar_lea.hbm %s832_s4, %s501_s5 }
  0x1f   : > { %vm265_vm1 = vcmp.ge.bf16.partialorder %v263_v3, 0  ;;  %v267_v4 = vmul.bf16 1009007652, %v263_v3  ;;  %s403_s7 = sshll.u32 %s241_s6, 4  ;;  %s390_s11 = scalar_lea.sflag [#allocation4], %s240_s30  ;;  %s783_s7 = int_to_ptr.vmem [resolvable:$true] %s403_s7 }
  0x20   : > { %v268_v5 = vsel %vm264_vm0, %v262_v1, %v266_v2  ;;  %s586_s12 = scalar_lea.vmem %s783_s7, 16  ;;  %s675_s20 = smov [#allocation3]  }
  0x21   : > { %296 = vrot.lane.b32.xlu0 %v268_v5, %s666_s13  ;;  %v269_v6 = vsel %vm265_vm1, %v263_v3, %v267_v4  ;;  %v272_v7 = vrot.slane %v268_v5, 6  ;;  %v280_v8 = vrot.slane %v268_v5, 4  ;;  %v288_v10 = vrot.slane %v268_v5, 2  ;;  %p587_p12 = scmp.ne.s32.totalorder %s783_s7, %s586_s12 }
  0x22   : > { %298 = vrot.lane.b32.xlu1 %v269_v6, %s666_s13  ;;  %v281_v11 = vrot.slane %v269_v6, 4  ;;  %v273_v12 = vrot.slane %v269_v6, 6  ;;  %v289_v13 = vrot.slane %v269_v6, 2  ;;  %s590_s13 = sshll.u32 %s675_s20, 4  ;;  %s591_s13 = int_to_ptr.vmem [resolvable:$false] %s590_s13 }
  0x23   : > { %p588_p13 = pnand %p587_p12, %p744_p4  ;;  %p593_p1 = scmp.lt.s32.totalorder %s783_s7, %s591_s13 }
  0x25   : > { %274 = vrot.lane.b32.xlu0 %v272_v7, %s668_s14  ;;  %p589_p0 = pneg %p588_p13 }
  0x26   : > { %282 = vrot.lane.b32.xlu1 %v280_v8, %s669_s15 }
  0x29   : > { %290 = vrot.lane.b32.xlu0 %v288_v10, %s670_s16 }
  0x2a   : > { %284 = vrot.lane.b32.xlu1 %v281_v11, %s669_s15 }
  0x2d   : > { %276 = vrot.lane.b32.xlu0 %v273_v12, %s668_s14  ;;  %s592_s14 = scalar_lea.vmem %s591_s13, 32 }
  0x2e   : > { %292 = vrot.lane.b32.xlu1 %v289_v13, %s670_s16  ;;  %p594_p2 = scmp.lt.s32.totalorder %s592_s14, %s586_s12 }
  0x30   : > { %p595_p3 = por %p594_p2, %p593_p1 }
  0x31   : > { %302 = vrot.lane.b32.xlu0 %v272_v7, %s673_s3 }
  0x32   : > { %304 = vrot.lane.b32.xlu1 %v273_v12, %s673_s3  ;;  %p596_p5 = pnand %p595_p3, %p589_p0 }
  0x35   : > { %308 = vrot.lane.b32.xlu0 %v280_v8, %s674_s23 }
  0x36   : > { %310 = vrot.lane.b32.xlu1 %v281_v11, %s674_s23 }
  0x39   : > { %334 = vperm.xlu0 %583, %v331_v15  }
  0x93   : > { %v297_v16 = vpop.permute.xlu0 %296 }
  0x94   : > { %v299_v17 = vpop.permute.xlu1 %298 }
  0x95   : > { %v301_v34 = vsel %vm300_vm10, %v297_v16, %v299_v17 }
  0x97   : > { %v275_v18 = vpop.permute.xlu0 %274 }
  0x98   : > { %v283_v19 = vpop.permute.xlu1 %282 }
  0x9b   : > { %v291_v20 = vpop.permute.xlu0 %290 }
  0x9c   : > { %v285_v21 = vpop.permute.xlu1 %284 }
  0x9d   : > { %v287_v25 = vsel %vm286_vm4, %v283_v19, %v285_v21 }
  0x9f   : > { %v277_v22 = vpop.permute.xlu0 %276 }
  0xa0   : > { %v279_v23 = vsel %vm278_vm3, %v275_v18, %v277_v22  ;;  %v293_v24 = vpop.permute.xlu1 %292 }
  0xa1   : > { %v317_v26 = vsel %vm314_vm5, %v268_v5, %v279_v23  ;;  %v295_v27 = vsel %vm294_vm6, %v291_v20, %v293_v24 }
  0xa2   : > { %v320_v28 = vsel %vm318_vm7, %v317_v26, %v287_v25 }
  0xa3   : > { %v323_v29 = vsel %vm321_vm8, %v320_v28, %v295_v27  ;;  %v303_v30 = vpop.permute.xlu0 %302 }
  0xa4   : > { %v305_v31 = vpop.permute.xlu1 %304  ;;  %512 = vmatpush3.bf16.msra.mxu0 %v323_v29 }
  0xa5   : > { %513 = vmatprep.subr.bf16.mxu0 %v667_v9  ;;  %v307_v32 = vsel %vm306_vm9, %v303_v30, %v305_v31 }
  0xa6   : > { %v327_v36 = vsel %vm314_vm5, %v301_v34, %v307_v32 }
  0xa7   : > { %v309_v33 = vpop.permute.xlu0 %308 }
  0xa8   : > { %v311_v35 = vpop.permute.xlu1 %310 }
  0xa9   : > { %v313_v37 = vsel %vm312_vm11, %v309_v33, %v311_v35 }
  0xaa   : > { %v329_v38 = vsel %vm318_vm7, %v327_v36, %v313_v37 }
  0xab   : > { %v345_v39 = vsel %vm321_vm8, %v329_v38, 0 }
  0xac   : > { %514 = vmatpush3.bf16.msra.mxu0 %v345_v39 }
  0xaf   : > { %516 = vmatmul.mubr.msk.bf16.vlgmr.msra.gmra.mrb[0].mxu0 %vm341_vm12, %v330_v40 }
  0xb8   : > { %v335_v44 = vpop.permute.xlu0 %334 }
  0xb9   : > { %v340_v45 = vrot.slane %v335_v44, %v339_v43 }
 0x182   : > { %v381_v46 = vpop.f32.mrb[0].mxu0 }
 0x183   : > { %v382_v47 = vadd.f32 %v381_v46, %v340_v45  ;;  %v517_v48 = vpop.f32.mrb[1].mxu0 }
 0x184   : > { %v384_v49 = vpop.f32.mrb[2].mxu0 }
 0x185   : > { %584 = vtanh.f32 %v382_v47  ;;  %v518_v50 = vpop.f32.mrb[3].mxu0 }
 0x18f   : > { %v585_v51 = vpop.eup %584 }
 0x190   : > { %388 = vst [vmem:[%s241_s6] sm:$0x1] %v585_v51 }
 0x191   : > { %599 = shalt.err (!%p596_p5)
}
 0x192   : > { %s600_s15 = scalar_lea.hbm %s781_s10, 16  ;;  %s604_s23 = scalar_lea.hbm %s832_s4, 32 }
 0x193   : > { %p601_p6 = scmp.ne.s32.totalorder %s781_s10, %s600_s15  ;;  %p605_p10 = scmp.lt.u32.totalorder %s781_s10, %s832_s4 }
 0x194   : > { %p606_p11 = scmp.lt.u32.totalorder %s604_s23, %s600_s15  ;;  %p608_p13 = scmp.lt.u32.totalorder %s600_s15, %s781_s10 }
 0x195   : > { %p602_p7 = pnand %p601_p6, %p744_p4 }
 0x196   : > { %p607_p12 = por %p606_p11, %p605_p10 }
 0x197   : > { %p603_p9 = pneg %p602_p7 }
 0x198   : > { %p609_p0 = por %p608_p13, %p607_p12 }
 0x19a   : > { %p610_p1 = pnand %p609_p0, %p603_p9 }
 0x19c   : > { %613 = shalt.err (!%p610_p1)
}
 0x19d   : > { %519 = dma.vmem_to_hbm [thread:$0]  (%p744_p4), %s783_s7, 16, %s781_s10, %s390_s11  }
 0x19e PF: > { %p525_p2 = scmp.ge.s32.totalorder %s664_s22, 2  ;;  %s415_s30 = sand.u32 1, %s644_s17  }
 0x19f   : > { %s416_s5 = scalar_lea.sflag [#allocation4], %s415_s30 }
 0x1a0   : > { %p522_p3 = pnand %p525_p2, %p751_p8 }
 0x1a2   : > { %639 = dma.done.wait (!%p522_p3), %s416_s5, 16  }
 0x1a3   : > { %641 = vsyncadd (!%p522_p3), %s416_s5, 4294967280  ;;  %s19_s22 = sadd.s32 1, %s664_s22   ;;  %s835_s17 = smov %s648_s18 }
 0x1a4   : > { %p16_p5 = scmp.ge.s32.totalorder %s19_s22, 4   ;;  %s836_s18 = smov %s652_s19 }
 0x1a5   : > { %s837_s19 = smov %s757_s29  ;;  %s838_s20 = smov %s660_s21 }
 0x1a6   : > { %s839_s21 = smov %s841_s24  ;;  %18 = sbr.rel (!%p16_p5) target bundleno = 7 (0x7), region = 74 }
 0x1ad   :  { %420 = vsyncpa [#allocation4], 1 }
 0x1ae   :  { %422 = vsyncpa [#allocation4 + $0x1], 1 }

</bundles_post_ra>
